<compile_context>
chip_gen: v7x
topology: tpu7x:2x2x1
jax: 0.10.0
libtpu: 0.0.40
codegen_flags: <defaults>
</compile_context>

<pallas_src>
import functools

import jax
import jax.numpy as jnp
from jax.experimental import pallas as pl
from jax.experimental.pallas import tpu as pltpu


def _patch_expand_kernel(x_ref, w_ref, g_ref, b_ref, o_ref, *, eps):
    # x_ref: [TR, W, D]       row tile of input tokens (D = dim)
    # w_ref: [2, D, D]        expand weight split into its two p1 halves (resident)
    # g_ref/b_ref: [1, D]     LayerNorm affine tiled over the two p2 chunks (f32)
    # o_ref: [TR, 2, W, D]    fused-scatter output (row 2h+p1 <- half p1)
    tr, wdim, d = x_ref.shape
    c_sub = d // 2                       # LayerNorm width (dim // 2)
    n = tr * wdim

    xv = x_ref[...].reshape(n, d)
    gamma = g_ref[...]                   # [1, d] f32
    beta = b_ref[...]                    # [1, d] f32
    inv_c = jnp.float32(1.0 / c_sub)

    # Lane mask selecting the second c_sub chunk (p2 == 1) of each half.
    lane = jax.lax.broadcasted_iota(jnp.int32, (1, d), 1)
    m1 = lane >= c_sub                   # [1, d] bool
    m1f = m1.astype(jnp.float32)

    for p1 in range(2):                  # half p1 -> output row 2h + p1
        # Expand half p1 on the MXU with f32 accumulation.
        y = jnp.dot(xv, w_ref[p1], preferred_element_type=jnp.float32)  # [n, d]
        yy = y * y
        # Group sums via full-lane reductions (group0 = total - group1): no
        # lane-unaligned slicing for Swin dims where c_sub is not 128-aligned.
        s_all = jnp.sum(y, axis=-1, keepdims=True)
        q_all = jnp.sum(yy, axis=-1, keepdims=True)
        s_g1 = jnp.sum(y * m1f, axis=-1, keepdims=True)
        q_g1 = jnp.sum(yy * m1f, axis=-1, keepdims=True)
        mu1 = s_g1 * inv_c
        mu0 = (s_all - s_g1) * inv_c
        # One-pass variance, clamped for safety; rsqrt runs on the EUP slot.
        inv1 = jax.lax.rsqrt(jnp.maximum(q_g1 * inv_c - mu1 * mu1, 0.0) + eps)
        inv0 = jax.lax.rsqrt(jnp.maximum((q_all - q_g1) * inv_c - mu0 * mu0, 0.0) + eps)
        # Broadcast per-group stats back across lanes (select, no slicing).
        inv_f = jnp.where(m1, inv1, inv0)                    # [n, d]
        a_f = jnp.where(m1, mu1 * inv1, mu0 * inv0)          # mean * inv, per group
        scale = inv_f * gamma
        shift = beta - a_f * gamma
        out = y * scale + shift
        # Single unmasked, lane-dense store of the whole half.
        o_ref[:, p1, :, :] = out.reshape(tr, wdim, d).astype(o_ref.dtype)


def _vmem_capacity_bytes():
    try:
        return int(pltpu.get_tpu_info().vmem_capacity_bytes)
    except Exception:
        return 64 * 1024 * 1024          # conservative default (v7x per-TC VMEM)


def patch_expand_forward(x, w_expand, gamma, beta, input_resolution, *,
                         eps=1e-5, block_tokens=None, out_dtype=None):
    """Swin PatchExpand forward.

    x:         [B, H*W, dim]
    w_expand:  [dim, 2*dim]  (transpose of torch nn.Linear(dim, 2*dim).weight)
    gamma/beta:[dim//2]      LayerNorm affine
    returns:   [B, 4*H*W, dim//2]
    """
    B, L, D = x.shape
    H, W = input_resolution
    assert L == H * W, "input feature has wrong size"
    assert D % 2 == 0
    c_sub = D // 2
    BH = B * H
    out_dtype = x.dtype if out_dtype is None else out_dtype

    # ---- host-side one-off operand prep (tiny) ----
    x3 = x.reshape(BH, W, D)
    # Split weight into p1 halves so the kernel never lane-slices the 2*dim result.
    w_stack = jnp.stack([w_expand[:, :D], w_expand[:, D:]], axis=0).astype(x.dtype)
    # Affine tiled over the two p2 chunks of each half; stats stay f32.
    gamma_f = jnp.tile(gamma.astype(jnp.float32).reshape(-1), 2).reshape(1, D)
    beta_f = jnp.tile(beta.astype(jnp.float32).reshape(-1), 2).reshape(1, D)

    # ---- generation-aware tile sizing from VMEM capacity ----
    cap = _vmem_capacity_bytes()
    vmem_limit = int(max(16 << 20, min(cap // 2, 96 << 20)))   # ~32MiB v7x, 64MiB v5e/v6e
    if block_tokens is None:
        block_tokens = 1024 if cap >= (100 << 20) else 512
    in_b = jnp.dtype(x.dtype).itemsize
    out_b = jnp.dtype(out_dtype).itemsize
    fixed = 4 * D * D * in_b + 4 * D * 4                       # weight stack + affine
    # Per B*H-row VMEM: double-buffered in/out tiles + ~8 full-width f32 temps.
    per_row = W * D * (2 * in_b + 4 * out_b + 8 * 4)
    tr = int(max(vmem_limit - fixed, per_row) // per_row)
    tr = max(1, min(tr, BH, max(1, block_tokens // W)))
    grid = (pl.cdiv(BH, tr),)
    # Note: a trailing partial tile computes stats on padded garbage rows that
    # are discarded on writeback (correct; no traps on TPU).
    # TODO(synk): add a second "parallel" W-tile grid axis if a single row
    # [W, dim] ever exceeds the per-row VMEM budget (not needed for Swin sizes).

    kernel = functools.partial(_patch_expand_kernel, eps=eps)

    def run(resident_single_buffer):
        def resident(shape):
            idx = lambda i: (0,) * len(shape)
            if resident_single_buffer:
                # Constant index_map => one buffer; frees VMEM for bigger row tiles.
                return pl.BlockSpec(shape, idx, pipeline_mode=pl.Buffered(1))
            return pl.BlockSpec(shape, idx)

        return pl.pallas_call(
            kernel,
            out_shape=jax.ShapeDtypeStruct((BH, 2, W, D), out_dtype),
            grid_spec=pltpu.PrefetchScalarGridSpec(
                num_scalar_prefetch=0,
                grid=grid,
                in_specs=[
                    pl.BlockSpec((tr, W, D), lambda i: (i, 0, 0)),  # pipelined rows
                    resident((2, D, D)),                            # weight halves
                    resident((1, D)),                               # gamma (tiled)
                    resident((1, D)),                               # beta (tiled)
                ],
                out_specs=pl.BlockSpec((tr, 2, W, D), lambda i: (i, 0, 0, 0)),
            ),
            compiler_params=pltpu.CompilerParams(
                dimension_semantics=("parallel",),   # independent tiles; v7x 2-TC shard
                vmem_limit_bytes=vmem_limit,
            ),
        )(x3, w_stack, gamma_f, beta_f)

    try:
        y4 = run(resident_single_buffer=True)
    except Exception:
        # pipeline_mode / Buffered(1) support varies across Pallas versions;
        # fall back to default double-buffering rather than failing.
        y4 = run(resident_single_buffer=False)

    # Free reshape: [B*H, 2, W, dim] is bit-identical to [B, 2H, 2W, dim//2].
    return y4.reshape(B, 4 * H * W, c_sub)


def reference_forward(x, w_expand, gamma, beta, input_resolution, eps=1e-5):
    """Pure-JAX reference of the PyTorch PatchExpand forward."""
    B, L, D = x.shape
    H, W = input_resolution
    c_sub = D // 2
    y = jnp.einsum("blc,cd->bld", x, w_expand)                  # Linear, no bias
    y = y.reshape(B, H, W, 2, 2, c_sub).transpose(0, 1, 3, 2, 4, 5)
    y = y.reshape(B, 4 * H * W, c_sub)
    mu = y.mean(-1, keepdims=True)
    var = ((y - mu) ** 2).mean(-1, keepdims=True)
    return (y - mu) / jnp.sqrt(var + eps) * gamma + beta


if __name__ == "__main__":
    # Small shapes consistent with the module: input_resolution=(8, 8),
    # dim=32, batch=2  ->  x: [2, 64, 32], output: [2, 256, 16].
    B, dim = 2, 32
    H = W = 8

    key = jax.random.PRNGKey(0)
    kx, kw, kg, kb = jax.random.split(key, 4)

    x = jax.random.normal(kx, (B, H * W, dim), dtype=jnp.float32)
    # torch nn.Linear(dim, 2*dim, bias=False).weight layout is [2*dim, dim].
    w_pt = jax.random.normal(kw, (2 * dim, dim), dtype=jnp.float32) * 0.02
    w_expand = w_pt.T                                           # [dim, 2*dim]
    gamma = 1.0 + 0.1 * jax.random.normal(kg, (dim // 2,), dtype=jnp.float32)
    beta = 0.1 * jax.random.normal(kb, (dim // 2,), dtype=jnp.float32)

    # block_tokens=64 forces a multi-step (tiled, pipelined) grid at this size.
    out = patch_expand_forward(x, w_expand, gamma, beta, (H, W), block_tokens=64)
    out = jax.block_until_ready(out)

    ref = reference_forward(x, w_expand, gamma, beta, (H, W))
    assert out.shape == (B, 4 * H * W, dim // 2)
    err = float(jnp.max(jnp.abs(out - ref)))
    assert jnp.allclose(out, ref, atol=1e-3, rtol=1e-3), err

    # bf16 I/O path (recommended for production: the op is HBM-bandwidth bound);
    # matmul accumulation and LayerNorm statistics stay f32 inside the kernel.
    out_bf16 = patch_expand_forward(
        x.astype(jnp.bfloat16), w_expand.astype(jnp.bfloat16), gamma, beta,
        (H, W), block_tokens=64)
    out_bf16 = jax.block_until_ready(out_bf16)
    assert jnp.allclose(out_bf16.astype(jnp.float32), ref, atol=2e-1, rtol=2e-1)

    print("KERNEL_OK")
</pallas_src>

<mosaic_0001>
module attributes {stable_mosaic.version = 11 : i64} {
  func.func @_patch_expand_kernel(%arg0: i32, %arg1: memref<8x8x32xf32, #tpu.memory_space<vmem>>, %arg2: memref<2x32x32xf32, #tpu.memory_space<vmem>>, %arg3: memref<1x32xf32, #tpu.memory_space<vmem>>, %arg4: memref<1x32xf32, #tpu.memory_space<vmem>>, %arg5: memref<8x2x8x32xf32, #tpu.memory_space<vmem>>) attributes {dimension_semantics = [#tpu.dimension_semantics<parallel>], iteration_bounds = array<i64: 2>, scalar_prefetch = 0 : i64, scratch_operands = 0 : i64, tpu.core_type = #tpu.core_type<tc>, window_params = [{transform_indices = @transform_0, window_bounds = array<i64: 8, 8, 32>}, {pipeline_mode = #tpu.pipeline_mode<synchronous>, transform_indices = @transform_1, window_bounds = array<i64: 2, 32, 32>}, {pipeline_mode = #tpu.pipeline_mode<synchronous>, transform_indices = @transform_2, window_bounds = array<i64: 1, 32>}, {pipeline_mode = #tpu.pipeline_mode<synchronous>, transform_indices = @transform_3, window_bounds = array<i64: 1, 32>}, {transform_indices = @transform_4, window_bounds = array<i64: 8, 2, 8, 32>}]} {
    %c0 = arith.constant 0 : index
    %c0_0 = arith.constant 0 : index
    %c0_1 = arith.constant 0 : index
    %0 = vector.load %arg1[%c0, %c0_0, %c0_1] : memref<8x8x32xf32, #tpu.memory_space<vmem>>, vector<8x8x32xf32>
    %1 = vector.shape_cast %0 : vector<8x8x32xf32> to vector<64x32xf32>
    %c0_2 = arith.constant 0 : index
    %c0_3 = arith.constant 0 : index
    %2 = vector.load %arg3[%c0_2, %c0_3] : memref<1x32xf32, #tpu.memory_space<vmem>>, vector<1x32xf32>
    %c0_4 = arith.constant 0 : index
    %c0_5 = arith.constant 0 : index
    %3 = vector.load %arg4[%c0_4, %c0_5] : memref<1x32xf32, #tpu.memory_space<vmem>>, vector<1x32xf32>
    %4 = tpu.iota {dimensions = array<i32: 1>} : vector<1x32xi32>
    %c16_i32 = arith.constant 16 : i32
    %5 = vector.broadcast %c16_i32 : i32 to vector<1x32xi32>
    %6 = arith.cmpi sge, %4, %5 : vector<1x32xi32>
    %7 = arith.extui %6 : vector<1x32xi1> to vector<1x32xi32>
    %8 = arith.sitofp %7 : vector<1x32xi32> to vector<1x32xf32>
    %c0_6 = arith.constant 0 : index
    %c0_7 = arith.constant 0 : index
    %c0_8 = arith.constant 0 : index
    %9 = vector.load %arg2[%c0_6, %c0_7, %c0_8] : memref<2x32x32xf32, #tpu.memory_space<vmem>>, vector<1x32x32xf32>
    %10 = vector.shape_cast %9 : vector<1x32x32xf32> to vector<32x32xf32>
    %cst = arith.constant dense<0.000000e+00> : vector<64x32xf32>
    %11 = tpu.matmul %1, %10, %cst {dimension_numbers = #tpu.dot_dimension_numbers<[1], [0], [0], [1], [0, 0, 1, 1], [], []>} : vector<64x32xf32>, vector<32x32xf32>, vector<64x32xf32> -> vector<64x32xf32>
    %12 = arith.mulf %11, %11 : vector<64x32xf32>
    %cst_9 = arith.constant dense<0.000000e+00> : vector<64xf32>
    %13 = vector.multi_reduction <add>, %11, %cst_9 [1] : vector<64x32xf32> to vector<64xf32>
    %14 = vector.shape_cast %13 : vector<64xf32> to vector<64x1xf32>
    %cst_10 = arith.constant dense<0.000000e+00> : vector<64xf32>
    %15 = vector.multi_reduction <add>, %12, %cst_10 [1] : vector<64x32xf32> to vector<64xf32>
    %16 = vector.shape_cast %15 : vector<64xf32> to vector<64x1xf32>
    %17 = vector.broadcast %8 : vector<1x32xf32> to vector<64x32xf32>
    %18 = arith.mulf %11, %17 : vector<64x32xf32>
    %cst_11 = arith.constant dense<0.000000e+00> : vector<64xf32>
    %19 = vector.multi_reduction <add>, %18, %cst_11 [1] : vector<64x32xf32> to vector<64xf32>
    %20 = vector.shape_cast %19 : vector<64xf32> to vector<64x1xf32>
    %21 = vector.broadcast %8 : vector<1x32xf32> to vector<64x32xf32>
    %22 = arith.mulf %12, %21 : vector<64x32xf32>
    %cst_12 = arith.constant dense<0.000000e+00> : vector<64xf32>
    %23 = vector.multi_reduction <add>, %22, %cst_12 [1] : vector<64x32xf32> to vector<64xf32>
    %24 = vector.shape_cast %23 : vector<64xf32> to vector<64x1xf32>
    %cst_13 = arith.constant 6.250000e-02 : f32
    %25 = vector.broadcast %cst_13 : f32 to vector<64x1xf32>
    %26 = arith.mulf %20, %25 : vector<64x1xf32>
    %27 = arith.subf %14, %20 : vector<64x1xf32>
    %cst_14 = arith.constant 6.250000e-02 : f32
    %28 = vector.broadcast %cst_14 : f32 to vector<64x1xf32>
    %29 = arith.mulf %27, %28 : vector<64x1xf32>
    %cst_15 = arith.constant 6.250000e-02 : f32
    %30 = vector.broadcast %cst_15 : f32 to vector<64x1xf32>
    %31 = arith.mulf %24, %30 : vector<64x1xf32>
    %32 = arith.mulf %26, %26 : vector<64x1xf32>
    %33 = arith.subf %31, %32 : vector<64x1xf32>
    %cst_16 = arith.constant 0.000000e+00 : f32
    %34 = vector.broadcast %cst_16 : f32 to vector<64x1xf32>
    %35 = arith.maximumf %33, %34 : vector<64x1xf32>
    %cst_17 = arith.constant 9.99999974E-6 : f32
    %36 = vector.broadcast %cst_17 : f32 to vector<64x1xf32>
    %37 = arith.addf %35, %36 : vector<64x1xf32>
    %38 = math.rsqrt %37 : vector<64x1xf32>
    %39 = arith.subf %16, %24 : vector<64x1xf32>
    %cst_18 = arith.constant 6.250000e-02 : f32
    %40 = vector.broadcast %cst_18 : f32 to vector<64x1xf32>
    %41 = arith.mulf %39, %40 : vector<64x1xf32>
    %42 = arith.mulf %29, %29 : vector<64x1xf32>
    %43 = arith.subf %41, %42 : vector<64x1xf32>
    %cst_19 = arith.constant 0.000000e+00 : f32
    %44 = vector.broadcast %cst_19 : f32 to vector<64x1xf32>
    %45 = arith.maximumf %43, %44 : vector<64x1xf32>
    %cst_20 = arith.constant 9.99999974E-6 : f32
    %46 = vector.broadcast %cst_20 : f32 to vector<64x1xf32>
    %47 = arith.addf %45, %46 : vector<64x1xf32>
    %48 = math.rsqrt %47 : vector<64x1xf32>
    %49 = vector.shape_cast %6 : vector<1x32xi1> to vector<1x32xi1>
    %50 = vector.broadcast %49 : vector<1x32xi1> to vector<64x32xi1>
    %51 = vector.shape_cast %38 : vector<64x1xf32> to vector<64x1xf32>
    %52 = vector.broadcast %51 : vector<64x1xf32> to vector<64x32xf32>
    %53 = vector.shape_cast %48 : vector<64x1xf32> to vector<64x1xf32>
    %54 = vector.broadcast %53 : vector<64x1xf32> to vector<64x32xf32>
    %55 = arith.select %50, %52, %54 : vector<64x32xi1>, vector<64x32xf32>
    %56 = arith.mulf %26, %38 : vector<64x1xf32>
    %57 = arith.mulf %29, %48 : vector<64x1xf32>
    %58 = vector.shape_cast %6 : vector<1x32xi1> to vector<1x32xi1>
    %59 = vector.broadcast %58 : vector<1x32xi1> to vector<64x32xi1>
    %60 = vector.shape_cast %56 : vector<64x1xf32> to vector<64x1xf32>
    %61 = vector.broadcast %60 : vector<64x1xf32> to vector<64x32xf32>
    %62 = vector.shape_cast %57 : vector<64x1xf32> to vector<64x1xf32>
    %63 = vector.broadcast %62 : vector<64x1xf32> to vector<64x32xf32>
    %64 = arith.select %59, %61, %63 : vector<64x32xi1>, vector<64x32xf32>
    %65 = vector.broadcast %2 : vector<1x32xf32> to vector<64x32xf32>
    %66 = arith.mulf %55, %65 : vector<64x32xf32>
    %67 = vector.broadcast %2 : vector<1x32xf32> to vector<64x32xf32>
    %68 = arith.mulf %64, %67 : vector<64x32xf32>
    %69 = vector.broadcast %3 : vector<1x32xf32> to vector<64x32xf32>
    %70 = arith.subf %69, %68 : vector<64x32xf32>
    %71 = arith.mulf %11, %66 : vector<64x32xf32>
    %72 = arith.addf %71, %70 : vector<64x32xf32>
    %73 = vector.shape_cast %72 : vector<64x32xf32> to vector<8x8x32xf32>
    %c0_21 = arith.constant 0 : index
    %c0_22 = arith.constant 0 : index
    %c0_23 = arith.constant 0 : index
    %c0_24 = arith.constant 0 : index
    %74 = vector.load %arg5[%c0_21, %c0_22, %c0_23, %c0_24] : memref<8x2x8x32xf32, #tpu.memory_space<vmem>>, vector<8x1x8x32xf32>
    %75 = vector.shape_cast %74 : vector<8x1x8x32xf32> to vector<8x8x32xf32>
    %76 = vector.shape_cast %73 : vector<8x8x32xf32> to vector<8x1x8x32xf32>
    tpu.vector_store %arg5[%c0_21, %c0_22, %c0_23, %c0_24], %76 {strides = array<i32>} : memref<8x2x8x32xf32, #tpu.memory_space<vmem>>, vector<8x1x8x32xf32>,
    %c1 = arith.constant 1 : index
    %c0_25 = arith.constant 0 : index
    %c0_26 = arith.constant 0 : index
    %77 = vector.load %arg2[%c1, %c0_25, %c0_26] : memref<2x32x32xf32, #tpu.memory_space<vmem>>, vector<1x32x32xf32>
    %78 = vector.shape_cast %77 : vector<1x32x32xf32> to vector<32x32xf32>
    %cst_27 = arith.constant dense<0.000000e+00> : vector<64x32xf32>
    %79 = tpu.matmul %1, %78, %cst_27 {dimension_numbers = #tpu.dot_dimension_numbers<[1], [0], [0], [1], [0, 0, 1, 1], [], []>} : vector<64x32xf32>, vector<32x32xf32>, vector<64x32xf32> -> vector<64x32xf32>
    %80 = arith.mulf %79, %79 : vector<64x32xf32>
    %cst_28 = arith.constant dense<0.000000e+00> : vector<64xf32>
    %81 = vector.multi_reduction <add>, %79, %cst_28 [1] : vector<64x32xf32> to vector<64xf32>
    %82 = vector.shape_cast %81 : vector<64xf32> to vector<64x1xf32>
    %cst_29 = arith.constant dense<0.000000e+00> : vector<64xf32>
    %83 = vector.multi_reduction <add>, %80, %cst_29 [1] : vector<64x32xf32> to vector<64xf32>
    %84 = vector.shape_cast %83 : vector<64xf32> to vector<64x1xf32>
    %85 = vector.broadcast %8 : vector<1x32xf32> to vector<64x32xf32>
    %86 = arith.mulf %79, %85 : vector<64x32xf32>
    %cst_30 = arith.constant dense<0.000000e+00> : vector<64xf32>
    %87 = vector.multi_reduction <add>, %86, %cst_30 [1] : vector<64x32xf32> to vector<64xf32>
    %88 = vector.shape_cast %87 : vector<64xf32> to vector<64x1xf32>
    %89 = vector.broadcast %8 : vector<1x32xf32> to vector<64x32xf32>
    %90 = arith.mulf %80, %89 : vector<64x32xf32>
    %cst_31 = arith.constant dense<0.000000e+00> : vector<64xf32>
    %91 = vector.multi_reduction <add>, %90, %cst_31 [1] : vector<64x32xf32> to vector<64xf32>
    %92 = vector.shape_cast %91 : vector<64xf32> to vector<64x1xf32>
    %cst_32 = arith.constant 6.250000e-02 : f32
    %93 = vector.broadcast %cst_32 : f32 to vector<64x1xf32>
    %94 = arith.mulf %88, %93 : vector<64x1xf32>
    %95 = arith.subf %82, %88 : vector<64x1xf32>
    %cst_33 = arith.constant 6.250000e-02 : f32
    %96 = vector.broadcast %cst_33 : f32 to vector<64x1xf32>
    %97 = arith.mulf %95, %96 : vector<64x1xf32>
    %cst_34 = arith.constant 6.250000e-02 : f32
    %98 = vector.broadcast %cst_34 : f32 to vector<64x1xf32>
    %99 = arith.mulf %92, %98 : vector<64x1xf32>
    %100 = arith.mulf %94, %94 : vector<64x1xf32>
    %101 = arith.subf %99, %100 : vector<64x1xf32>
    %cst_35 = arith.constant 0.000000e+00 : f32
    %102 = vector.broadcast %cst_35 : f32 to vector<64x1xf32>
    %103 = arith.maximumf %101, %102 : vector<64x1xf32>
    %cst_36 = arith.constant 9.99999974E-6 : f32
    %104 = vector.broadcast %cst_36 : f32 to vector<64x1xf32>
    %105 = arith.addf %103, %104 : vector<64x1xf32>
    %106 = math.rsqrt %105 : vector<64x1xf32>
    %107 = arith.subf %84, %92 : vector<64x1xf32>
    %cst_37 = arith.constant 6.250000e-02 : f32
    %108 = vector.broadcast %cst_37 : f32 to vector<64x1xf32>
    %109 = arith.mulf %107, %108 : vector<64x1xf32>
    %110 = arith.mulf %97, %97 : vector<64x1xf32>
    %111 = arith.subf %109, %110 : vector<64x1xf32>
    %cst_38 = arith.constant 0.000000e+00 : f32
    %112 = vector.broadcast %cst_38 : f32 to vector<64x1xf32>
    %113 = arith.maximumf %111, %112 : vector<64x1xf32>
    %cst_39 = arith.constant 9.99999974E-6 : f32
    %114 = vector.broadcast %cst_39 : f32 to vector<64x1xf32>
    %115 = arith.addf %113, %114 : vector<64x1xf32>
    %116 = math.rsqrt %115 : vector<64x1xf32>
    %117 = vector.shape_cast %6 : vector<1x32xi1> to vector<1x32xi1>
    %118 = vector.broadcast %117 : vector<1x32xi1> to vector<64x32xi1>
    %119 = vector.shape_cast %106 : vector<64x1xf32> to vector<64x1xf32>
    %120 = vector.broadcast %119 : vector<64x1xf32> to vector<64x32xf32>
    %121 = vector.shape_cast %116 : vector<64x1xf32> to vector<64x1xf32>
    %122 = vector.broadcast %121 : vector<64x1xf32> to vector<64x32xf32>
    %123 = arith.select %118, %120, %122 : vector<64x32xi1>, vector<64x32xf32>
    %124 = arith.mulf %94, %106 : vector<64x1xf32>
    %125 = arith.mulf %97, %116 : vector<64x1xf32>
    %126 = vector.shape_cast %6 : vector<1x32xi1> to vector<1x32xi1>
    %127 = vector.broadcast %126 : vector<1x32xi1> to vector<64x32xi1>
    %128 = vector.shape_cast %124 : vector<64x1xf32> to vector<64x1xf32>
    %129 = vector.broadcast %128 : vector<64x1xf32> to vector<64x32xf32>
    %130 = vector.shape_cast %125 : vector<64x1xf32> to vector<64x1xf32>
    %131 = vector.broadcast %130 : vector<64x1xf32> to vector<64x32xf32>
    %132 = arith.select %127, %129, %131 : vector<64x32xi1>, vector<64x32xf32>
    %133 = vector.broadcast %2 : vector<1x32xf32> to vector<64x32xf32>
    %134 = arith.mulf %123, %133 : vector<64x32xf32>
    %135 = vector.broadcast %2 : vector<1x32xf32> to vector<64x32xf32>
    %136 = arith.mulf %132, %135 : vector<64x32xf32>
    %137 = vector.broadcast %3 : vector<1x32xf32> to vector<64x32xf32>
    %138 = arith.subf %137, %136 : vector<64x32xf32>
    %139 = arith.mulf %79, %134 : vector<64x32xf32>
    %140 = arith.addf %139, %138 : vector<64x32xf32>
    %141 = vector.shape_cast %140 : vector<64x32xf32> to vector<8x8x32xf32>
    %c0_40 = arith.constant 0 : index
    %c1_41 = arith.constant 1 : index
    %c0_42 = arith.constant 0 : index
    %c0_43 = arith.constant 0 : index
    %142 = vector.load %arg5[%c0_40, %c1_41, %c0_42, %c0_43] : memref<8x2x8x32xf32, #tpu.memory_space<vmem>>, vector<8x1x8x32xf32>
    %143 = vector.shape_cast %142 : vector<8x1x8x32xf32> to vector<8x8x32xf32>
    %144 = vector.shape_cast %141 : vector<8x8x32xf32> to vector<8x1x8x32xf32>
    tpu.vector_store %arg5[%c0_40, %c1_41, %c0_42, %c0_43], %144 {strides = array<i32>} : memref<8x2x8x32xf32, #tpu.memory_space<vmem>>, vector<8x1x8x32xf32>,
    return
  }
  func.func @transform_0(%arg0: i32) -> (i32, i32, i32) {
    %c0_i32 = arith.constant 0 : i32
    %c0_i32_0 = arith.constant 0 : i32
    %c0_i32_1 = arith.constant 0 : i32
    return %arg0, %c0_i32, %c0_i32_0 : i32, i32, i32
  }
  func.func @transform_1(%arg0: i32) -> (i32, i32, i32) {
    %c0_i32 = arith.constant 0 : i32
    %c0_i32_0 = arith.constant 0 : i32
    %c0_i32_1 = arith.constant 0 : i32
    %c0_i32_2 = arith.constant 0 : i32
    return %c0_i32, %c0_i32_0, %c0_i32_1 : i32, i32, i32
  }
  func.func @transform_2(%arg0: i32) -> (i32, i32) {
    %c0_i32 = arith.constant 0 : i32
    %c0_i32_0 = arith.constant 0 : i32
    %c0_i32_1 = arith.constant 0 : i32
    return %c0_i32, %c0_i32_0 : i32, i32
  }
  func.func @transform_3(%arg0: i32) -> (i32, i32) {
    %c0_i32 = arith.constant 0 : i32
    %c0_i32_0 = arith.constant 0 : i32
    %c0_i32_1 = arith.constant 0 : i32
    return %c0_i32, %c0_i32_0 : i32, i32
  }
  func.func @transform_4(%arg0: i32) -> (i32, i32, i32, i32) {
    %c0_i32 = arith.constant 0 : i32
    %c0_i32_0 = arith.constant 0 : i32
    %c0_i32_1 = arith.constant 0 : i32
    %c0_i32_2 = arith.constant 0 : i32
    return %arg0, %c0_i32, %c0_i32_0, %c0_i32_1 : i32, i32, i32, i32
  }
}

module attributes {stable_mosaic.version = 11 : i64} {
  func.func @_patch_expand_kernel(%arg0: i32, %arg1: memref<8x8x32xf32, #tpu.memory_space<vmem>>, %arg2: memref<2x32x32xf32, #tpu.memory_space<vmem>>, %arg3: memref<1x32xf32, #tpu.memory_space<vmem>>, %arg4: memref<1x32xf32, #tpu.memory_space<vmem>>, %arg5: memref<8x2x8x32xf32, #tpu.memory_space<vmem>>) attributes {dimension_semantics = [#tpu.dimension_semantics<parallel>], iteration_bounds = array<i64: 2>, scalar_prefetch = 0 : i64, scratch_operands = 0 : i64, tpu.core_type = #tpu.core_type<tc>, window_params = [{transform_indices = @transform_0, window_bounds = array<i64: 8, 8, 32>}, {pipeline_mode = #tpu.pipeline_mode<synchronous>, transform_indices = @transform_1, window_bounds = array<i64: 2, 32, 32>}, {pipeline_mode = #tpu.pipeline_mode<synchronous>, transform_indices = @transform_2, window_bounds = array<i64: 1, 32>}, {pipeline_mode = #tpu.pipeline_mode<synchronous>, transform_indices = @transform_3, window_bounds = array<i64: 1, 32>}, {transform_indices = @transform_4, window_bounds = array<i64: 8, 2, 8, 32>}]} {
    %c0 = arith.constant 0 : index
    %c0_0 = arith.constant 0 : index
    %c0_1 = arith.constant 0 : index
    %0 = vector.load %arg1[%c0, %c0_0, %c0_1] : memref<8x8x32xf32, #tpu.memory_space<vmem>>, vector<8x8x32xf32>
    %1 = vector.shape_cast %0 : vector<8x8x32xf32> to vector<64x32xf32>
    %c0_2 = arith.constant 0 : index
    %c0_3 = arith.constant 0 : index
    %2 = vector.load %arg3[%c0_2, %c0_3] : memref<1x32xf32, #tpu.memory_space<vmem>>, vector<1x32xf32>
    %c0_4 = arith.constant 0 : index
    %c0_5 = arith.constant 0 : index
    %3 = vector.load %arg4[%c0_4, %c0_5] : memref<1x32xf32, #tpu.memory_space<vmem>>, vector<1x32xf32>
    %4 = tpu.iota {dimensions = array<i32: 1>} : vector<1x32xi32>
    %c16_i32 = arith.constant 16 : i32
    %5 = vector.broadcast %c16_i32 : i32 to vector<1x32xi32>
    %6 = arith.cmpi sge, %4, %5 : vector<1x32xi32>
    %7 = arith.extui %6 : vector<1x32xi1> to vector<1x32xi32>
    %8 = arith.sitofp %7 : vector<1x32xi32> to vector<1x32xf32>
    %c0_6 = arith.constant 0 : index
    %c0_7 = arith.constant 0 : index
    %c0_8 = arith.constant 0 : index
    %9 = vector.load %arg2[%c0_6, %c0_7, %c0_8] : memref<2x32x32xf32, #tpu.memory_space<vmem>>, vector<1x32x32xf32>
    %10 = vector.shape_cast %9 : vector<1x32x32xf32> to vector<32x32xf32>
    %cst = arith.constant dense<0.000000e+00> : vector<64x32xf32>
    %11 = tpu.matmul %1, %10, %cst {dimension_numbers = #tpu.dot_dimension_numbers<[1], [0], [0], [1], [0, 0, 1, 1], [], []>} : vector<64x32xf32>, vector<32x32xf32>, vector<64x32xf32> -> vector<64x32xf32>
    %12 = arith.mulf %11, %11 : vector<64x32xf32>
    %cst_9 = arith.constant dense<0.000000e+00> : vector<64xf32>
    %13 = vector.multi_reduction <add>, %11, %cst_9 [1] : vector<64x32xf32> to vector<64xf32>
    %14 = vector.shape_cast %13 : vector<64xf32> to vector<64x1xf32>
    %cst_10 = arith.constant dense<0.000000e+00> : vector<64xf32>
    %15 = vector.multi_reduction <add>, %12, %cst_10 [1] : vector<64x32xf32> to vector<64xf32>
    %16 = vector.shape_cast %15 : vector<64xf32> to vector<64x1xf32>
    %17 = vector.broadcast %8 : vector<1x32xf32> to vector<64x32xf32>
    %18 = arith.mulf %11, %17 : vector<64x32xf32>
    %cst_11 = arith.constant dense<0.000000e+00> : vector<64xf32>
    %19 = vector.multi_reduction <add>, %18, %cst_11 [1] : vector<64x32xf32> to vector<64xf32>
    %20 = vector.shape_cast %19 : vector<64xf32> to vector<64x1xf32>
    %21 = vector.broadcast %8 : vector<1x32xf32> to vector<64x32xf32>
    %22 = arith.mulf %12, %21 : vector<64x32xf32>
    %cst_12 = arith.constant dense<0.000000e+00> : vector<64xf32>
    %23 = vector.multi_reduction <add>, %22, %cst_12 [1] : vector<64x32xf32> to vector<64xf32>
    %24 = vector.shape_cast %23 : vector<64xf32> to vector<64x1xf32>
    %cst_13 = arith.constant 6.250000e-02 : f32
    %25 = vector.broadcast %cst_13 : f32 to vector<64x1xf32>
    %26 = arith.mulf %20, %25 : vector<64x1xf32>
    %27 = arith.subf %14, %20 : vector<64x1xf32>
    %cst_14 = arith.constant 6.250000e-02 : f32
    %28 = vector.broadcast %cst_14 : f32 to vector<64x1xf32>
    %29 = arith.mulf %27, %28 : vector<64x1xf32>
    %cst_15 = arith.constant 6.250000e-02 : f32
    %30 = vector.broadcast %cst_15 : f32 to vector<64x1xf32>
    %31 = arith.mulf %24, %30 : vector<64x1xf32>
    %32 = arith.mulf %26, %26 : vector<64x1xf32>
    %33 = arith.subf %31, %32 : vector<64x1xf32>
    %cst_16 = arith.constant 0.000000e+00 : f32
    %34 = vector.broadcast %cst_16 : f32 to vector<64x1xf32>
    %35 = arith.maximumf %33, %34 : vector<64x1xf32>
    %cst_17 = arith.constant 9.99999974E-6 : f32
    %36 = vector.broadcast %cst_17 : f32 to vector<64x1xf32>
    %37 = arith.addf %35, %36 : vector<64x1xf32>
    %38 = math.rsqrt %37 : vector<64x1xf32>
    %39 = arith.subf %16, %24 : vector<64x1xf32>
    %cst_18 = arith.constant 6.250000e-02 : f32
    %40 = vector.broadcast %cst_18 : f32 to vector<64x1xf32>
    %41 = arith.mulf %39, %40 : vector<64x1xf32>
    %42 = arith.mulf %29, %29 : vector<64x1xf32>
    %43 = arith.subf %41, %42 : vector<64x1xf32>
    %cst_19 = arith.constant 0.000000e+00 : f32
    %44 = vector.broadcast %cst_19 : f32 to vector<64x1xf32>
    %45 = arith.maximumf %43, %44 : vector<64x1xf32>
    %cst_20 = arith.constant 9.99999974E-6 : f32
    %46 = vector.broadcast %cst_20 : f32 to vector<64x1xf32>
    %47 = arith.addf %45, %46 : vector<64x1xf32>
    %48 = math.rsqrt %47 : vector<64x1xf32>
    %49 = vector.shape_cast %6 : vector<1x32xi1> to vector<1x32xi1>
    %50 = vector.broadcast %49 : vector<1x32xi1> to vector<64x32xi1>
    %51 = vector.shape_cast %38 : vector<64x1xf32> to vector<64x1xf32>
    %52 = vector.broadcast %51 : vector<64x1xf32> to vector<64x32xf32>
    %53 = vector.shape_cast %48 : vector<64x1xf32> to vector<64x1xf32>
    %54 = vector.broadcast %53 : vector<64x1xf32> to vector<64x32xf32>
    %55 = arith.select %50, %52, %54 : vector<64x32xi1>, vector<64x32xf32>
    %56 = arith.mulf %26, %38 : vector<64x1xf32>
    %57 = arith.mulf %29, %48 : vector<64x1xf32>
    %58 = vector.shape_cast %6 : vector<1x32xi1> to vector<1x32xi1>
    %59 = vector.broadcast %58 : vector<1x32xi1> to vector<64x32xi1>
    %60 = vector.shape_cast %56 : vector<64x1xf32> to vector<64x1xf32>
    %61 = vector.broadcast %60 : vector<64x1xf32> to vector<64x32xf32>
    %62 = vector.shape_cast %57 : vector<64x1xf32> to vector<64x1xf32>
    %63 = vector.broadcast %62 : vector<64x1xf32> to vector<64x32xf32>
    %64 = arith.select %59, %61, %63 : vector<64x32xi1>, vector<64x32xf32>
    %65 = vector.broadcast %2 : vector<1x32xf32> to vector<64x32xf32>
    %66 = arith.mulf %55, %65 : vector<64x32xf32>
    %67 = vector.broadcast %2 : vector<1x32xf32> to vector<64x32xf32>
    %68 = arith.mulf %64, %67 : vector<64x32xf32>
    %69 = vector.broadcast %3 : vector<1x32xf32> to vector<64x32xf32>
    %70 = arith.subf %69, %68 : vector<64x32xf32>
    %71 = arith.mulf %11, %66 : vector<64x32xf32>
    %72 = arith.addf %71, %70 : vector<64x32xf32>
    %73 = vector.shape_cast %72 : vector<64x32xf32> to vector<8x8x32xf32>
    %c0_21 = arith.constant 0 : index
    %c0_22 = arith.constant 0 : index
    %c0_23 = arith.constant 0 : index
    %c0_24 = arith.constant 0 : index
    %74 = vector.load %arg5[%c0_21, %c0_22, %c0_23, %c0_24] : memref<8x2x8x32xf32, #tpu.memory_space<vmem>>, vector<8x1x8x32xf32>
    %75 = vector.shape_cast %74 : vector<8x1x8x32xf32> to vector<8x8x32xf32>
    %76 = vector.shape_cast %73 : vector<8x8x32xf32> to vector<8x1x8x32xf32>
    tpu.vector_store %arg5[%c0_21, %c0_22, %c0_23, %c0_24], %76 {strides = array<i32>} : memref<8x2x8x32xf32, #tpu.memory_space<vmem>>, vector<8x1x8x32xf32>,
    %c1 = arith.constant 1 : index
    %c0_25 = arith.constant 0 : index
    %c0_26 = arith.constant 0 : index
    %77 = vector.load %arg2[%c1, %c0_25, %c0_26] : memref<2x32x32xf32, #tpu.memory_space<vmem>>, vector<1x32x32xf32>
    %78 = vector.shape_cast %77 : vector<1x32x32xf32> to vector<32x32xf32>
    %cst_27 = arith.constant dense<0.000000e+00> : vector<64x32xf32>
    %79 = tpu.matmul %1, %78, %cst_27 {dimension_numbers = #tpu.dot_dimension_numbers<[1], [0], [0], [1], [0, 0, 1, 1], [], []>} : vector<64x32xf32>, vector<32x32xf32>, vector<64x32xf32> -> vector<64x32xf32>
    %80 = arith.mulf %79, %79 : vector<64x32xf32>
    %cst_28 = arith.constant dense<0.000000e+00> : vector<64xf32>
    %81 = vector.multi_reduction <add>, %79, %cst_28 [1] : vector<64x32xf32> to vector<64xf32>
    %82 = vector.shape_cast %81 : vector<64xf32> to vector<64x1xf32>
    %cst_29 = arith.constant dense<0.000000e+00> : vector<64xf32>
    %83 = vector.multi_reduction <add>, %80, %cst_29 [1] : vector<64x32xf32> to vector<64xf32>
    %84 = vector.shape_cast %83 : vector<64xf32> to vector<64x1xf32>
    %85 = vector.broadcast %8 : vector<1x32xf32> to vector<64x32xf32>
    %86 = arith.mulf %79, %85 : vector<64x32xf32>
    %cst_30 = arith.constant dense<0.000000e+00> : vector<64xf32>
    %87 = vector.multi_reduction <add>, %86, %cst_30 [1] : vector<64x32xf32> to vector<64xf32>
    %88 = vector.shape_cast %87 : vector<64xf32> to vector<64x1xf32>
    %89 = vector.broadcast %8 : vector<1x32xf32> to vector<64x32xf32>
    %90 = arith.mulf %80, %89 : vector<64x32xf32>
    %cst_31 = arith.constant dense<0.000000e+00> : vector<64xf32>
    %91 = vector.multi_reduction <add>, %90, %cst_31 [1] : vector<64x32xf32> to vector<64xf32>
    %92 = vector.shape_cast %91 : vector<64xf32> to vector<64x1xf32>
    %cst_32 = arith.constant 6.250000e-02 : f32
    %93 = vector.broadcast %cst_32 : f32 to vector<64x1xf32>
    %94 = arith.mulf %88, %93 : vector<64x1xf32>
    %95 = arith.subf %82, %88 : vector<64x1xf32>
    %cst_33 = arith.constant 6.250000e-02 : f32
    %96 = vector.broadcast %cst_33 : f32 to vector<64x1xf32>
    %97 = arith.mulf %95, %96 : vector<64x1xf32>
    %cst_34 = arith.constant 6.250000e-02 : f32
    %98 = vector.broadcast %cst_34 : f32 to vector<64x1xf32>
    %99 = arith.mulf %92, %98 : vector<64x1xf32>
    %100 = arith.mulf %94, %94 : vector<64x1xf32>
    %101 = arith.subf %99, %100 : vector<64x1xf32>
    %cst_35 = arith.constant 0.000000e+00 : f32
    %102 = vector.broadcast %cst_35 : f32 to vector<64x1xf32>
    %103 = arith.maximumf %101, %102 : vector<64x1xf32>
    %cst_36 = arith.constant 9.99999974E-6 : f32
    %104 = vector.broadcast %cst_36 : f32 to vector<64x1xf32>
    %105 = arith.addf %103, %104 : vector<64x1xf32>
    %106 = math.rsqrt %105 : vector<64x1xf32>
    %107 = arith.subf %84, %92 : vector<64x1xf32>
    %cst_37 = arith.constant 6.250000e-02 : f32
    %108 = vector.broadcast %cst_37 : f32 to vector<64x1xf32>
    %109 = arith.mulf %107, %108 : vector<64x1xf32>
    %110 = arith.mulf %97, %97 : vector<64x1xf32>
    %111 = arith.subf %109, %110 : vector<64x1xf32>
    %cst_38 = arith.constant 0.000000e+00 : f32
    %112 = vector.broadcast %cst_38 : f32 to vector<64x1xf32>
    %113 = arith.maximumf %111, %112 : vector<64x1xf32>
    %cst_39 = arith.constant 9.99999974E-6 : f32
    %114 = vector.broadcast %cst_39 : f32 to vector<64x1xf32>
    %115 = arith.addf %113, %114 : vector<64x1xf32>
    %116 = math.rsqrt %115 : vector<64x1xf32>
    %117 = vector.shape_cast %6 : vector<1x32xi1> to vector<1x32xi1>
    %118 = vector.broadcast %117 : vector<1x32xi1> to vector<64x32xi1>
    %119 = vector.shape_cast %106 : vector<64x1xf32> to vector<64x1xf32>
    %120 = vector.broadcast %119 : vector<64x1xf32> to vector<64x32xf32>
    %121 = vector.shape_cast %116 : vector<64x1xf32> to vector<64x1xf32>
    %122 = vector.broadcast %121 : vector<64x1xf32> to vector<64x32xf32>
    %123 = arith.select %118, %120, %122 : vector<64x32xi1>, vector<64x32xf32>
    %124 = arith.mulf %94, %106 : vector<64x1xf32>
    %125 = arith.mulf %97, %116 : vector<64x1xf32>
    %126 = vector.shape_cast %6 : vector<1x32xi1> to vector<1x32xi1>
    %127 = vector.broadcast %126 : vector<1x32xi1> to vector<64x32xi1>
    %128 = vector.shape_cast %124 : vector<64x1xf32> to vector<64x1xf32>
    %129 = vector.broadcast %128 : vector<64x1xf32> to vector<64x32xf32>
    %130 = vector.shape_cast %125 : vector<64x1xf32> to vector<64x1xf32>
    %131 = vector.broadcast %130 : vector<64x1xf32> to vector<64x32xf32>
    %132 = arith.select %127, %129, %131 : vector<64x32xi1>, vector<64x32xf32>
    %133 = vector.broadcast %2 : vector<1x32xf32> to vector<64x32xf32>
    %134 = arith.mulf %123, %133 : vector<64x32xf32>
    %135 = vector.broadcast %2 : vector<1x32xf32> to vector<64x32xf32>
    %136 = arith.mulf %132, %135 : vector<64x32xf32>
    %137 = vector.broadcast %3 : vector<1x32xf32> to vector<64x32xf32>
    %138 = arith.subf %137, %136 : vector<64x32xf32>
    %139 = arith.mulf %79, %134 : vector<64x32xf32>
    %140 = arith.addf %139, %138 : vector<64x32xf32>
    %141 = vector.shape_cast %140 : vector<64x32xf32> to vector<8x8x32xf32>
    %c0_40 = arith.constant 0 : index
    %c1_41 = arith.constant 1 : index
    %c0_42 = arith.constant 0 : index
    %c0_43 = arith.constant 0 : index
    %142 = vector.load %arg5[%c0_40, %c1_41, %c0_42, %c0_43] : memref<8x2x8x32xf32, #tpu.memory_space<vmem>>, vector<8x1x8x32xf32>
    %143 = vector.shape_cast %142 : vector<8x1x8x32xf32> to vector<8x8x32xf32>
    %144 = vector.shape_cast %141 : vector<8x8x32xf32> to vector<8x1x8x32xf32>
    tpu.vector_store %arg5[%c0_40, %c1_41, %c0_42, %c0_43], %144 {strides = array<i32>} : memref<8x2x8x32xf32, #tpu.memory_space<vmem>>, vector<8x1x8x32xf32>,
    return
  }
  func.func @transform_0(%arg0: i32) -> (i32, i32, i32) {
    %c0_i32 = arith.constant 0 : i32
    %c0_i32_0 = arith.constant 0 : i32
    %c0_i32_1 = arith.constant 0 : i32
    return %arg0, %c0_i32, %c0_i32_0 : i32, i32, i32
  }
  func.func @transform_1(%arg0: i32) -> (i32, i32, i32) {
    %c0_i32 = arith.constant 0 : i32
    %c0_i32_0 = arith.constant 0 : i32
    %c0_i32_1 = arith.constant 0 : i32
    %c0_i32_2 = arith.constant 0 : i32
    return %c0_i32, %c0_i32_0, %c0_i32_1 : i32, i32, i32
  }
  func.func @transform_2(%arg0: i32) -> (i32, i32) {
    %c0_i32 = arith.constant 0 : i32
    %c0_i32_0 = arith.constant 0 : i32
    %c0_i32_1 = arith.constant 0 : i32
    return %c0_i32, %c0_i32_0 : i32, i32
  }
  func.func @transform_3(%arg0: i32) -> (i32, i32) {
    %c0_i32 = arith.constant 0 : i32
    %c0_i32_0 = arith.constant 0 : i32
    %c0_i32_1 = arith.constant 0 : i32
    return %c0_i32, %c0_i32_0 : i32, i32
  }
  func.func @transform_4(%arg0: i32) -> (i32, i32, i32, i32) {
    %c0_i32 = arith.constant 0 : i32
    %c0_i32_0 = arith.constant 0 : i32
    %c0_i32_1 = arith.constant 0 : i32
    %c0_i32_2 = arith.constant 0 : i32
    return %arg0, %c0_i32, %c0_i32_0, %c0_i32_1 : i32, i32, i32, i32
  }
}

</mosaic_0001>

<bundles_post_ra>
// kernel: tpu_custom_call.1
= control target key start
LH: loop header
LB: loop body
LE: loop exit
PB: predicated region body
PF: predicated region fallthrough
CT: control target
= control target key end

     0   :  { %9 = vsyncpa [#allocation3], 0  ;;  %s2644_s0 = inlined_call_operand.hbm [shape: f32[16,8,32], index: 0, kind: input, shape index: {}]   ;;  %s2645_s1 = inlined_call_operand.hbm [shape: f32[2,32,32], index: 1, kind: input, shape index: {}]   ;;  %s2646_s2 = inlined_call_operand.vmem [shape: f32[1,32], index: 2, kind: input, shape index: {}]   ;;  %s2647_s3 = inlined_call_operand.vmem [shape: f32[1,32], index: 3, kind: input, shape index: {}]   ;;  %s2648_s4 = inlined_call_operand.hbm [shape: f32[16,2,8,32], index: 4, kind: output, shape index: {}]  }
   0x1   :  { %11 = vsyncpa [#allocation3 + $0x1], 0 }
   0x2   :  { %12 = vsyncpa [#allocation6], 0 }
   0x3   :  { %13 = vsyncpa [#allocation4], 0 }
   0x4   :  { %15 = vsyncpa [#allocation4 + $0x1], 0  ;;  %s1676_s15 = smov 0   ;;  %s1678_s16 = smov 0  }
   0x5   :  { %s1680_s17 = smov 0   ;;  %s1682_s18 = smov 0  }
   0x6 LB: > { %s1697_s19 = sadd.s32 4294967295, %s1641_s18   ;;  %s1260_s20 = sadd.s32 4294967294, %s1641_s18   ;;  %s1641_s18 = sphi %s1682_s18, %s2668_s18   ;;  %s1637_s17 = sphi %s1680_s17, %s2667_s17   ;;  %s1633_s16 = sphi %s1678_s16, %s2666_s16   ;;  %s1629_s15 = sphi %s1676_s15, %s2665_s15  }
   0x7   : > { %p41_p0 = scmp.ne.s32.totalorder %s1633_s16, %s1629_s15  ;;  %p2649_p1 = scmp.eq.s32.totalorder %s1697_s19, 0 }
   0x8   : > { %p134_p3 = scmp.eq.s32.totalorder %s1260_s20, 1  ;;  %p1261_p5 = scmp.ge.s32.totalorder %s1641_s18, 1 }
   0x9   : > { %p1706_p4 = por %p2649_p1, %p41_p0  ;;  %p141_p7 = scmp.lt.s32.totalorder %s1641_s18, 3 }
   0xa   : > { %p1711_p6 = por %p134_p3, %p41_p0  ;;  %s1643_s24 = smov [#allocation5]  }
   0xb   : > { %s2652_s21 = scalar_select %p1706_p4, 1, 0 }
   0xc   : > { %s2653_s22 = scalar_select %p1711_p6, 1, 0 }
   0xd   : > { %p1716_p8 = pnand %p1261_p5, %p141_p7  ;;  %s153_s25 = sshll.u32 %s1643_s24, 4  ;;  %s1720_s25 = int_to_ptr.vmem [resolvable:$true] %s153_s25 }
   0xe   : > { %s1732_s27 = sadd.s32 1, %s1641_s18   ;;  %s28_s28 = sadd.s32 1, %s1637_s17 }
   0xf   : > { %s2654_s23 = scalar_select %p1716_p8, 1, 0 }
  0x10   : > { %p1395_p9 = pneg %p1716_p8  ;;  %s25_s29 = ssub.s32 %s1641_s18, %s1732_s27 }
  0x11   : > { %s1513_s6 = scalar_lea.hbm %s2645_s1, 1024 }
  0x12   : > { %p1727_p11 = pnand %p1395_p9, %p2649_p1  ;;  %p1514_p12 = scmp.ne.s32.totalorder %s2645_s1, %s1513_s6 }
  0x13   : > { %p1520_p5 = scmp.lt.u32.totalorder %s1513_s6, %s2645_s1 }
  0x14   : > { %p1515_p13 = pneg %p1727_p11 }
  0x16   : > { %p1516_p0 = pnand %p1515_p13, %p1514_p12 }
  0x18   : > { %p1517_p3 = pneg %p1516_p0 }
  0x1a   : > { %p1522_p7 = pnand %p1520_p5, %p1517_p3 }
  0x1c   : > { %1525 = shalt.err (!%p1522_p7)
}
  0x1d   : > { %s1526_s11 = scalar_lea.vmem %s1720_s25, 1024  ;;  %p1534_p2 = scmp.lt.s32.totalorder %s1720_s25, %s1720_s25 }
  0x1e   : > { %p1527_p9 = scmp.ne.s32.totalorder %s1720_s25, %s1526_s11  ;;  %p1535_p6 = scmp.lt.s32.totalorder %s1526_s11, %s1526_s11 }
  0x20   : > { %p1529_p10 = pnand %p1527_p9, %p1515_p13  ;;  %p1536_p4 = por %p1535_p6, %p1534_p2 }
  0x22   : > { %p1530_p1 = pneg %p1529_p10 }
  0x24   : > { %p1537_p8 = pnand %p1536_p4, %p1530_p1 }
  0x26   : > { %1540 = shalt.err (!%p1537_p8)
}
  0x27   : > { %s1644_s12 = smov 128   ;;  %s1645_s13 = smov 8  }
  0x28   : > { %1398 = dma.hbm_to_vmem [thread:$0]  (!%p1727_p11), %s2645_s1, 1024, %s1720_s25, [#allocation6], %s1644_s12, %s1644_s12, %s1645_s13  }
  0x29   : > { %p26_p1 = scmp.eq.s32.totalorder %s25_s29, 0  ;;  %p35_p2 = scmp.ne.s32.totalorder %s1637_s17, %s1633_s16 }
  0x2a   : > { %p36_p4 = scmp.eq.s32.totalorder %s1641_s18, 0  ;;  %p1408_p6 = scmp.lt.s32.totalorder %s1641_s18, 2 }
  0x2b   : > { %s1766_s24 = scalar_select %p26_p1, %s1637_s17, %s28_s28  }
  0x2c   : > { %p37_p8 = por %p36_p4, %p35_p2  ;;  %p2656_p10 = scmp.eq.s32.totalorder %s1697_s19, 1 }
  0x2d   : > { %s173_s26 = sand.u32 1, %s1637_s17   ;;  %s1304_s5 = sshll.u32 %s1641_s18, 10 }
  0x2e   : > { %p1770_p12 = por %p2656_p10, %p35_p2  ;;  %s1264_s6 = sshll.u32 %s173_s26, 6 }
  0x2f   : > { %s1779_s9 = scalar_lea.hbm %s2644_s0, %s1304_s5  ;;  %s177_s25 = scalar_lea.vmem [#allocation2], %s1264_s6 }
  0x30   : > { %s184_s28 = sshll.u32 %s177_s25, 4  ;;  %p1781_p11 = pnand %p1408_p6, %p37_p8  ;;  %s1785_s28 = int_to_ptr.vmem [resolvable:$true] %s184_s28 }
  0x31   : > { %s1787_s10 = scalar_lea.sflag [#allocation3], %s173_s26  ;;  %s1541_s11 = scalar_lea.hbm %s1779_s9, 1024 }
  0x32   : > { %p1542_p13 = scmp.ne.s32.totalorder %s1779_s9, %s1541_s11  ;;  %p1543_p0 = pneg %p1781_p11 }
  0x33   : > { %s1546_s5 = scalar_lea.hbm %s2644_s0, 2048  ;;  %p1547_p7 = scmp.lt.u32.totalorder %s1779_s9, %s2644_s0 }
  0x34   : > { %p1544_p3 = pnand %p1543_p0, %p1542_p13  ;;  %p1548_p9 = scmp.lt.u32.totalorder %s1546_s5, %s1541_s11 }
  0x35   : > { %p1550_p2 = scmp.lt.u32.totalorder %s1541_s11, %s1779_s9 }
  0x36   : > { %p1545_p5 = pneg %p1544_p3  ;;  %p1549_p1 = por %p1548_p9, %p1547_p7 }
  0x38   : > { %p1551_p4 = por %p1550_p2, %p1549_p1 }
  0x3a   : > { %p1552_p6 = pnand %p1551_p4, %p1545_p5 }
  0x3c   : > { %1555 = shalt.err (!%p1552_p6)
}
  0x3d   : > { %s1556_s26 = scalar_lea.vmem %s1785_s28, 1024  ;;  %s1646_s8 = smov [#allocation2]  }
  0x3e   : > { %p1557_p8 = scmp.ne.s32.totalorder %s1785_s28, %s1556_s26  ;;  %s1561_s25 = sshll.u32 %s1646_s8, 4  ;;  %s1562_s25 = int_to_ptr.vmem [resolvable:$false] %s1561_s25 }
  0x3f   : > { %s1563_s14 = scalar_lea.vmem %s1562_s25, 2048  ;;  %p1564_p3 = scmp.lt.s32.totalorder %s1785_s28, %s1562_s25 }
  0x40   : > { %p1559_p10 = pnand %p1557_p8, %p1543_p0  ;;  %p1565_p7 = scmp.lt.s32.totalorder %s1563_s14, %s1556_s26 }
  0x42   : > { %p1560_p13 = pneg %p1559_p10  ;;  %p1566_p9 = por %p1565_p7, %p1564_p3 }
  0x44   : > { %p1567_p1 = pnand %p1566_p9, %p1560_p13 }
  0x46   : > { %1570 = shalt.err (!%p1567_p1)
}
  0x47   : > { %1402 = dma.hbm_to_vmem [thread:$0]  (!%p1781_p11), %s1779_s9, 1024, %s1785_s28, %s1787_s10, %s1644_s12, %s1644_s12, %s1645_s13  }
  0x48   : > { %p2659_p0 = scmp.ne.s32.totalorder %s2654_s23, 0 }
  0x49   : > { %s1821_s11 = sand.u32 (!%p2659_p0), 1, %s1633_s16   ;;  %p2660_p5 = scmp.ne.s32.totalorder (!%p2659_p0), %s2652_s21, 0 }
  0x4a   : > { %196 = sbr.rel (%p2659_p0) target bundleno = 627 (0x273), region = 36  ;;  %s1268_s20 = sshll.u32 (!%p2659_p0), %s1821_s11, 6 }
  0x4b   : > { %s199_s5 = scalar_lea.sflag (!%p2659_p0), [#allocation3], %s1821_s11  ;;  %s1825_s6 = scalar_lea.vmem (!%p2659_p0), [#allocation2], %s1268_s20 }
  0x51   : > { %1616 = dma.done.wait (%p2660_p5), %s199_s5, 1024  }
  0x52   : > { %1618 = vsyncadd (%p2660_p5), %s199_s5, 4294966272  ;;  %p2661_p11 = scmp.eq.s32.totalorder %s1697_s19, 0 }
  0x54   : > { %1620 = dma.done.wait (%p2661_p11), [#allocation6], 1024   ;;  %p2662_p2 = pmov %p2661_p11 }
  0x55   : > { %v248_v0 = vld [vmem:[#allocation5] sm:$0xff]  ;;  %v249_v1 = vld [vmem:[#allocation5 + $0x8] sm:$0xff]  ;;  %vm252_vm0 = vcmask 261120   ;;  %v250_v5 = vld [vmem:[#allocation5 + $0x10] sm:$0xff]  ;;  %v243_v20 = vlaneseq  ;;  %v1647_v29 = vmov 0.0   ;;  %s1270_s9 = sshll.u32 %s1821_s11, 7 }
  0x56   : > { %1622 = vsyncadd (%p2662_p2), [#allocation6], 4294966272  ;;  %v724_v2 = vld [vmem:[#allocation5 + $0x20] sm:$0xff]  ;;  %v1371_v3 = vpack.c.bf16 %v249_v1, %v248_v0  ;;  %v725_v4 = vld [vmem:[#allocation5 + $0x28] sm:$0xff]  ;;  %s2247_s28 = scalar_lea.vmem [#allocation7], %s1270_s9  ;;  %s1306_s29 = sshll.u32 %s1697_s19, 11 }
  0x57   : > { %v251_v6 = vld [vmem:[#allocation5 + $0x18] sm:$0xff]  ;;  %v1379_v7 = vpack.c.bf16 %v725_v4, %v724_v2  ;;  %v726_v9 = vld [vmem:[#allocation5 + $0x30] sm:$0xff]  ;;  %v233_v11 = vld [vmem:[%s1825_s6] sm:$0xff]  ;;  %v1859_v21 = vand.u32 127, %v243_v20  ;;  %s1177_s10 = sshll.u32 %s2247_s28, 4  ;;  %s2596_s8 = scalar_lea.hbm %s2648_s4, %s1306_s29  ;;  %s2598_s10 = int_to_ptr.vmem [resolvable:$true] %s1177_s10 }
  0x58   : > { %v1375_v8 = vpack.c.bf16 %v251_v6, %v250_v5  ;;  %v727_v10 = vld [vmem:[#allocation5 + $0x38] sm:$0xff]  ;;  %1372 = vmatprep.subr.bf16.mxu0 %v1371_v3  ;;  %1339 = vmatprep.mubr.msk.f32.mxu0 %vm252_vm0, %v233_v11  ;;  %v234_v13 = vld [vmem:[%s1825_s6 + $0x8] sm:$0xff]  ;;  %v235_v14 = vld [vmem:[%s1825_s6 + $0x10] sm:$0xff]  ;;  %s1163_s19 = scalar_lea.sflag [#allocation4], %s1821_s11  ;;  %s1571_s25 = scalar_lea.vmem %s2598_s10, 2048 }
  0x59   : > { %v1383_v12 = vpack.c.bf16 %v727_v10, %v726_v9  ;;  %1380 = vmatprep.subr.bf16.mxu1 %v1379_v7  ;;  %1374 = vmatpush3.bf16.msra.mxu0 %v1371_v3  ;;  %v236_v15 = vld [vmem:[%s1825_s6 + $0x18] sm:$0xff]  ;;  %v237_v16 = vld [vmem:[%s1825_s6 + $0x20] sm:$0xff]  ;;  %v238_v17 = vld [vmem:[%s1825_s6 + $0x28] sm:$0xff]  ;;  %vm245_vm1 = vcmp.ge.s32.totalorder %v1859_v21, 16  ;;  %p1572_p4 = scmp.ne.s32.totalorder %s2598_s10, %s1571_s25  ;;  %s1648_s14 = smov [#allocation7]  }
  0x5a   : > { %1382 = vmatpush3.bf16.msra.mxu1 %v1379_v7  ;;  %1376 = vmatprep.subr.bf16.mxu0 %v1375_v8  ;;  %v239_v18 = vld [vmem:[%s1825_s6 + $0x30] sm:$0xff]  ;;  %v240_v19 = vld [vmem:[%s1825_s6 + $0x38] sm:$0xff]  ;;  %v1880_v30 = vsel %vm245_vm1, 1.0, %v1647_v29  ;;  %s1575_s20 = sshll.u32 %s1648_s14, 4  ;;  %s1576_s20 = int_to_ptr.vmem [resolvable:$false] %s1575_s20 }
  0x5b   : > { %1384 = vmatprep.subr.bf16.mxu1 %v1383_v12  ;;  %1359 = vmatprep.mubr.msk.f32.mxu1 %vm252_vm0, %v233_v11  ;;  %p1573_p6 = pnand %p1572_p4, %p1770_p12  ;;  %s1577_s5 = scalar_lea.vmem %s1576_s20, 4096 }
  0x5c   : > { %p1578_p10 = scmp.lt.s32.totalorder %s2598_s10, %s1576_s20  ;;  %p1579_p13 = scmp.lt.s32.totalorder %s1577_s5, %s1571_s25 }
  0x5d   : > { %1378 = vmatpush3.bf16.msra.mxu0 %v1375_v8  ;;  %p1574_p8 = pneg %p1573_p6 }
  0x5e   : > { %1386 = vmatpush3.bf16.msra.mxu1 %v1383_v12  ;;  %p1580_p3 = por %p1579_p13, %p1578_p10 }
  0x60   : > { %1340 = vmatmul.mubr.msk.f32.vlgmr.msra.gmra.mrb[0].mxu0 %vm252_vm0, %v234_v13  ;;  %p1581_p7 = pnand %p1580_p3, %p1574_p8 }
  0x61   : > { %1360 = vmatmul.mubr.msk.f32.vlgmr.msra.gmra.mrb[0].mxu1 %vm252_vm0, %v234_v13  ;;  %1342 = vmatprep.mubr.msk.f32.mxu0 %vm252_vm0, %v235_v14 }
  0x62   : > { %1362 = vmatprep.mubr.msk.f32.mxu1 %vm252_vm0, %v235_v14 }
  0x64   : > { %1343 = vmatmul.mubr.msk.f32.gmra.mrb[2].mxu0 %vm252_vm0, %v236_v15 }
  0x65   : > { %1363 = vmatmul.mubr.msk.f32.gmra.mrb[2].mxu1 %vm252_vm0, %v236_v15  ;;  %1345 = vmatprep.mubr.msk.f32.mxu0 %vm252_vm0, %v237_v16 }
  0x66   : > { %1365 = vmatprep.mubr.msk.f32.mxu1 %vm252_vm0, %v237_v16 }
  0x68   : > { %1346 = vmatmul.mubr.msk.f32.gmra.mrb[4].mxu0 %vm252_vm0, %v238_v17 }
  0x69   : > { %1366 = vmatmul.mubr.msk.f32.gmra.mrb[4].mxu1 %vm252_vm0, %v238_v17  ;;  %1348 = vmatprep.mubr.msk.f32.mxu0 %vm252_vm0, %v239_v18 }
  0x6a   : > { %1368 = vmatprep.mubr.msk.f32.mxu1 %vm252_vm0, %v239_v18 }
  0x6c   : > { %1349 = vmatmul.mubr.msk.f32.gmra.mrb[6].mxu0 %vm252_vm0, %v240_v19 }
  0x6d   : > { %1369 = vmatmul.mubr.msk.f32.gmra.mrb[6].mxu1 %vm252_vm0, %v240_v19 }
 0x133   : > { %v1861_v22 = vpop.f32.mrb[0].mxu0 }
 0x134   : > { %v1864_v23 = vpop.f32.mrb[0].mxu1  ;;  %v1866_v24 = vpop.f32.mrb[1].mxu0  ;;  %v393_v25 = vsel %vm252_vm0, %v1861_v22, 0.0  ;;  %v1876_v28 = vmul.f32 %v1861_v22, %v1861_v22  ;;  %v439_v36 = vmul.f32 %v1861_v22, %v1880_v30 }
 0x135   : > { %v1870_v26 = vpop.f32.mrb[1].mxu1  ;;  %v844_v27 = vsel %vm252_vm0, %v1864_v23, 0.0  ;;  %394 = vadd.xlane.f32.xlu0 %v393_v25  ;;  %v390_v32 = vsel %vm252_vm0, %v1866_v24, 0.0  ;;  %v382_v40 = vmul.f32 %v1866_v24, %v1866_v24  ;;  %v890_v44 = vmul.f32 %v1864_v23, %v1880_v30 }
 0x136   : > { %845 = vadd.xlane.f32.xlu1 %v844_v27  ;;  %v417_v35 = vsel %vm252_vm0, %v1876_v28, 0.0  ;;  %v841_v39 = vsel %vm252_vm0, %v1870_v26, 0.0  ;;  %v449_v43 = vsel %vm252_vm0, %v439_v36, 0.0  ;;  %v438_v48 = vmul.f32 %v1880_v30, %v1866_v24 }
 0x137   : > { %v1882_v31 = vpop.f32.mrb[2].mxu0  ;;  %v414_v47 = vsel %vm252_vm0, %v382_v40, 0.0  ;;  %v900_v51 = vsel %vm252_vm0, %v890_v44, 0.0  ;;  %v834_v52 = vmul.f32 %v1864_v23, %v1864_v23  ;;  %v889_v58 = vmul.f32 %v1880_v30, %v1870_v26 }
 0x138   : > { %v1886_v33 = vpop.f32.mrb[3].mxu0  ;;  %v1888_v34 = vpop.f32.mrb[2].mxu1  ;;  %v446_v57 = vsel %vm252_vm0, %v438_v48, 0.0  ;;  %v399_v0 = vsel %vm252_vm0, %v1882_v31, 0.0  ;;  %v833_v1 = vmul.f32 %v1870_v26, %v1870_v26  ;;  %v471_v16 = vmul.f32 %v1880_v30, %v1876_v28 }
 0x139   : > { %391 = vadd.xlane.f32.xlu0 %v390_v32  ;;  %v1894_v37 = vpop.f32.mrb[3].mxu1  ;;  %v868_v59 = vsel %vm252_vm0, %v834_v52, 0.0  ;;  %v897_v2 = vsel %vm252_vm0, %v889_v58, 0.0  ;;  %v850_v11 = vsel %vm252_vm0, %v1888_v34, 0.0  ;;  %v470_v28 = vmul.f32 %v1880_v30, %v382_v40 }
 0x13a   : > { %418 = vadd.xlane.f32.xlu1 %v417_v35  ;;  %v865_v12 = vsel %vm252_vm0, %v833_v1, 0.0  ;;  %v847_v27 = vsel %vm252_vm0, %v1894_v37, 0.0  ;;  %v481_v29 = vsel %vm252_vm0, %v471_v16, 0.0  ;;  %v922_v32 = vmul.f32 %v1880_v30, %v834_v52 }
 0x13b   : > { %v1896_v38 = vpop.f32.mrb[4].mxu0  ;;  %v478_v35 = vsel %vm252_vm0, %v470_v28, 0.0  ;;  %v921_v36 = vmul.f32 %v1880_v30, %v833_v1  ;;  %v384_v44 = vmul.f32 %v1886_v33, %v1886_v33  ;;  %v396_v40 = vsel %vm252_vm0, %v1886_v33, 0.0 }
 0x13c   : > { %v1902_v41 = vpop.f32.mrb[5].mxu0  ;;  %v1904_v42 = vpop.f32.mrb[4].mxu1  ;;  %v1927_v54 = vmul.f32 %v1896_v38, %v1880_v30  ;;  %v1943_v60 = vmul.f32 %v1896_v38, %v1896_v38  ;;  %v892_v1 = vmul.f32 %v1888_v34, %v1880_v30  ;;  %v836_v16 = vmul.f32 %v1888_v34, %v1888_v34 }
 0x13d   : > { %842 = vadd.xlane.f32.xlu0 %v841_v39  ;;  %v1909_v45 = vpop.f32.mrb[5].mxu1  ;;  %v1931_v55 = vmul.f32 %v1904_v42, %v1880_v30  ;;  %v1947_v61 = vmul.f32 %v1902_v41, %v1902_v41  ;;  %v1951_v62 = vmul.f32 %v1904_v42, %v1904_v42  ;;  %v932_v39 = vsel %vm252_vm0, %v922_v32, 0.0 }
 0x13e   : > { %450 = vadd.xlane.f32.xlu1 %v449_v43  ;;  %v1935_v56 = vmul.f32 %v1880_v30, %v1909_v45  ;;  %v1955_v63 = vmul.f32 %v1909_v45, %v1909_v45  ;;  %v1964_v3 = vmul.f32 %v1880_v30, %v1943_v60  ;;  %v929_v43 = vsel %vm252_vm0, %v921_v36, 0.0 }
 0x13f   : > { %v1911_v46 = vpop.f32.mrb[6].mxu0  ;;  %v1968_v4 = vmul.f32 %v1880_v30, %v1947_v61  ;;  %v1972_v5 = vmul.f32 %v1880_v30, %v1951_v62  ;;  %v420_v48 = vsel %vm252_vm0, %v384_v44, 0.0  ;;  %v874_v28 = vsel %vm252_vm0, %v836_v16, 0.0 }
 0x140   : > { %v1916_v49 = vpop.f32.mrb[7].mxu0  ;;  %v1918_v50 = vpop.f32.mrb[6].mxu1  ;;  %v1976_v6 = vmul.f32 %v1880_v30, %v1955_v63  ;;  %v1980_v7 = vmul.f32 %v1911_v46, %v1880_v30  ;;  %v1999_v13 = vmul.f32 %v1911_v46, %v1911_v46  ;;  %v405_v32 = vsel %vm252_vm0, %v1896_v38, 0.0 }
 0x141   : > { %415 = vadd.xlane.f32.xlu0 %v414_v47  ;;  %v1923_v53 = vpop.f32.mrb[7].mxu1  ;;  %v1984_v8 = vmul.f32 %v1880_v30, %v1916_v49  ;;  %v1988_v9 = vmul.f32 %v1918_v50, %v1880_v30  ;;  %v2003_v14 = vmul.f32 %v1916_v49, %v1916_v49  ;;  %v2007_v15 = vmul.f32 %v1918_v50, %v1918_v50 }
 0x142   : > { %901 = vadd.xlane.f32.xlu1 %v900_v51  ;;  %v1992_v10 = vmul.f32 %v1880_v30, %v1923_v53  ;;  %v2013_v17 = vmul.f32 %v1923_v53, %v1923_v53  ;;  %v2017_v18 = vmul.f32 %v1880_v30, %v1999_v13  ;;  %v385_v47 = vmul.f32 %v1882_v31, %v1882_v31 }
 0x143   : > { %v2021_v19 = vmul.f32 %v1880_v30, %v2003_v14  ;;  %v2025_v20 = vmul.f32 %v1880_v30, %v2007_v15  ;;  %v440_v51 = vmul.f32 %v1880_v30, %v1886_v33  ;;  %v856_v36 = vsel %vm252_vm0, %v1904_v42, 0.0 }
 0x144   : > { %v2029_v25 = vmul.f32 %v1880_v30, %v2013_v17  ;;  %v423_v52 = vsel %vm252_vm0, %v385_v47, 0.0 }
 0x145   : > { %447 = vadd.xlane.f32.xlu0 %v446_v57  ;;  %v441_v57 = vmul.f32 %v1882_v31, %v1880_v30  ;;  %v452_v58 = vsel %vm252_vm0, %v440_v51, 0.0 }
 0x146   : > { %869 = vadd.xlane.f32.xlu1 %v868_v59  ;;  %v891_v59 = vmul.f32 %v1880_v30, %v1894_v37 }
 0x149   : > { %898 = vadd.xlane.f32.xlu0 %v897_v2  ;;  %v903_v2 = vsel %vm252_vm0, %v891_v59, 0.0  ;;  %v461_v59 = vsel %vm252_vm0, %v1927_v54, 0.0  ;;  %v877_v54 = vsel %vm252_vm0, %v1955_v63, 0.0  ;;  %v493_v63 = vsel %vm252_vm0, %v1964_v3, 0.0 }
 0x14a   : > { %400 = vadd.xlane.f32.xlu1 %v399_v0  ;;  %v455_v0 = vsel %vm252_vm0, %v441_v57, 0.0  ;;  %v915_v3 = vsel %vm252_vm0, %v1992_v10, 0.0  ;;  %v499_v10 = vsel %vm252_vm0, %v2017_v18, 0.0 }
 0x14d   : > { %866 = vadd.xlane.f32.xlu0 %v865_v12  ;;  %v906_v12 = vsel %vm252_vm0, %v892_v1, 0.0  ;;  %v912_v1 = vsel %vm252_vm0, %v1931_v55, 0.0  ;;  %v408_v55 = vsel %vm252_vm0, %v1916_v49, 0.0 }
 0x14e   : > { %851 = vadd.xlane.f32.xlu1 %v850_v11  ;;  %v835_v11 = vmul.f32 %v1894_v37, %v1894_v37 }
 0x151   : > { %848 = vadd.xlane.f32.xlu0 %v847_v27  ;;  %v871_v27 = vsel %vm252_vm0, %v835_v11, 0.0 }
 0x152   : > { %482 = vadd.xlane.f32.xlu1 %v481_v29  ;;  %v402_v29 = vsel %vm252_vm0, %v1902_v41, 0.0 }
 0x155   : > { %479 = vadd.xlane.f32.xlu0 %v478_v35  ;;  %v853_v35 = vsel %vm252_vm0, %v1909_v45, 0.0 }
 0x156   : > { %933 = vadd.xlane.f32.xlu1 %v932_v39  ;;  %v472_v39 = vmul.f32 %v1880_v30, %v384_v44 }
 0x159   : > { %930 = vadd.xlane.f32.xlu0 %v929_v43  ;;  %v473_v43 = vmul.f32 %v1880_v30, %v385_v47 }
 0x15a   : > { %397 = vadd.xlane.f32.xlu1 %v396_v40  ;;  %v484_v40 = vsel %vm252_vm0, %v472_v39, 0.0 }
 0x15b   : > { %v487_v51 = vsel %vm252_vm0, %v473_v43, 0.0 }
 0x15d   : > { %421 = vadd.xlane.f32.xlu0 %v420_v48  ;;  %v923_v48 = vmul.f32 %v1880_v30, %v835_v11  ;;  %v880_v11 = vsel %vm252_vm0, %v1951_v62, 0.0  ;;  %v490_v62 = vsel %vm252_vm0, %v1968_v4, 0.0  ;;  %v918_v4 = vsel %vm252_vm0, %v1988_v9, 0.0 }
 0x15e   : > { %424 = vadd.xlane.f32.xlu1 %v423_v52  ;;  %v924_v52 = vmul.f32 %v1880_v30, %v836_v16  ;;  %v944_v16 = vsel %vm252_vm0, %v1972_v5, 0.0  ;;  %v432_v5 = vsel %vm252_vm0, %v2003_v14, 0.0  ;;  %v496_v9 = vsel %vm252_vm0, %v2021_v19, 0.0 }
 0x15f   : > { %v935_v57 = vsel %vm252_vm0, %v923_v48, 0.0  ;;  %v950_v14 = vsel %vm252_vm0, %v2025_v20, 0.0 }
 0x160   : > { %v938_v44 = vsel %vm252_vm0, %v924_v52, 0.0 }
 0x161   : > { %453 = vadd.xlane.f32.xlu0 %v452_v58  ;;  %v442_v58 = vmul.f32 %v1880_v30, %v1902_v41  ;;  %v426_v30 = vsel %vm252_vm0, %v1947_v61, 0.0  ;;  %v862_v61 = vsel %vm252_vm0, %v1918_v50, 0.0 }
 0x162   : > { %456 = vadd.xlane.f32.xlu1 %v455_v0  ;;  %v909_v0 = vsel %vm252_vm0, %v1935_v56, 0.0  ;;  %v411_v56 = vsel %vm252_vm0, %v1911_v46, 0.0 }
 0x163   : > { %v458_v47 = vsel %vm252_vm0, %v442_v58, 0.0 }
 0x165   : > { %904 = vadd.xlane.f32.xlu0 %v903_v2  ;;  %v429_v2 = vsel %vm252_vm0, %v1943_v60, 0.0  ;;  %v859_v60 = vsel %vm252_vm0, %v1923_v53, 0.0 }
 0x166   : > { %907 = vadd.xlane.f32.xlu1 %v906_v12  ;;  %v941_v12 = vsel %vm252_vm0, %v1976_v6, 0.0  ;;  %v435_v6 = vsel %vm252_vm0, %v1999_v13, 0.0  ;;  %v947_v13 = vsel %vm252_vm0, %v2029_v25, 0.0 }
 0x169   : > { %872 = vadd.xlane.f32.xlu0 %v871_v27  ;;  %v464_v27 = vsel %vm252_vm0, %v1984_v8, 0.0  ;;  %v886_v8 = vsel %vm252_vm0, %v2007_v15, 0.0 }
 0x16a   : > { %875 = vadd.xlane.f32.xlu1 %v874_v28  ;;  %v467_v28 = vsel %vm252_vm0, %v1980_v7, 0.0  ;;  %v883_v7 = vsel %vm252_vm0, %v2013_v17, 0.0 }
 0x16d   : > { %403 = vadd.xlane.f32.xlu0 %v402_v29 }
 0x16e   : > { %406 = vadd.xlane.f32.xlu1 %v405_v32 }
 0x171   : > { %854 = vadd.xlane.f32.xlu0 %v853_v35 }
 0x172   : > { %857 = vadd.xlane.f32.xlu1 %v856_v36 }
 0x175   : > { %485 = vadd.xlane.f32.xlu0 %v484_v40 }
 0x176   : > { %488 = vadd.xlane.f32.xlu1 %v487_v51 }
 0x179   : > { %936 = vadd.xlane.f32.xlu0 %v935_v57 }
 0x17a   : > { %939 = vadd.xlane.f32.xlu1 %v938_v44 }
 0x17d   : > { %459 = vadd.xlane.f32.xlu0 %v458_v47 }
 0x17e   : > { %462 = vadd.xlane.f32.xlu1 %v461_v59 }
 0x181   : > { %910 = vadd.xlane.f32.xlu0 %v909_v0 }
 0x182   : > { %913 = vadd.xlane.f32.xlu1 %v912_v1 }
 0x185   : > { %427 = vadd.xlane.f32.xlu0 %v426_v30 }
 0x186   : > { %430 = vadd.xlane.f32.xlu1 %v429_v2 }
 0x189   : > { %878 = vadd.xlane.f32.xlu0 %v877_v54 }
 0x18a   : > { %881 = vadd.xlane.f32.xlu1 %v880_v11 }
 0x18d   : > { %409 = vadd.xlane.f32.xlu0 %v408_v55 }
 0x18e   : > { %412 = vadd.xlane.f32.xlu1 %v411_v56 }
 0x191   : > { %860 = vadd.xlane.f32.xlu0 %v859_v60 }
 0x192   : > { %863 = vadd.xlane.f32.xlu1 %v862_v61 }
 0x195   : > { %491 = vadd.xlane.f32.xlu0 %v490_v62 }
 0x196   : > { %494 = vadd.xlane.f32.xlu1 %v493_v63 }
 0x199   : > { %942 = vadd.xlane.f32.xlu0 %v941_v12 }
 0x19a   : > { %945 = vadd.xlane.f32.xlu1 %v944_v16 }
 0x19d   : > { %465 = vadd.xlane.f32.xlu0 %v464_v27 }
 0x19e   : > { %468 = vadd.xlane.f32.xlu1 %v467_v28 }
 0x1a1   : > { %916 = vadd.xlane.f32.xlu0 %v915_v3 }
 0x1a2   : > { %919 = vadd.xlane.f32.xlu1 %v918_v4 }
 0x1a5   : > { %433 = vadd.xlane.f32.xlu0 %v432_v5 }
 0x1a6   : > { %436 = vadd.xlane.f32.xlu1 %v435_v6 }
 0x1a9   : > { %884 = vadd.xlane.f32.xlu0 %v883_v7 }
 0x1aa   : > { %887 = vadd.xlane.f32.xlu1 %v886_v8 }
 0x1ad   : > { %497 = vadd.xlane.f32.xlu0 %v496_v9 }
 0x1ae   : > { %500 = vadd.xlane.f32.xlu1 %v499_v10 }
 0x1b1   : > { %948 = vadd.xlane.f32.xlu0 %v947_v13 }
 0x1b2   : > { %951 = vadd.xlane.f32.xlu1 %v950_v14 }
 0x1c2   : > { %v395_v17 = vpop.xlane.xlu0 %394 }
 0x1c3   : > { %v846_v15 = vpop.xlane.xlu1 %845 }
 0x1c6   : > { %v392_v29 = vpop.xlane.xlu0 %391 }
 0x1c7   : > { %v419_v32 = vpop.xlane.xlu1 %418 }
 0x1ca   : > { %v843_v35 = vpop.xlane.xlu0 %842 }
 0x1cb   : > { %v451_v36 = vpop.xlane.xlu1 %450 }
 0x1cc   : > { %v511_v51 = vsub.f32 %v395_v17, %v451_v36  ;;  %v2143_v58 = vmul.f32 0.0625, %v451_v36 }
 0x1ce   : > { %v416_v19 = vpop.xlane.xlu0 %415  ;;  %v2145_v44 = vmul.f32 0.0625, %v511_v51  ;;  %v535_v11 = vmul.f32 %v2143_v58, %v2143_v58 }
 0x1cf   : > { %v902_v39 = vpop.xlane.xlu1 %901 }
 0x1d0   : > { %v962_v25 = vsub.f32 %v846_v15, %v902_v39  ;;  %v2147_v59 = vmul.f32 0.0625, %v902_v39  ;;  %v591_v60 = vmul.f32 %v2145_v44, %v2145_v44 }
 0x1d2   : > { %v448_v43 = vpop.xlane.xlu0 %447  ;;  %v2149_v0 = vmul.f32 0.0625, %v962_v25  ;;  %v986_v63 = vmul.f32 %v2147_v59, %v2147_v59 }
 0x1d3   : > { %v870_v18 = vpop.xlane.xlu1 %869  ;;  %v510_v57 = vsub.f32 %v392_v29, %v448_v43  ;;  %v2153_v30 = vmul.f32 0.0625, %v448_v43 }
 0x1d4   : > { %v1042_v12 = vmul.f32 %v2149_v0, %v2149_v0 }
 0x1d5   : > { %v2155_v2 = vmul.f32 0.0625, %v510_v57  ;;  %v534_v3 = vmul.f32 %v2153_v30, %v2153_v30 }
 0x1d6   : > { %v899_v40 = vpop.xlane.xlu0 %898 }
 0x1d7   : > { %v2139_v48 = vpop.xlane.xlu1 %400  ;;  %v961_v47 = vsub.f32 %v843_v35, %v899_v40  ;;  %v2161_v61 = vmul.f32 0.0625, %v899_v40  ;;  %v590_v4 = vmul.f32 %v2155_v2, %v2155_v2 }
 0x1d9   : > { %v2163_v62 = vmul.f32 0.0625, %v961_v47  ;;  %v985_v14 = vmul.f32 %v2161_v61, %v2161_v61 }
 0x1da   : > { %v867_v52 = vpop.xlane.xlu0 %866 }
 0x1db   : > { %v2141_v20 = vpop.xlane.xlu1 %851  ;;  %v1041_v17 = vmul.f32 %v2163_v62, %v2163_v62 }
 0x1de   : > { %v2151_v1 = vpop.xlane.xlu0 %848 }
 0x1df   : > { %v483_v54 = vpop.xlane.xlu1 %482 }
 0x1e0   : > { %v527_v55 = vmul.f32 0.0625, %v483_v54  ;;  %v575_v56 = vsub.f32 %v419_v32, %v483_v54 }
 0x1e2   : > { %v543_v16 = vsub.f32 %v527_v55, %v535_v11  ;;  %v583_v27 = vmul.f32 0.0625, %v575_v56  ;;  %v480_v28 = vpop.xlane.xlu0 %479 }
 0x1e3   : > { %v526_v5 = vmul.f32 0.0625, %v480_v28  ;;  %v574_v6 = vsub.f32 %v416_v19, %v480_v28  ;;  %v934_v7 = vpop.xlane.xlu1 %933 }
 0x1e4   : > { %v551_v8 = vmax.f32 %v543_v16, 0.0  ;;  %v599_v9 = vsub.f32 %v583_v27, %v591_v60  ;;  %v978_v10 = vmul.f32 0.0625, %v934_v7  ;;  %v1026_v13 = vsub.f32 %v870_v18, %v934_v7 }
 0x1e5   : > { %v542_v15 = vsub.f32 %v526_v5, %v534_v3  ;;  %v582_v29 = vmul.f32 0.0625, %v574_v6 }
 0x1e6   : > { %v559_v32 = vadd.f32 1e-05, %v551_v8  ;;  %v607_v35 = vmax.f32 %v599_v9, 0.0  ;;  %v994_v36 = vsub.f32 %v978_v10, %v986_v63  ;;  %v1034_v39 = vmul.f32 0.0625, %v1026_v13  ;;  %v931_v43 = vpop.xlane.xlu0 %930 }
 0x1e7   : > { %v550_v40 = vmax.f32 %v542_v15, 0.0  ;;  %v598_v19 = vsub.f32 %v582_v29, %v590_v4  ;;  %v977_v51 = vmul.f32 0.0625, %v931_v43  ;;  %v1025_v25 = vsub.f32 %v867_v52, %v931_v43  ;;  %v2177_v57 = vpop.xlane.xlu1 %397 }
 0x1e8   : > { %1449 = vrsqrt.f32 %v559_v32  ;;  %v615_v18 = vadd.f32 1e-05, %v607_v35  ;;  %v1002_v47 = vmax.f32 %v994_v36, 0.0  ;;  %v1050_v54 = vsub.f32 %v1034_v39, %v1042_v12 }
 0x1e9   : > { %v558_v11 = vadd.f32 1e-05, %v550_v40  ;;  %v606_v55 = vmax.f32 %v598_v19, 0.0  ;;  %v993_v56 = vsub.f32 %v977_v51, %v985_v14  ;;  %v1033_v60 = vmul.f32 0.0625, %v1025_v25  ;;  %v2190_v14 = vld [vmem:[%s2646_s2] ss:$0 sm:$0xff] }
 0x1ea   : > { %1451 = vrsqrt.f32 %v615_v18  ;;  %v1010_v16 = vadd.f32 1e-05, %v1002_v47  ;;  %v1058_v27 = vmax.f32 %v1050_v54, 0.0  ;;  %v2179_v63 = vpop.xlane.xlu0 %421  ;;  %v2204_v51 = vld [vmem:[%s2647_s3] ss:$0 sm:$0xff] }
 0x1eb   : > { %1453 = vrsqrt.f32 %v558_v11  ;;  %v614_v28 = vadd.f32 1e-05, %v606_v55  ;;  %v1001_v3 = vmax.f32 %v993_v56, 0.0  ;;  %v1049_v4 = vsub.f32 %v1033_v60, %v1041_v17  ;;  %v2181_v52 = vpop.xlane.xlu1 %424 }
 0x1ec   : > { %1455 = vrsqrt.f32 %v1010_v16  ;;  %v1066_v5 = vadd.f32 1e-05, %v1058_v27 }
 0x1ed   : > { %1457 = vrsqrt.f32 %v614_v28  ;;  %v1009_v6 = vadd.f32 1e-05, %v1001_v3  ;;  %v1057_v12 = vmax.f32 %v1049_v4, 0.0 }
 0x1ee   : > { %1459 = vrsqrt.f32 %v1066_v5  ;;  %v454_v7 = vpop.xlane.xlu0 %453 }
 0x1ef   : > { %v1065_v8 = vadd.f32 1e-05, %v1057_v12  ;;  %v2183_v9 = vpop.xlane.xlu1 %456  ;;  %1461 = vrsqrt.f32 %v1009_v6  ;;  %v2208_v18 = vmul.f32 0.0625, %v454_v7 }
 0x1f1   : > { %1463 = vrsqrt.f32 %v1065_v8  ;;  %v512_v8 = vsub.f32 %v2177_v57, %v454_v7 }
 0x1f2   : > { %v1450_v10 = vpop.eup %1449  ;;  %v2185_v13 = vpop.xlane.xlu0 %904 }
 0x1f3   : > { %v2192_v17 = vpop.xlane.xlu1 %907  ;;  %v640_v35 = vmul.f32 %v1450_v10, %v2143_v58 }
 0x1f4   : > { %v1452_v15 = vpop.eup %1451 }
 0x1f5   : > { %v1454_v29 = vpop.eup %1453  ;;  %v632_v32 = vsel %vm245_vm1, %v1450_v10, %v1452_v15  ;;  %v648_v36 = vmul.f32 %v1452_v15, %v2145_v44 }
 0x1f6   : > { %v1456_v39 = vpop.eup %1455  ;;  %v670_v43 = vmul.f32 %v2190_v14, %v632_v32  ;;  %v2199_v40 = vpop.xlane.xlu0 %872  ;;  %v639_v11 = vmul.f32 %v1454_v29, %v2153_v30  ;;  %v963_v32 = vsub.f32 %v2151_v1, %v2185_v13 }
 0x1f7   : > { %v1458_v19 = vpop.eup %1457  ;;  %v656_v25 = vsel %vm245_vm1, %v640_v35, %v648_v36  ;;  %v2210_v47 = vpop.xlane.xlu1 %875  ;;  %v1090_v16 = vmul.f32 %v1456_v39, %v2147_v59 }
 0x1f8   : > { %v1460_v58 = vpop.eup %1459  ;;  %v678_v44 = vmul.f32 %v2190_v14, %v656_v25  ;;  %v631_v54 = vsel %vm245_vm1, %v1454_v29, %v1458_v19  ;;  %v647_v55 = vmul.f32 %v1458_v19, %v2155_v2  ;;  %v700_v4 = vmul.f32 %v1861_v22, %v670_v43 }
 0x1f9   : > { %v669_v56 = vmul.f32 %v2190_v14, %v631_v54  ;;  %v1082_v60 = vsel %vm245_vm1, %v1456_v39, %v1460_v58  ;;  %v1098_v27 = vmul.f32 %v1460_v58, %v2149_v0  ;;  %v1462_v28 = vpop.eup %1461  ;;  %v513_v0 = vsub.f32 %v2139_v48, %v2183_v9 }
 0x1fa   : > { %v692_v3 = vsub.f32 %v2204_v51, %v678_v44  ;;  %v655_v5 = vsel %vm245_vm1, %v639_v11, %v647_v55  ;;  %v1114_v30 = vmul.f32 %v2190_v14, %v1082_v60  ;;  %v2228_v2 = vpop.xlane.xlu0 %403  ;;  %v1089_v39 = vmul.f32 %v1462_v28, %v2161_v61 }
 0x1fb   : > { %v1464_v6 = vpop.eup %1463  ;;  %v677_v12 = vmul.f32 %v2190_v14, %v655_v5  ;;  %v1106_v59 = vsel %vm245_vm1, %v1090_v16, %v1098_v27  ;;  %v2236_v10 = vpop.xlane.xlu1 %406  ;;  %v699_v36 = vmul.f32 %v669_v56, %v1866_v24  ;;  %v964_v24 = vsub.f32 %v2141_v20, %v2192_v17 }
 0x1fc   : > { %v708_v22 = vadd.f32 %v700_v4, %v692_v3  ;;  %v1122_v15 = vmul.f32 %v2190_v14, %v1106_v59  ;;  %v1081_v29 = vsel %vm245_vm1, %v1462_v28, %v1464_v6  ;;  %v1097_v48 = vmul.f32 %v1464_v6, %v2163_v62 }
 0x1fd   : > { %v691_v35 = vsub.f32 %v2204_v51, %v677_v12  ;;  %v1138_v7 = vmul.f32 %v1864_v23, %v1114_v30  ;;  %v1113_v1 = vmul.f32 %v2190_v14, %v1081_v29  ;;  %v2261_v19 = vmul.f32 0.0625, %v2183_v9 }
 0x1fe   : > { %716 = vst.msk [vmem:[%s2247_s28 + $0x10] sm:$0xff] %vm252_vm0, %v708_v22  ;;  %v1130_v57 = vsub.f32 %v2204_v51, %v1122_v15  ;;  %v2256_v43 = vpop.xlane.xlu0 %854  ;;  %v1105_v62 = vsel %vm245_vm1, %v1089_v39, %v1097_v48  ;;  %v2263_v25 = vmul.f32 0.0625, %v512_v8  ;;  %v2268_v54 = vmul.f32 0.0625, %v513_v0 }
 0x1ff   : > { %v707_v61 = vadd.f32 %v699_v36, %v691_v35  ;;  %v2265_v58 = vpop.xlane.xlu1 %857  ;;  %v1121_v44 = vmul.f32 %v2190_v14, %v1105_v62  ;;  %v536_v20 = vmul.f32 %v2208_v18, %v2208_v18  ;;  %v2275_v11 = vmul.f32 0.0625, %v2192_v17 }
 0x200   : > { %v1146_v23 = vadd.f32 %v1138_v7, %v1130_v57  ;;  %v2278_v9 = vmul.f32 0.0625, %v2185_v13  ;;  %v1137_v56 = vmul.f32 %v1113_v1, %v1870_v26  ;;  %v2284_v60 = vmul.f32 0.0625, %v964_v24 }
 0x201   : > { %715 = vst.msk [vmem:[%s2247_s28] sm:$0xff] %vm252_vm0, %v707_v61  ;;  %v1129_v55 = vsub.f32 %v2204_v51, %v1121_v44  ;;  %v2286_v16 = vmul.f32 0.0625, %v963_v32  ;;  %v537_v28 = vmul.f32 %v2261_v19, %v2261_v19  ;;  %v592_v17 = vmul.f32 %v2263_v25, %v2263_v25 }
 0x202   : > { %1291 = vst.msk [vmem:[%s2247_s28 + $0x18] sm:$0xff] %vm252_vm0, %v1146_v23  ;;  %v486_v27 = vpop.xlane.xlu0 %485  ;;  %v593_v26 = vmul.f32 %v2268_v54, %v2268_v54  ;;  %v988_v12 = vmul.f32 %v2275_v11, %v2275_v11  ;;  %v987_v59 = vmul.f32 %v2278_v9, %v2278_v9 }
 0x203   : > { %v489_v13 = vpop.xlane.xlu1 %488  ;;  %v528_v3 = vmul.f32 0.0625, %v486_v27  ;;  %v576_v4 = vsub.f32 %v2179_v63, %v486_v27  ;;  %v1145_v5 = vadd.f32 %v1137_v56, %v1129_v55  ;;  %v1044_v63 = vmul.f32 %v2284_v60, %v2284_v60 }
 0x204   : > { %v529_v30 = vmul.f32 0.0625, %v489_v13  ;;  %v577_v6 = vsub.f32 %v2181_v52, %v489_v13  ;;  %v1043_v22 = vmul.f32 %v2286_v16, %v2286_v16 }
 0x205   : > { %v544_v0 = vsub.f32 %v528_v3, %v536_v20  ;;  %v584_v8 = vmul.f32 0.0625, %v576_v4  ;;  %1290 = vst.msk [vmem:[%s2247_s28 + $0x8] sm:$0xff] %vm252_vm0, %v1145_v5 }
 0x206   : > { %v545_v15 = vsub.f32 %v529_v30, %v537_v28  ;;  %v585_v29 = vmul.f32 0.0625, %v577_v6  ;;  %v937_v32 = vpop.xlane.xlu0 %936 }
 0x207   : > { %v552_v52 = vmax.f32 %v544_v0, 0.0  ;;  %v600_v35 = vsub.f32 %v584_v8, %v592_v17  ;;  %v940_v36 = vpop.xlane.xlu1 %939  ;;  %v979_v39 = vmul.f32 0.0625, %v937_v32  ;;  %v1027_v48 = vsub.f32 %v2199_v40, %v937_v32 }
 0x208   : > { %v553_v57 = vmax.f32 %v545_v15, 0.0  ;;  %v601_v7 = vsub.f32 %v585_v29, %v593_v26  ;;  %v980_v1 = vmul.f32 0.0625, %v940_v36  ;;  %v1028_v24 = vsub.f32 %v2210_v47, %v940_v36 }
 0x209   : > { %v560_v61 = vadd.f32 1e-05, %v552_v52  ;;  %v608_v62 = vmax.f32 %v600_v35, 0.0  ;;  %v995_v23 = vsub.f32 %v979_v39, %v987_v59  ;;  %v1035_v44 = vmul.f32 0.0625, %v1027_v48 }
 0x20a   : > { %v561_v20 = vadd.f32 1e-05, %v553_v57  ;;  %v609_v55 = vmax.f32 %v601_v7, 0.0  ;;  %v996_v56 = vsub.f32 %v980_v1, %v988_v12  ;;  %v1036_v27 = vmul.f32 0.0625, %v1028_v24  ;;  %v2308_v28 = vpop.xlane.xlu0 %459 }
 0x20b   : > { %1465 = vrsqrt.f32 %v560_v61  ;;  %v616_v17 = vadd.f32 1e-05, %v608_v62  ;;  %v1003_v13 = vmax.f32 %v995_v23, 0.0  ;;  %v1051_v3 = vsub.f32 %v1035_v44, %v1043_v22  ;;  %v2310_v40 = vpop.xlane.xlu1 %462 }
 0x20c   : > { %1467 = vrsqrt.f32 %v561_v20  ;;  %v617_v4 = vadd.f32 1e-05, %v609_v55  ;;  %v1004_v5 = vmax.f32 %v996_v56, 0.0  ;;  %v1052_v47 = vsub.f32 %v1036_v27, %v1044_v63 }
 0x20d   : > { %1469 = vrsqrt.f32 %v616_v17  ;;  %v1011_v26 = vadd.f32 1e-05, %v1003_v13  ;;  %v1059_v30 = vmax.f32 %v1051_v3, 0.0  ;;  %v2319_v63 = vmul.f32 0.0625, %v2310_v40 }
 0x20e   : > { %1471 = vrsqrt.f32 %v617_v4  ;;  %v1012_v6 = vadd.f32 1e-05, %v1004_v5  ;;  %v1060_v59 = vmax.f32 %v1052_v47, 0.0  ;;  %v2312_v12 = vpop.xlane.xlu0 %910  ;;  %v515_v39 = vsub.f32 %v2236_v10, %v2310_v40 }
 0x20f   : > { %1473 = vrsqrt.f32 %v1011_v26  ;;  %v1067_v0 = vadd.f32 1e-05, %v1059_v30  ;;  %v2314_v8 = vpop.xlane.xlu1 %913  ;;  %v2329_v48 = vmul.f32 %v2319_v63, %v2319_v63  ;;  %v2332_v57 = vmul.f32 0.0625, %v2308_v28 }
 0x210   : > { %1475 = vrsqrt.f32 %v1012_v6  ;;  %v1068_v22 = vadd.f32 1e-05, %v1060_v59  ;;  %v514_v10 = vsub.f32 %v2228_v2, %v2308_v28  ;;  %v965_v2 = vsub.f32 %v2256_v43, %v2312_v12 }
 0x211   : > { %1477 = vrsqrt.f32 %v1067_v0 }
 0x212   : > { %1479 = vrsqrt.f32 %v1068_v22  ;;  %v2316_v15 = vpop.xlane.xlu0 %427 }
 0x213   : > { %v2321_v29 = vpop.xlane.xlu1 %430 }
 0x215   : > { %v1466_v32 = vpop.eup %1465 }
 0x216   : > { %v1468_v52 = vpop.eup %1467  ;;  %v2323_v35 = vpop.xlane.xlu0 %878  ;;  %v641_v61 = vmul.f32 %v1466_v32, %v2208_v18 }
 0x217   : > { %v1470_v36 = vpop.eup %1469  ;;  %v2334_v7 = vpop.xlane.xlu1 %881  ;;  %v642_v20 = vmul.f32 %v1468_v52, %v2261_v19 }
 0x218   : > { %v1472_v1 = vpop.eup %1471  ;;  %v633_v24 = vsel %vm245_vm1, %v1466_v32, %v1470_v36  ;;  %v649_v62 = vmul.f32 %v1470_v36, %v2263_v25  ;;  %v966_v25 = vsub.f32 %v2265_v58, %v2314_v8  ;;  %v2383_v36 = vmul.f32 0.0625, %v515_v39 }
 0x219   : > { %v1474_v23 = vpop.eup %1473  ;;  %v634_v44 = vsel %vm245_vm1, %v1468_v52, %v1472_v1  ;;  %v650_v55 = vmul.f32 %v1472_v1, %v2268_v54  ;;  %v671_v56 = vmul.f32 %v2190_v14, %v633_v24  ;;  %v2400_v39 = vmul.f32 0.0625, %v2312_v12 }
 0x21a   : > { %v1476_v27 = vpop.eup %1475  ;;  %v672_v17 = vmul.f32 %v2190_v14, %v634_v44  ;;  %v657_v18 = vsel %vm245_vm1, %v641_v61, %v649_v62  ;;  %v2354_v28 = vpop.xlane.xlu0 %409  ;;  %v1091_v40 = vmul.f32 %v1474_v23, %v2278_v9  ;;  %v538_v61 = vmul.f32 %v2332_v57, %v2332_v57 }
 0x21b   : > { %v1478_v13 = vpop.eup %1477  ;;  %v658_v19 = vsel %vm245_vm1, %v642_v20, %v650_v55  ;;  %v679_v54 = vmul.f32 %v2190_v14, %v657_v18  ;;  %v701_v3 = vmul.f32 %v671_v56, %v1886_v33  ;;  %v2361_v4 = vpop.xlane.xlu1 %412  ;;  %v1092_v47 = vmul.f32 %v1476_v27, %v2275_v11 }
 0x21c   : > { %v1480_v5 = vpop.eup %1479  ;;  %v680_v58 = vmul.f32 %v2190_v14, %v658_v19  ;;  %v1083_v43 = vsel %vm245_vm1, %v1474_v23, %v1478_v13  ;;  %v1099_v26 = vmul.f32 %v1478_v13, %v2286_v16  ;;  %v702_v0 = vmul.f32 %v1882_v31, %v672_v17 }
 0x21d   : > { %v693_v30 = vsub.f32 %v2204_v51, %v679_v54  ;;  %v1084_v6 = vsel %vm245_vm1, %v1476_v27, %v1480_v5  ;;  %v1100_v33 = vmul.f32 %v1480_v5, %v2284_v60  ;;  %v1115_v9 = vmul.f32 %v2190_v14, %v1083_v43 }
 0x21e   : > { %v694_v59 = vsub.f32 %v2204_v51, %v680_v58  ;;  %v1116_v11 = vmul.f32 %v2190_v14, %v1084_v6  ;;  %v1107_v22 = vsel %vm245_vm1, %v1091_v40, %v1099_v26  ;;  %v2378_v16 = vpop.xlane.xlu0 %860  ;;  %v2391_v62 = vmul.f32 0.0625, %v2314_v8 }
 0x21f   : > { %v709_v32 = vadd.f32 %v701_v3, %v693_v30  ;;  %v1108_v52 = vsel %vm245_vm1, %v1092_v47, %v1100_v33  ;;  %v1123_v60 = vmul.f32 %v2190_v14, %v1107_v22  ;;  %v2385_v1 = vpop.xlane.xlu1 %863  ;;  %v1139_v44 = vmul.f32 %v1115_v9, %v1894_v37 }
 0x220   : > { %v710_v24 = vadd.f32 %v702_v0, %v694_v59  ;;  %v1124_v31 = vmul.f32 %v2190_v14, %v1108_v52  ;;  %v2397_v20 = vmul.f32 0.0625, %v514_v10  ;;  %v1140_v56 = vmul.f32 %v1888_v34, %v1116_v11 }
 0x221   : > { %717 = vst.msk [vmem:[%s2247_s28 + $0x20] sm:$0xff] %vm252_vm0, %v709_v32  ;;  %v1131_v23 = vsub.f32 %v2204_v51, %v1123_v60  ;;  %v2406_v8 = vmul.f32 0.0625, %v966_v25  ;;  %v2408_v27 = vmul.f32 0.0625, %v965_v2  ;;  %v595_v37 = vmul.f32 %v2383_v36, %v2383_v36 }
 0x222   : > { %718 = vst.msk [vmem:[%s2247_s28 + $0x30] sm:$0xff] %vm252_vm0, %v710_v24  ;;  %v1132_v55 = vsub.f32 %v2204_v51, %v1124_v31  ;;  %v492_v17 = vpop.xlane.xlu0 %491  ;;  %v990_v54 = vmul.f32 %v2391_v62, %v2391_v62  ;;  %v594_v25 = vmul.f32 %v2397_v20, %v2397_v20  ;;  %v989_v2 = vmul.f32 %v2400_v39, %v2400_v39 }
 0x223   : > { %v1147_v18 = vadd.f32 %v1139_v44, %v1131_v23  ;;  %v495_v10 = vpop.xlane.xlu1 %494  ;;  %v530_v12 = vmul.f32 0.0625, %v492_v17  ;;  %v578_v13 = vsub.f32 %v2316_v15, %v492_v17  ;;  %v1046_v15 = vmul.f32 %v2406_v8, %v2406_v8 }
 0x224   : > { %v1148_v19 = vadd.f32 %v1140_v56, %v1132_v55  ;;  %v531_v3 = vmul.f32 0.0625, %v495_v10  ;;  %v579_v34 = vsub.f32 %v2321_v29, %v495_v10  ;;  %v1045_v58 = vmul.f32 %v2408_v27, %v2408_v27 }
 0x225   : > { %1292 = vst.msk [vmem:[%s2247_s28 + $0x28] sm:$0xff] %vm252_vm0, %v1147_v18  ;;  %v546_v40 = vsub.f32 %v530_v12, %v538_v61  ;;  %v586_v5 = vmul.f32 0.0625, %v578_v13 }
 0x226   : > { %1293 = vst.msk [vmem:[%s2247_s28 + $0x38] sm:$0xff] %vm252_vm0, %v1148_v19  ;;  %v547_v29 = vsub.f32 %v531_v3, %v2329_v48  ;;  %v587_v47 = vmul.f32 0.0625, %v579_v34  ;;  %v943_v43 = vpop.xlane.xlu0 %942 }
 0x227   : > { %v554_v26 = vmax.f32 %v546_v40, 0.0  ;;  %v602_v30 = vsub.f32 %v586_v5, %v594_v25  ;;  %v946_v6 = vpop.xlane.xlu1 %945  ;;  %v981_v33 = vmul.f32 0.0625, %v943_v43  ;;  %v1029_v9 = vsub.f32 %v2323_v35, %v943_v43 }
 0x228   : > { %v555_v59 = vmax.f32 %v547_v29, 0.0  ;;  %v603_v0 = vsub.f32 %v587_v47, %v595_v37  ;;  %v982_v11 = vmul.f32 0.0625, %v946_v6  ;;  %v1030_v22 = vsub.f32 %v2334_v7, %v946_v6 }
 0x229   : > { %v562_v32 = vadd.f32 1e-05, %v554_v26  ;;  %v610_v52 = vmax.f32 %v602_v30, 0.0  ;;  %v997_v60 = vsub.f32 %v981_v33, %v989_v2  ;;  %v1037_v24 = vmul.f32 0.0625, %v1029_v9 }
 0x22a   : > { %v563_v31 = vadd.f32 1e-05, %v555_v59  ;;  %v611_v61 = vmax.f32 %v603_v0, 0.0  ;;  %v998_v48 = vsub.f32 %v982_v11, %v990_v54  ;;  %v1038_v23 = vmul.f32 0.0625, %v1030_v22  ;;  %v466_v44 = vpop.xlane.xlu0 %465 }
 0x22b   : > { %1481 = vrsqrt.f32 %v562_v32  ;;  %v618_v55 = vadd.f32 1e-05, %v610_v52  ;;  %v1005_v56 = vmax.f32 %v997_v60, 0.0  ;;  %v1053_v17 = vsub.f32 %v1037_v24, %v1045_v58  ;;  %v469_v18 = vpop.xlane.xlu1 %468 }
 0x22c   : > { %1483 = vrsqrt.f32 %v563_v31  ;;  %v619_v35 = vadd.f32 1e-05, %v611_v61  ;;  %v1006_v37 = vmax.f32 %v998_v48, 0.0  ;;  %v1054_v10 = vsub.f32 %v1038_v23, %v1046_v15 }
 0x22d   : > { %1485 = vrsqrt.f32 %v618_v55  ;;  %v1013_v7 = vadd.f32 1e-05, %v1005_v56  ;;  %v1061_v12 = vmax.f32 %v1053_v17, 0.0  ;;  %v517_v34 = vsub.f32 %v2361_v4, %v469_v18 }
 0x22e   : > { %1487 = vrsqrt.f32 %v619_v35  ;;  %v1014_v13 = vadd.f32 1e-05, %v1006_v37  ;;  %v1062_v19 = vmax.f32 %v1054_v10, 0.0  ;;  %v917_v3 = vpop.xlane.xlu0 %916  ;;  %v516_v40 = vsub.f32 %v2354_v28, %v466_v44 }
 0x22f   : > { %1489 = vrsqrt.f32 %v1013_v7  ;;  %v1069_v54 = vadd.f32 1e-05, %v1061_v12  ;;  %v920_v25 = vpop.xlane.xlu1 %919  ;;  %v2434_v15 = vmul.f32 0.0625, %v469_v18  ;;  %v2436_v58 = vmul.f32 0.0625, %v466_v44 }
 0x230   : > { %1491 = vrsqrt.f32 %v1014_v13  ;;  %v1070_v2 = vadd.f32 1e-05, %v1062_v19  ;;  %v968_v5 = vsub.f32 %v2385_v1, %v920_v25  ;;  %v2440_v47 = vmul.f32 0.0625, %v517_v34 }
 0x231   : > { %1493 = vrsqrt.f32 %v1069_v54  ;;  %v2442_v43 = vmul.f32 0.0625, %v516_v40  ;;  %v2444_v4 = vmul.f32 0.0625, %v920_v25  ;;  %v2446_v26 = vmul.f32 0.0625, %v917_v3 }
 0x232   : > { %1495 = vrsqrt.f32 %v1070_v2  ;;  %v2438_v29 = vpop.xlane.xlu0 %433  ;;  %v2450_v28 = vmul.f32 0.0625, %v968_v5  ;;  %v541_v33 = vmul.f32 %v2434_v15, %v2434_v15  ;;  %v2456_v9 = vmul.f32 %v2436_v58, %v2436_v58 }
 0x233   : > { %v2448_v30 = vpop.xlane.xlu1 %436  ;;  %v967_v59 = vsub.f32 %v2378_v16, %v917_v3  ;;  %v2463_v22 = vmul.f32 %v2440_v47, %v2440_v47  ;;  %v2467_v32 = vmul.f32 %v2442_v43, %v2442_v43  ;;  %v2471_v52 = vmul.f32 %v2444_v4, %v2444_v4 }
 0x234   : > { %v2475_v60 = vmul.f32 %v2446_v26, %v2446_v26  ;;  %v2485_v23 = vmul.f32 %v2450_v28, %v2450_v28 }
 0x235   : > { %v1482_v1 = vpop.eup %1481  ;;  %v2496_v10 = vmul.f32 0.0625, %v967_v59 }
 0x236   : > { %v1484_v6 = vpop.eup %1483  ;;  %v2459_v0 = vpop.xlane.xlu0 %884  ;;  %v643_v61 = vmul.f32 %v1482_v1, %v2332_v57 }
 0x237   : > { %v1486_v11 = vpop.eup %1485  ;;  %v2477_v16 = vpop.xlane.xlu1 %887  ;;  %v644_v56 = vmul.f32 %v1484_v6, %v2319_v63 }
 0x238   : > { %v1488_v24 = vpop.eup %1487  ;;  %v635_v31 = vsel %vm245_vm1, %v1482_v1, %v1486_v11  ;;  %v651_v48 = vmul.f32 %v1486_v11, %v2397_v20 }
 0x239   : > { %v1490_v44 = vpop.eup %1489  ;;  %v636_v55 = vsel %vm245_vm1, %v1484_v6, %v1488_v24  ;;  %v652_v17 = vmul.f32 %v1488_v24, %v2383_v36  ;;  %v673_v18 = vmul.f32 %v2190_v14, %v635_v31 }
 0x23a   : > { %v1492_v35 = vpop.eup %1491  ;;  %v674_v37 = vmul.f32 %v2190_v14, %v636_v55  ;;  %v659_v57 = vsel %vm245_vm1, %v643_v61, %v651_v48  ;;  %v1093_v20 = vmul.f32 %v1490_v44, %v2400_v39  ;;  %v498_v2 = vpop.xlane.xlu0 %497 }
 0x23b   : > { %v1494_v7 = vpop.eup %1493  ;;  %v660_v12 = vsel %vm245_vm1, %v644_v56, %v652_v17  ;;  %v681_v63 = vmul.f32 %v2190_v14, %v659_v57  ;;  %v703_v36 = vmul.f32 %v673_v18, %v1902_v41  ;;  %v1094_v13 = vmul.f32 %v1492_v35, %v2391_v62  ;;  %v501_v19 = vpop.xlane.xlu1 %500 }
 0x23c   : > { %v1496_v3 = vpop.eup %1495  ;;  %v682_v54 = vmul.f32 %v2190_v14, %v660_v12  ;;  %v704_v34 = vmul.f32 %v1896_v38, %v674_v37  ;;  %v1085_v39 = vsel %vm245_vm1, %v1490_v44, %v1494_v7  ;;  %v1101_v25 = vmul.f32 %v1494_v7, %v2408_v27 }
 0x23d   : > { %v695_v40 = vsub.f32 %v2204_v51, %v681_v63  ;;  %v1086_v5 = vsel %vm245_vm1, %v1492_v35, %v1496_v3  ;;  %v1102_v41 = vmul.f32 %v1496_v3, %v2406_v8  ;;  %v1117_v62 = vmul.f32 %v2190_v14, %v1085_v39 }
 0x23e   : > { %v696_v1 = vsub.f32 %v2204_v51, %v682_v54  ;;  %v1118_v38 = vmul.f32 %v2190_v14, %v1086_v5  ;;  %v1109_v6 = vsel %vm245_vm1, %v1093_v20, %v1101_v25  ;;  %v533_v27 = vmul.f32 0.0625, %v501_v19 }
 0x23f   : > { %v711_v59 = vadd.f32 %v703_v36, %v695_v40  ;;  %v1110_v11 = vsel %vm245_vm1, %v1094_v13, %v1102_v41  ;;  %v1125_v24 = vmul.f32 %v2190_v14, %v1109_v6  ;;  %v1141_v31 = vmul.f32 %v1117_v62, %v1909_v45  ;;  %v952_v8 = vpop.xlane.xlu1 %951 }
 0x240   : > { %v712_v61 = vadd.f32 %v704_v34, %v696_v1  ;;  %v1126_v48 = vmul.f32 %v2190_v14, %v1110_v11  ;;  %v1142_v44 = vmul.f32 %v1904_v42, %v1118_v38  ;;  %v549_v55 = vsub.f32 %v533_v27, %v541_v33  ;;  %v949_v33 = vpop.xlane.xlu0 %948 }
 0x241   : > { %719 = vst.msk [vmem:[%s2247_s28 + $0x40] sm:$0xff] %vm252_vm0, %v711_v59  ;;  %v1133_v56 = vsub.f32 %v2204_v51, %v1125_v24  ;;  %v581_v17 = vsub.f32 %v2448_v30, %v501_v19  ;;  %v532_v18 = vmul.f32 0.0625, %v498_v2  ;;  %v580_v35 = vsub.f32 %v2438_v29, %v498_v2 }
 0x242   : > { %720 = vst.msk [vmem:[%s2247_s28 + $0x50] sm:$0xff] %vm252_vm0, %v712_v61  ;;  %v1134_v45 = vsub.f32 %v2204_v51, %v1126_v48  ;;  %v557_v37 = vmax.f32 %v549_v55, 0.0  ;;  %v984_v57 = vmul.f32 0.0625, %v952_v8  ;;  %v1032_v42 = vsub.f32 %v2477_v16, %v952_v8 }
 0x243   : > { %v1149_v20 = vadd.f32 %v1141_v31, %v1133_v56  ;;  %v589_v7 = vmul.f32 0.0625, %v581_v17  ;;  %v548_v12 = vsub.f32 %v532_v18, %v2456_v9  ;;  %v588_v63 = vmul.f32 0.0625, %v580_v35 }
 0x244   : > { %v1150_v30 = vadd.f32 %v1142_v44, %v1134_v45  ;;  %v565_v36 = vadd.f32 1e-05, %v557_v37  ;;  %v1000_v13 = vsub.f32 %v984_v57, %v2471_v52  ;;  %v1040_v29 = vmul.f32 0.0625, %v1032_v42 }
 0x245   : > { %1294 = vst.msk [vmem:[%s2247_s28 + $0x48] sm:$0xff] %vm252_vm0, %v1149_v20  ;;  %v605_v19 = vsub.f32 %v589_v7, %v2463_v22  ;;  %v556_v3 = vmax.f32 %v548_v12, 0.0  ;;  %v604_v54 = vsub.f32 %v588_v63, %v2467_v32  ;;  %v983_v34 = vmul.f32 0.0625, %v949_v33 }
 0x246   : > { %1295 = vst.msk [vmem:[%s2247_s28 + $0x58] sm:$0xff] %vm252_vm0, %v1150_v30  ;;  %v1047_v16 = vmul.f32 %v2496_v10, %v2496_v10  ;;  %v1008_v9 = vmax.f32 %v1000_v13, 0.0  ;;  %v1056_v39 = vsub.f32 %v1040_v29, %v2485_v23  ;;  %v1031_v25 = vsub.f32 %v2459_v0, %v949_v33 }
 0x247   : > { %v613_v52 = vmax.f32 %v605_v19, 0.0  ;;  %v564_v2 = vadd.f32 1e-05, %v556_v3  ;;  %v612_v40 = vmax.f32 %v604_v54, 0.0  ;;  %v999_v5 = vsub.f32 %v983_v34, %v2475_v60 }
 0x248   : > { %1497 = vrsqrt.f32 %v565_v36  ;;  %v1016_v22 = vadd.f32 1e-05, %v1008_v9  ;;  %v1064_v41 = vmax.f32 %v1056_v39, 0.0  ;;  %v1039_v32 = vmul.f32 0.0625, %v1031_v25 }
 0x249   : > { %v621_v62 = vadd.f32 1e-05, %v613_v52  ;;  %1499 = vrsqrt.f32 %v564_v2  ;;  %v620_v1 = vadd.f32 1e-05, %v612_v40  ;;  %v1007_v38 = vmax.f32 %v999_v5, 0.0 }
 0x24a   : > { %1501 = vrsqrt.f32 %v1016_v22  ;;  %v1072_v6 = vadd.f32 1e-05, %v1064_v41  ;;  %v1055_v27 = vsub.f32 %v1039_v32, %v1047_v16 }
 0x24b   : > { %1503 = vrsqrt.f32 %v621_v62  ;;  %v1015_v23 = vadd.f32 1e-05, %v1007_v38 }
 0x24c   : > { %1505 = vrsqrt.f32 %v620_v1  ;;  %v1063_v0 = vmax.f32 %v1055_v27, 0.0 }
 0x24d   : > { %1507 = vrsqrt.f32 %v1072_v6 }
 0x24e   : > { %v1071_v59 = vadd.f32 1e-05, %v1063_v0  ;;  %1509 = vrsqrt.f32 %v1015_v23 }
 0x250   : > { %1511 = vrsqrt.f32 %v1071_v59 }
 0x252   : > { %v1498_v60 = vpop.eup %1497 }
 0x253   : > { %v1500_v11 = vpop.eup %1499  ;;  %v646_v48 = vmul.f32 %v1498_v60, %v2434_v15 }
 0x254   : > { %v1502_v24 = vpop.eup %1501  ;;  %v645_v55 = vmul.f32 %v1500_v11, %v2436_v58 }
 0x255   : > { %v1504_v31 = vpop.eup %1503  ;;  %v1096_v45 = vmul.f32 %v1502_v24, %v2444_v4 }
 0x256   : > { %v1506_v8 = vpop.eup %1505  ;;  %v638_v61 = vsel %vm245_vm1, %v1498_v60, %v1504_v31  ;;  %v654_v44 = vmul.f32 %v1504_v31, %v2440_v47 }
 0x257   : > { %v1508_v56 = vpop.eup %1507  ;;  %v676_v17 = vmul.f32 %v2190_v14, %v638_v61  ;;  %v637_v18 = vsel %vm245_vm1, %v1500_v11, %v1506_v8  ;;  %v653_v35 = vmul.f32 %v1506_v8, %v2442_v43 }
 0x258   : > { %v662_v37 = vsel %vm245_vm1, %v646_v48, %v654_v44  ;;  %v675_v57 = vmul.f32 %v2190_v14, %v637_v18  ;;  %v1088_v15 = vsel %vm245_vm1, %v1502_v24, %v1508_v56  ;;  %v1104_v58 = vmul.f32 %v1508_v56, %v2450_v28  ;;  %v1510_v47 = vpop.eup %1509 }
 0x259   : > { %v684_v42 = vmul.f32 %v2190_v14, %v662_v37  ;;  %v661_v33 = vsel %vm245_vm1, %v645_v55, %v653_v35  ;;  %v1120_v43 = vmul.f32 %v2190_v14, %v1088_v15  ;;  %v706_v63 = vmul.f32 %v1911_v46, %v676_v17 }
 0x25a   : > { %v1512_v20 = vpop.eup %1511  ;;  %v683_v4 = vmul.f32 %v2190_v14, %v661_v33  ;;  %v1112_v7 = vsel %vm245_vm1, %v1096_v45, %v1104_v58  ;;  %v705_v13 = vmul.f32 %v675_v57, %v1916_v49  ;;  %v1095_v29 = vmul.f32 %v1510_v47, %v2446_v26 }
 0x25b   : > { %v698_v12 = vsub.f32 %v2204_v51, %v684_v42  ;;  %v1128_v28 = vmul.f32 %v2190_v14, %v1112_v7  ;;  %v1087_v30 = vsel %vm245_vm1, %v1510_v47, %v1512_v20  ;;  %v1103_v19 = vmul.f32 %v1512_v20, %v2496_v10 }
 0x25c   : > { %v697_v36 = vsub.f32 %v2204_v51, %v683_v4  ;;  %v1144_v54 = vmul.f32 %v1918_v50, %v1120_v43  ;;  %v1119_v34 = vmul.f32 %v2190_v14, %v1087_v30 }
 0x25d   : > { %v714_v3 = vadd.f32 %v706_v63, %v698_v12  ;;  %v1136_v46 = vsub.f32 %v2204_v51, %v1128_v28  ;;  %v1111_v9 = vsel %vm245_vm1, %v1095_v29, %v1103_v19 }
 0x25e   : > { %v713_v16 = vadd.f32 %v705_v13, %v697_v36  ;;  %v1127_v26 = vmul.f32 %v2190_v14, %v1111_v9  ;;  %v1143_v10 = vmul.f32 %v1119_v34, %v1923_v53 }
 0x25f   : > { %722 = vst.msk [vmem:[%s2247_s28 + $0x70] sm:$0xff] %vm252_vm0, %v714_v3  ;;  %v1152_v49 = vadd.f32 %v1144_v54, %v1136_v46 }
 0x260   : > { %721 = vst.msk [vmem:[%s2247_s28 + $0x60] sm:$0xff] %vm252_vm0, %v713_v16  ;;  %v1135_v50 = vsub.f32 %v2204_v51, %v1127_v26 }
 0x261   : > { %1297 = vst.msk [vmem:[%s2247_s28 + $0x78] sm:$0xff] %vm252_vm0, %v1152_v49 }
 0x262   : > { %v1151_v21 = vadd.f32 %v1143_v10, %v1135_v50 }
 0x264   : > { %1296 = vst.msk [vmem:[%s2247_s28 + $0x68] sm:$0xff] %vm252_vm0, %v1151_v21 }
 0x265   : > { %1584 = shalt.err (!%p1581_p7)
}
 0x266   : > { %s1585_s6 = scalar_lea.hbm %s2596_s8, 2048  ;;  %s1589_s12 = scalar_lea.hbm %s2648_s4, 4096 }
 0x267   : > { %p1586_p9 = scmp.ne.s32.totalorder %s2596_s8, %s1585_s6  ;;  %p1590_p5 = scmp.lt.u32.totalorder %s2596_s8, %s2648_s4 }
 0x268   : > { %p1591_p11 = scmp.lt.u32.totalorder %s1589_s12, %s1585_s6  ;;  %p1593_p4 = scmp.lt.u32.totalorder %s1585_s6, %s2596_s8 }
 0x269   : > { %p1587_p1 = pnand %p1586_p9, %p1770_p12 }
 0x26a   : > { %p1592_p2 = por %p1591_p11, %p1590_p5 }
 0x26b   : > { %p1588_p0 = pneg %p1587_p1 }
 0x26c   : > { %p1594_p6 = por %p1593_p4, %p1592_p2 }
 0x26e   : > { %p1595_p8 = pnand %p1594_p6, %p1588_p0 }
 0x270   : > { %1598 = shalt.err (!%p1595_p8)
}
 0x271   : > { %s1649_s28 = smov 128   ;;  %s1650_s29 = smov 8  }
 0x272   : > { %1393 = dma.vmem_to_hbm [thread:$0]  (%p1770_p12), %s2598_s10, 2048, %s2596_s8, %s1163_s19, %s1649_s28, %s1649_s28, %s1650_s29  }
 0x273 PF: > { %s1192_s7 = sand.u32 1, %s1629_s15   ;;  %p2663_p10 = scmp.ne.s32.totalorder %s2653_s22, 0 }
 0x274   : > { %p2664_p13 = scmp.ge.s32.totalorder %s1641_s18, 2  ;;  %s1193_s26 = scalar_lea.sflag [#allocation4], %s1192_s7 }
 0x276   : > { %p1404_p3 = pnand %p2664_p13, %p2663_p10 }
 0x278   : > { %1624 = dma.done.wait (!%p1404_p3), %s1193_s26, 2048  }
 0x279   : > { %1626 = vsyncadd (!%p1404_p3), %s1193_s26, 4294965248  ;;  %p18_p7 = scmp.ge.s32.totalorder %s1732_s27, 4   ;;  %s2665_s15 = smov %s1633_s16 }
 0x27a   : > { %s2666_s16 = smov %s1637_s17  ;;  %s2667_s17 = smov %s1766_s24 }
 0x27b   : > { %s2668_s18 = smov %s1732_s27  ;;  %20 = sbr.rel (!%p18_p7) target bundleno = 6 (0x6), region = 87 }
 0x282   :  { %1198 = vsyncpa [#allocation3], 1 }
 0x283   :  { %1200 = vsyncpa [#allocation3 + $0x1], 1 }
 0x284   :  { %1201 = vsyncpa [#allocation6], 1 }
 0x285   :  { %1202 = vsyncpa [#allocation4], 1 }
 0x286   :  { %1204 = vsyncpa [#allocation4 + $0x1], 1 }

// kernel: tpu_custom_call.1
= control target key start
LH: loop header
LB: loop body
LE: loop exit
PB: predicated region body
PF: predicated region fallthrough
CT: control target
= control target key end

     0   :  { %9 = vsyncpa [#allocation3], 0  ;;  %s2644_s0 = inlined_call_operand.hbm [shape: f32[16,8,32], index: 0, kind: input, shape index: {}]   ;;  %s2645_s1 = inlined_call_operand.hbm [shape: f32[2,32,32], index: 1, kind: input, shape index: {}]   ;;  %s2646_s2 = inlined_call_operand.vmem [shape: f32[1,32], index: 2, kind: input, shape index: {}]   ;;  %s2647_s3 = inlined_call_operand.vmem [shape: f32[1,32], index: 3, kind: input, shape index: {}]   ;;  %s2648_s4 = inlined_call_operand.hbm [shape: f32[16,2,8,32], index: 4, kind: output, shape index: {}]  }
   0x1   :  { %11 = vsyncpa [#allocation3 + $0x1], 0 }
   0x2   :  { %12 = vsyncpa [#allocation6], 0 }
   0x3   :  { %13 = vsyncpa [#allocation4], 0 }
   0x4   :  { %15 = vsyncpa [#allocation4 + $0x1], 0  ;;  %s1676_s15 = smov 0   ;;  %s1678_s16 = smov 0  }
   0x5   :  { %s1680_s17 = smov 0   ;;  %s1682_s18 = smov 0  }
   0x6 LB: > { %s1697_s19 = sadd.s32 4294967295, %s1641_s18   ;;  %s1260_s20 = sadd.s32 4294967294, %s1641_s18   ;;  %s1641_s18 = sphi %s1682_s18, %s2668_s18   ;;  %s1637_s17 = sphi %s1680_s17, %s2667_s17   ;;  %s1633_s16 = sphi %s1678_s16, %s2666_s16   ;;  %s1629_s15 = sphi %s1676_s15, %s2665_s15  }
   0x7   : > { %p41_p0 = scmp.ne.s32.totalorder %s1633_s16, %s1629_s15  ;;  %p2649_p1 = scmp.eq.s32.totalorder %s1697_s19, 0 }
   0x8   : > { %p134_p3 = scmp.eq.s32.totalorder %s1260_s20, 1  ;;  %p1261_p5 = scmp.ge.s32.totalorder %s1641_s18, 1 }
   0x9   : > { %p1706_p4 = por %p2649_p1, %p41_p0  ;;  %p141_p7 = scmp.lt.s32.totalorder %s1641_s18, 3 }
   0xa   : > { %p1711_p6 = por %p134_p3, %p41_p0  ;;  %s1643_s24 = smov [#allocation5]  }
   0xb   : > { %s2652_s21 = scalar_select %p1706_p4, 1, 0 }
   0xc   : > { %s2653_s22 = scalar_select %p1711_p6, 1, 0 }
   0xd   : > { %p1716_p8 = pnand %p1261_p5, %p141_p7  ;;  %s153_s25 = sshll.u32 %s1643_s24, 4  ;;  %s1720_s25 = int_to_ptr.vmem [resolvable:$true] %s153_s25 }
   0xe   : > { %s1732_s27 = sadd.s32 1, %s1641_s18   ;;  %s28_s28 = sadd.s32 1, %s1637_s17 }
   0xf   : > { %s2654_s23 = scalar_select %p1716_p8, 1, 0 }
  0x10   : > { %p1395_p9 = pneg %p1716_p8  ;;  %s25_s29 = ssub.s32 %s1641_s18, %s1732_s27 }
  0x11   : > { %s1513_s6 = scalar_lea.hbm %s2645_s1, 1024 }
  0x12   : > { %p1727_p11 = pnand %p1395_p9, %p2649_p1  ;;  %p1514_p12 = scmp.ne.s32.totalorder %s2645_s1, %s1513_s6 }
  0x13   : > { %p1520_p5 = scmp.lt.u32.totalorder %s1513_s6, %s2645_s1 }
  0x14   : > { %p1515_p13 = pneg %p1727_p11 }
  0x16   : > { %p1516_p0 = pnand %p1515_p13, %p1514_p12 }
  0x18   : > { %p1517_p3 = pneg %p1516_p0 }
  0x1a   : > { %p1522_p7 = pnand %p1520_p5, %p1517_p3 }
  0x1c   : > { %1525 = shalt.err (!%p1522_p7)
}
  0x1d   : > { %s1526_s11 = scalar_lea.vmem %s1720_s25, 1024  ;;  %p1534_p2 = scmp.lt.s32.totalorder %s1720_s25, %s1720_s25 }
  0x1e   : > { %p1527_p9 = scmp.ne.s32.totalorder %s1720_s25, %s1526_s11  ;;  %p1535_p6 = scmp.lt.s32.totalorder %s1526_s11, %s1526_s11 }
  0x20   : > { %p1529_p10 = pnand %p1527_p9, %p1515_p13  ;;  %p1536_p4 = por %p1535_p6, %p1534_p2 }
  0x22   : > { %p1530_p1 = pneg %p1529_p10 }
  0x24   : > { %p1537_p8 = pnand %p1536_p4, %p1530_p1 }
  0x26   : > { %1540 = shalt.err (!%p1537_p8)
}
  0x27   : > { %s1644_s12 = smov 128   ;;  %s1645_s13 = smov 8  }
  0x28   : > { %1398 = dma.hbm_to_vmem [thread:$0]  (!%p1727_p11), %s2645_s1, 1024, %s1720_s25, [#allocation6], %s1644_s12, %s1644_s12, %s1645_s13  }
  0x29   : > { %p26_p1 = scmp.eq.s32.totalorder %s25_s29, 0  ;;  %p35_p2 = scmp.ne.s32.totalorder %s1637_s17, %s1633_s16 }
  0x2a   : > { %p36_p4 = scmp.eq.s32.totalorder %s1641_s18, 0  ;;  %p1408_p6 = scmp.lt.s32.totalorder %s1641_s18, 2 }
  0x2b   : > { %s1766_s24 = scalar_select %p26_p1, %s1637_s17, %s28_s28  }
  0x2c   : > { %p37_p8 = por %p36_p4, %p35_p2  ;;  %p2656_p10 = scmp.eq.s32.totalorder %s1697_s19, 1 }
  0x2d   : > { %s173_s26 = sand.u32 1, %s1637_s17   ;;  %s1304_s5 = sshll.u32 %s1641_s18, 10 }
  0x2e   : > { %p1770_p12 = por %p2656_p10, %p35_p2  ;;  %s1264_s6 = sshll.u32 %s173_s26, 6 }
  0x2f   : > { %s1779_s9 = scalar_lea.hbm %s2644_s0, %s1304_s5  ;;  %s177_s25 = scalar_lea.vmem [#allocation2], %s1264_s6 }
  0x30   : > { %s184_s28 = sshll.u32 %s177_s25, 4  ;;  %p1781_p11 = pnand %p1408_p6, %p37_p8  ;;  %s1785_s28 = int_to_ptr.vmem [resolvable:$true] %s184_s28 }
  0x31   : > { %s1787_s10 = scalar_lea.sflag [#allocation3], %s173_s26  ;;  %s1541_s11 = scalar_lea.hbm %s1779_s9, 1024 }
  0x32   : > { %p1542_p13 = scmp.ne.s32.totalorder %s1779_s9, %s1541_s11  ;;  %p1543_p0 = pneg %p1781_p11 }
  0x33   : > { %s1546_s5 = scalar_lea.hbm %s2644_s0, 2048  ;;  %p1547_p7 = scmp.lt.u32.totalorder %s1779_s9, %s2644_s0 }
  0x34   : > { %p1544_p3 = pnand %p1543_p0, %p1542_p13  ;;  %p1548_p9 = scmp.lt.u32.totalorder %s1546_s5, %s1541_s11 }
  0x35   : > { %p1550_p2 = scmp.lt.u32.totalorder %s1541_s11, %s1779_s9 }
  0x36   : > { %p1545_p5 = pneg %p1544_p3  ;;  %p1549_p1 = por %p1548_p9, %p1547_p7 }
  0x38   : > { %p1551_p4 = por %p1550_p2, %p1549_p1 }
  0x3a   : > { %p1552_p6 = pnand %p1551_p4, %p1545_p5 }
  0x3c   : > { %1555 = shalt.err (!%p1552_p6)
}
  0x3d   : > { %s1556_s26 = scalar_lea.vmem %s1785_s28, 1024  ;;  %s1646_s8 = smov [#allocation2]  }
  0x3e   : > { %p1557_p8 = scmp.ne.s32.totalorder %s1785_s28, %s1556_s26  ;;  %s1561_s25 = sshll.u32 %s1646_s8, 4  ;;  %s1562_s25 = int_to_ptr.vmem [resolvable:$false] %s1561_s25 }
  0x3f   : > { %s1563_s14 = scalar_lea.vmem %s1562_s25, 2048  ;;  %p1564_p3 = scmp.lt.s32.totalorder %s1785_s28, %s1562_s25 }
  0x40   : > { %p1559_p10 = pnand %p1557_p8, %p1543_p0  ;;  %p1565_p7 = scmp.lt.s32.totalorder %s1563_s14, %s1556_s26 }
  0x42   : > { %p1560_p13 = pneg %p1559_p10  ;;  %p1566_p9 = por %p1565_p7, %p1564_p3 }
  0x44   : > { %p1567_p1 = pnand %p1566_p9, %p1560_p13 }
  0x46   : > { %1570 = shalt.err (!%p1567_p1)
}
  0x47   : > { %1402 = dma.hbm_to_vmem [thread:$0]  (!%p1781_p11), %s1779_s9, 1024, %s1785_s28, %s1787_s10, %s1644_s12, %s1644_s12, %s1645_s13  }
  0x48   : > { %p2659_p0 = scmp.ne.s32.totalorder %s2654_s23, 0 }
  0x49   : > { %s1821_s11 = sand.u32 (!%p2659_p0), 1, %s1633_s16   ;;  %p2660_p5 = scmp.ne.s32.totalorder (!%p2659_p0), %s2652_s21, 0 }
  0x4a   : > { %196 = sbr.rel (%p2659_p0) target bundleno = 627 (0x273), region = 36  ;;  %s1268_s20 = sshll.u32 (!%p2659_p0), %s1821_s11, 6 }
  0x4b   : > { %s199_s5 = scalar_lea.sflag (!%p2659_p0), [#allocation3], %s1821_s11  ;;  %s1825_s6 = scalar_lea.vmem (!%p2659_p0), [#allocation2], %s1268_s20 }
  0x51   : > { %1616 = dma.done.wait (%p2660_p5), %s199_s5, 1024  }
  0x52   : > { %1618 = vsyncadd (%p2660_p5), %s199_s5, 4294966272  ;;  %p2661_p11 = scmp.eq.s32.totalorder %s1697_s19, 0 }
  0x54   : > { %1620 = dma.done.wait (%p2661_p11), [#allocation6], 1024   ;;  %p2662_p2 = pmov %p2661_p11 }
  0x55   : > { %v248_v0 = vld [vmem:[#allocation5] sm:$0xff]  ;;  %v249_v1 = vld [vmem:[#allocation5 + $0x8] sm:$0xff]  ;;  %vm252_vm0 = vcmask 261120   ;;  %v250_v5 = vld [vmem:[#allocation5 + $0x10] sm:$0xff]  ;;  %v243_v20 = vlaneseq  ;;  %v1647_v29 = vmov 0.0   ;;  %s1270_s9 = sshll.u32 %s1821_s11, 7 }
  0x56   : > { %1622 = vsyncadd (%p2662_p2), [#allocation6], 4294966272  ;;  %v724_v2 = vld [vmem:[#allocation5 + $0x20] sm:$0xff]  ;;  %v1371_v3 = vpack.c.bf16 %v249_v1, %v248_v0  ;;  %v725_v4 = vld [vmem:[#allocation5 + $0x28] sm:$0xff]  ;;  %s2247_s28 = scalar_lea.vmem [#allocation7], %s1270_s9  ;;  %s1306_s29 = sshll.u32 %s1697_s19, 11 }
  0x57   : > { %v251_v6 = vld [vmem:[#allocation5 + $0x18] sm:$0xff]  ;;  %v1379_v7 = vpack.c.bf16 %v725_v4, %v724_v2  ;;  %v726_v9 = vld [vmem:[#allocation5 + $0x30] sm:$0xff]  ;;  %v233_v11 = vld [vmem:[%s1825_s6] sm:$0xff]  ;;  %v1859_v21 = vand.u32 127, %v243_v20  ;;  %s1177_s10 = sshll.u32 %s2247_s28, 4  ;;  %s2596_s8 = scalar_lea.hbm %s2648_s4, %s1306_s29  ;;  %s2598_s10 = int_to_ptr.vmem [resolvable:$true] %s1177_s10 }
  0x58   : > { %v1375_v8 = vpack.c.bf16 %v251_v6, %v250_v5  ;;  %v727_v10 = vld [vmem:[#allocation5 + $0x38] sm:$0xff]  ;;  %1372 = vmatprep.subr.bf16.mxu0 %v1371_v3  ;;  %1339 = vmatprep.mubr.msk.f32.mxu0 %vm252_vm0, %v233_v11  ;;  %v234_v13 = vld [vmem:[%s1825_s6 + $0x8] sm:$0xff]  ;;  %v235_v14 = vld [vmem:[%s1825_s6 + $0x10] sm:$0xff]  ;;  %s1163_s19 = scalar_lea.sflag [#allocation4], %s1821_s11  ;;  %s1571_s25 = scalar_lea.vmem %s2598_s10, 2048 }
  0x59   : > { %v1383_v12 = vpack.c.bf16 %v727_v10, %v726_v9  ;;  %1380 = vmatprep.subr.bf16.mxu1 %v1379_v7  ;;  %1374 = vmatpush3.bf16.msra.mxu0 %v1371_v3  ;;  %v236_v15 = vld [vmem:[%s1825_s6 + $0x18] sm:$0xff]  ;;  %v237_v16 = vld [vmem:[%s1825_s6 + $0x20] sm:$0xff]  ;;  %v238_v17 = vld [vmem:[%s1825_s6 + $0x28] sm:$0xff]  ;;  %vm245_vm1 = vcmp.ge.s32.totalorder %v1859_v21, 16  ;;  %p1572_p4 = scmp.ne.s32.totalorder %s2598_s10, %s1571_s25  ;;  %s1648_s14 = smov [#allocation7]  }
  0x5a   : > { %1382 = vmatpush3.bf16.msra.mxu1 %v1379_v7  ;;  %1376 = vmatprep.subr.bf16.mxu0 %v1375_v8  ;;  %v239_v18 = vld [vmem:[%s1825_s6 + $0x30] sm:$0xff]  ;;  %v240_v19 = vld [vmem:[%s1825_s6 + $0x38] sm:$0xff]  ;;  %v1880_v30 = vsel %vm245_vm1, 1.0, %v1647_v29  ;;  %s1575_s20 = sshll.u32 %s1648_s14, 4  ;;  %s1576_s20 = int_to_ptr.vmem [resolvable:$false] %s1575_s20 }
  0x5b   : > { %1384 = vmatprep.subr.bf16.mxu1 %v1383_v12  ;;  %1359 = vmatprep.mubr.msk.f32.mxu1 %vm252_vm0, %v233_v11  ;;  %p1573_p6 = pnand %p1572_p4, %p1770_p12  ;;  %s1577_s5 = scalar_lea.vmem %s1576_s20, 4096 }
  0x5c   : > { %p1578_p10 = scmp.lt.s32.totalorder %s2598_s10, %s1576_s20  ;;  %p1579_p13 = scmp.lt.s32.totalorder %s1577_s5, %s1571_s25 }
  0x5d   : > { %1378 = vmatpush3.bf16.msra.mxu0 %v1375_v8  ;;  %p1574_p8 = pneg %p1573_p6 }
  0x5e   : > { %1386 = vmatpush3.bf16.msra.mxu1 %v1383_v12  ;;  %p1580_p3 = por %p1579_p13, %p1578_p10 }
  0x60   : > { %1340 = vmatmul.mubr.msk.f32.vlgmr.msra.gmra.mrb[0].mxu0 %vm252_vm0, %v234_v13  ;;  %p1581_p7 = pnand %p1580_p3, %p1574_p8 }
  0x61   : > { %1360 = vmatmul.mubr.msk.f32.vlgmr.msra.gmra.mrb[0].mxu1 %vm252_vm0, %v234_v13  ;;  %1342 = vmatprep.mubr.msk.f32.mxu0 %vm252_vm0, %v235_v14 }
  0x62   : > { %1362 = vmatprep.mubr.msk.f32.mxu1 %vm252_vm0, %v235_v14 }
  0x64   : > { %1343 = vmatmul.mubr.msk.f32.gmra.mrb[2].mxu0 %vm252_vm0, %v236_v15 }
  0x65   : > { %1363 = vmatmul.mubr.msk.f32.gmra.mrb[2].mxu1 %vm252_vm0, %v236_v15  ;;  %1345 = vmatprep.mubr.msk.f32.mxu0 %vm252_vm0, %v237_v16 }
  0x66   : > { %1365 = vmatprep.mubr.msk.f32.mxu1 %vm252_vm0, %v237_v16 }
  0x68   : > { %1346 = vmatmul.mubr.msk.f32.gmra.mrb[4].mxu0 %vm252_vm0, %v238_v17 }
  0x69   : > { %1366 = vmatmul.mubr.msk.f32.gmra.mrb[4].mxu1 %vm252_vm0, %v238_v17  ;;  %1348 = vmatprep.mubr.msk.f32.mxu0 %vm252_vm0, %v239_v18 }
  0x6a   : > { %1368 = vmatprep.mubr.msk.f32.mxu1 %vm252_vm0, %v239_v18 }
  0x6c   : > { %1349 = vmatmul.mubr.msk.f32.gmra.mrb[6].mxu0 %vm252_vm0, %v240_v19 }
  0x6d   : > { %1369 = vmatmul.mubr.msk.f32.gmra.mrb[6].mxu1 %vm252_vm0, %v240_v19 }
 0x133   : > { %v1861_v22 = vpop.f32.mrb[0].mxu0 }
 0x134   : > { %v1864_v23 = vpop.f32.mrb[0].mxu1  ;;  %v1866_v24 = vpop.f32.mrb[1].mxu0  ;;  %v393_v25 = vsel %vm252_vm0, %v1861_v22, 0.0  ;;  %v1876_v28 = vmul.f32 %v1861_v22, %v1861_v22  ;;  %v439_v36 = vmul.f32 %v1861_v22, %v1880_v30 }
 0x135   : > { %v1870_v26 = vpop.f32.mrb[1].mxu1  ;;  %v844_v27 = vsel %vm252_vm0, %v1864_v23, 0.0  ;;  %394 = vadd.xlane.f32.xlu0 %v393_v25  ;;  %v390_v32 = vsel %vm252_vm0, %v1866_v24, 0.0  ;;  %v382_v40 = vmul.f32 %v1866_v24, %v1866_v24  ;;  %v890_v44 = vmul.f32 %v1864_v23, %v1880_v30 }
 0x136   : > { %845 = vadd.xlane.f32.xlu1 %v844_v27  ;;  %v417_v35 = vsel %vm252_vm0, %v1876_v28, 0.0  ;;  %v841_v39 = vsel %vm252_vm0, %v1870_v26, 0.0  ;;  %v449_v43 = vsel %vm252_vm0, %v439_v36, 0.0  ;;  %v438_v48 = vmul.f32 %v1880_v30, %v1866_v24 }
 0x137   : > { %v1882_v31 = vpop.f32.mrb[2].mxu0  ;;  %v414_v47 = vsel %vm252_vm0, %v382_v40, 0.0  ;;  %v900_v51 = vsel %vm252_vm0, %v890_v44, 0.0  ;;  %v834_v52 = vmul.f32 %v1864_v23, %v1864_v23  ;;  %v889_v58 = vmul.f32 %v1880_v30, %v1870_v26 }
 0x138   : > { %v1886_v33 = vpop.f32.mrb[3].mxu0  ;;  %v1888_v34 = vpop.f32.mrb[2].mxu1  ;;  %v446_v57 = vsel %vm252_vm0, %v438_v48, 0.0  ;;  %v399_v0 = vsel %vm252_vm0, %v1882_v31, 0.0  ;;  %v833_v1 = vmul.f32 %v1870_v26, %v1870_v26  ;;  %v471_v16 = vmul.f32 %v1880_v30, %v1876_v28 }
 0x139   : > { %391 = vadd.xlane.f32.xlu0 %v390_v32  ;;  %v1894_v37 = vpop.f32.mrb[3].mxu1  ;;  %v868_v59 = vsel %vm252_vm0, %v834_v52, 0.0  ;;  %v897_v2 = vsel %vm252_vm0, %v889_v58, 0.0  ;;  %v850_v11 = vsel %vm252_vm0, %v1888_v34, 0.0  ;;  %v470_v28 = vmul.f32 %v1880_v30, %v382_v40 }
 0x13a   : > { %418 = vadd.xlane.f32.xlu1 %v417_v35  ;;  %v865_v12 = vsel %vm252_vm0, %v833_v1, 0.0  ;;  %v847_v27 = vsel %vm252_vm0, %v1894_v37, 0.0  ;;  %v481_v29 = vsel %vm252_vm0, %v471_v16, 0.0  ;;  %v922_v32 = vmul.f32 %v1880_v30, %v834_v52 }
 0x13b   : > { %v1896_v38 = vpop.f32.mrb[4].mxu0  ;;  %v478_v35 = vsel %vm252_vm0, %v470_v28, 0.0  ;;  %v921_v36 = vmul.f32 %v1880_v30, %v833_v1  ;;  %v384_v44 = vmul.f32 %v1886_v33, %v1886_v33  ;;  %v396_v40 = vsel %vm252_vm0, %v1886_v33, 0.0 }
 0x13c   : > { %v1902_v41 = vpop.f32.mrb[5].mxu0  ;;  %v1904_v42 = vpop.f32.mrb[4].mxu1  ;;  %v1927_v54 = vmul.f32 %v1896_v38, %v1880_v30  ;;  %v1943_v60 = vmul.f32 %v1896_v38, %v1896_v38  ;;  %v892_v1 = vmul.f32 %v1888_v34, %v1880_v30  ;;  %v836_v16 = vmul.f32 %v1888_v34, %v1888_v34 }
 0x13d   : > { %842 = vadd.xlane.f32.xlu0 %v841_v39  ;;  %v1909_v45 = vpop.f32.mrb[5].mxu1  ;;  %v1931_v55 = vmul.f32 %v1904_v42, %v1880_v30  ;;  %v1947_v61 = vmul.f32 %v1902_v41, %v1902_v41  ;;  %v1951_v62 = vmul.f32 %v1904_v42, %v1904_v42  ;;  %v932_v39 = vsel %vm252_vm0, %v922_v32, 0.0 }
 0x13e   : > { %450 = vadd.xlane.f32.xlu1 %v449_v43  ;;  %v1935_v56 = vmul.f32 %v1880_v30, %v1909_v45  ;;  %v1955_v63 = vmul.f32 %v1909_v45, %v1909_v45  ;;  %v1964_v3 = vmul.f32 %v1880_v30, %v1943_v60  ;;  %v929_v43 = vsel %vm252_vm0, %v921_v36, 0.0 }
 0x13f   : > { %v1911_v46 = vpop.f32.mrb[6].mxu0  ;;  %v1968_v4 = vmul.f32 %v1880_v30, %v1947_v61  ;;  %v1972_v5 = vmul.f32 %v1880_v30, %v1951_v62  ;;  %v420_v48 = vsel %vm252_vm0, %v384_v44, 0.0  ;;  %v874_v28 = vsel %vm252_vm0, %v836_v16, 0.0 }
 0x140   : > { %v1916_v49 = vpop.f32.mrb[7].mxu0  ;;  %v1918_v50 = vpop.f32.mrb[6].mxu1  ;;  %v1976_v6 = vmul.f32 %v1880_v30, %v1955_v63  ;;  %v1980_v7 = vmul.f32 %v1911_v46, %v1880_v30  ;;  %v1999_v13 = vmul.f32 %v1911_v46, %v1911_v46  ;;  %v405_v32 = vsel %vm252_vm0, %v1896_v38, 0.0 }
 0x141   : > { %415 = vadd.xlane.f32.xlu0 %v414_v47  ;;  %v1923_v53 = vpop.f32.mrb[7].mxu1  ;;  %v1984_v8 = vmul.f32 %v1880_v30, %v1916_v49  ;;  %v1988_v9 = vmul.f32 %v1918_v50, %v1880_v30  ;;  %v2003_v14 = vmul.f32 %v1916_v49, %v1916_v49  ;;  %v2007_v15 = vmul.f32 %v1918_v50, %v1918_v50 }
 0x142   : > { %901 = vadd.xlane.f32.xlu1 %v900_v51  ;;  %v1992_v10 = vmul.f32 %v1880_v30, %v1923_v53  ;;  %v2013_v17 = vmul.f32 %v1923_v53, %v1923_v53  ;;  %v2017_v18 = vmul.f32 %v1880_v30, %v1999_v13  ;;  %v385_v47 = vmul.f32 %v1882_v31, %v1882_v31 }
 0x143   : > { %v2021_v19 = vmul.f32 %v1880_v30, %v2003_v14  ;;  %v2025_v20 = vmul.f32 %v1880_v30, %v2007_v15  ;;  %v440_v51 = vmul.f32 %v1880_v30, %v1886_v33  ;;  %v856_v36 = vsel %vm252_vm0, %v1904_v42, 0.0 }
 0x144   : > { %v2029_v25 = vmul.f32 %v1880_v30, %v2013_v17  ;;  %v423_v52 = vsel %vm252_vm0, %v385_v47, 0.0 }
 0x145   : > { %447 = vadd.xlane.f32.xlu0 %v446_v57  ;;  %v441_v57 = vmul.f32 %v1882_v31, %v1880_v30  ;;  %v452_v58 = vsel %vm252_vm0, %v440_v51, 0.0 }
 0x146   : > { %869 = vadd.xlane.f32.xlu1 %v868_v59  ;;  %v891_v59 = vmul.f32 %v1880_v30, %v1894_v37 }
 0x149   : > { %898 = vadd.xlane.f32.xlu0 %v897_v2  ;;  %v903_v2 = vsel %vm252_vm0, %v891_v59, 0.0  ;;  %v461_v59 = vsel %vm252_vm0, %v1927_v54, 0.0  ;;  %v877_v54 = vsel %vm252_vm0, %v1955_v63, 0.0  ;;  %v493_v63 = vsel %vm252_vm0, %v1964_v3, 0.0 }
 0x14a   : > { %400 = vadd.xlane.f32.xlu1 %v399_v0  ;;  %v455_v0 = vsel %vm252_vm0, %v441_v57, 0.0  ;;  %v915_v3 = vsel %vm252_vm0, %v1992_v10, 0.0  ;;  %v499_v10 = vsel %vm252_vm0, %v2017_v18, 0.0 }
 0x14d   : > { %866 = vadd.xlane.f32.xlu0 %v865_v12  ;;  %v906_v12 = vsel %vm252_vm0, %v892_v1, 0.0  ;;  %v912_v1 = vsel %vm252_vm0, %v1931_v55, 0.0  ;;  %v408_v55 = vsel %vm252_vm0, %v1916_v49, 0.0 }
 0x14e   : > { %851 = vadd.xlane.f32.xlu1 %v850_v11  ;;  %v835_v11 = vmul.f32 %v1894_v37, %v1894_v37 }
 0x151   : > { %848 = vadd.xlane.f32.xlu0 %v847_v27  ;;  %v871_v27 = vsel %vm252_vm0, %v835_v11, 0.0 }
 0x152   : > { %482 = vadd.xlane.f32.xlu1 %v481_v29  ;;  %v402_v29 = vsel %vm252_vm0, %v1902_v41, 0.0 }
 0x155   : > { %479 = vadd.xlane.f32.xlu0 %v478_v35  ;;  %v853_v35 = vsel %vm252_vm0, %v1909_v45, 0.0 }
 0x156   : > { %933 = vadd.xlane.f32.xlu1 %v932_v39  ;;  %v472_v39 = vmul.f32 %v1880_v30, %v384_v44 }
 0x159   : > { %930 = vadd.xlane.f32.xlu0 %v929_v43  ;;  %v473_v43 = vmul.f32 %v1880_v30, %v385_v47 }
 0x15a   : > { %397 = vadd.xlane.f32.xlu1 %v396_v40  ;;  %v484_v40 = vsel %vm252_vm0, %v472_v39, 0.0 }
 0x15b   : > { %v487_v51 = vsel %vm252_vm0, %v473_v43, 0.0 }
 0x15d   : > { %421 = vadd.xlane.f32.xlu0 %v420_v48  ;;  %v923_v48 = vmul.f32 %v1880_v30, %v835_v11  ;;  %v880_v11 = vsel %vm252_vm0, %v1951_v62, 0.0  ;;  %v490_v62 = vsel %vm252_vm0, %v1968_v4, 0.0  ;;  %v918_v4 = vsel %vm252_vm0, %v1988_v9, 0.0 }
 0x15e   : > { %424 = vadd.xlane.f32.xlu1 %v423_v52  ;;  %v924_v52 = vmul.f32 %v1880_v30, %v836_v16  ;;  %v944_v16 = vsel %vm252_vm0, %v1972_v5, 0.0  ;;  %v432_v5 = vsel %vm252_vm0, %v2003_v14, 0.0  ;;  %v496_v9 = vsel %vm252_vm0, %v2021_v19, 0.0 }
 0x15f   : > { %v935_v57 = vsel %vm252_vm0, %v923_v48, 0.0  ;;  %v950_v14 = vsel %vm252_vm0, %v2025_v20, 0.0 }
 0x160   : > { %v938_v44 = vsel %vm252_vm0, %v924_v52, 0.0 }
 0x161   : > { %453 = vadd.xlane.f32.xlu0 %v452_v58  ;;  %v442_v58 = vmul.f32 %v1880_v30, %v1902_v41  ;;  %v426_v30 = vsel %vm252_vm0, %v1947_v61, 0.0  ;;  %v862_v61 = vsel %vm252_vm0, %v1918_v50, 0.0 }
 0x162   : > { %456 = vadd.xlane.f32.xlu1 %v455_v0  ;;  %v909_v0 = vsel %vm252_vm0, %v1935_v56, 0.0  ;;  %v411_v56 = vsel %vm252_vm0, %v1911_v46, 0.0 }
 0x163   : > { %v458_v47 = vsel %vm252_vm0, %v442_v58, 0.0 }
 0x165   : > { %904 = vadd.xlane.f32.xlu0 %v903_v2  ;;  %v429_v2 = vsel %vm252_vm0, %v1943_v60, 0.0  ;;  %v859_v60 = vsel %vm252_vm0, %v1923_v53, 0.0 }
 0x166   : > { %907 = vadd.xlane.f32.xlu1 %v906_v12  ;;  %v941_v12 = vsel %vm252_vm0, %v1976_v6, 0.0  ;;  %v435_v6 = vsel %vm252_vm0, %v1999_v13, 0.0  ;;  %v947_v13 = vsel %vm252_vm0, %v2029_v25, 0.0 }
 0x169   : > { %872 = vadd.xlane.f32.xlu0 %v871_v27  ;;  %v464_v27 = vsel %vm252_vm0, %v1984_v8, 0.0  ;;  %v886_v8 = vsel %vm252_vm0, %v2007_v15, 0.0 }
 0x16a   : > { %875 = vadd.xlane.f32.xlu1 %v874_v28  ;;  %v467_v28 = vsel %vm252_vm0, %v1980_v7, 0.0  ;;  %v883_v7 = vsel %vm252_vm0, %v2013_v17, 0.0 }
 0x16d   : > { %403 = vadd.xlane.f32.xlu0 %v402_v29 }
 0x16e   : > { %406 = vadd.xlane.f32.xlu1 %v405_v32 }
 0x171   : > { %854 = vadd.xlane.f32.xlu0 %v853_v35 }
 0x172   : > { %857 = vadd.xlane.f32.xlu1 %v856_v36 }
 0x175   : > { %485 = vadd.xlane.f32.xlu0 %v484_v40 }
 0x176   : > { %488 = vadd.xlane.f32.xlu1 %v487_v51 }
 0x179   : > { %936 = vadd.xlane.f32.xlu0 %v935_v57 }
 0x17a   : > { %939 = vadd.xlane.f32.xlu1 %v938_v44 }
 0x17d   : > { %459 = vadd.xlane.f32.xlu0 %v458_v47 }
 0x17e   : > { %462 = vadd.xlane.f32.xlu1 %v461_v59 }
 0x181   : > { %910 = vadd.xlane.f32.xlu0 %v909_v0 }
 0x182   : > { %913 = vadd.xlane.f32.xlu1 %v912_v1 }
 0x185   : > { %427 = vadd.xlane.f32.xlu0 %v426_v30 }
 0x186   : > { %430 = vadd.xlane.f32.xlu1 %v429_v2 }
 0x189   : > { %878 = vadd.xlane.f32.xlu0 %v877_v54 }
 0x18a   : > { %881 = vadd.xlane.f32.xlu1 %v880_v11 }
 0x18d   : > { %409 = vadd.xlane.f32.xlu0 %v408_v55 }
 0x18e   : > { %412 = vadd.xlane.f32.xlu1 %v411_v56 }
 0x191   : > { %860 = vadd.xlane.f32.xlu0 %v859_v60 }
 0x192   : > { %863 = vadd.xlane.f32.xlu1 %v862_v61 }
 0x195   : > { %491 = vadd.xlane.f32.xlu0 %v490_v62 }
 0x196   : > { %494 = vadd.xlane.f32.xlu1 %v493_v63 }
 0x199   : > { %942 = vadd.xlane.f32.xlu0 %v941_v12 }
 0x19a   : > { %945 = vadd.xlane.f32.xlu1 %v944_v16 }
 0x19d   : > { %465 = vadd.xlane.f32.xlu0 %v464_v27 }
 0x19e   : > { %468 = vadd.xlane.f32.xlu1 %v467_v28 }
 0x1a1   : > { %916 = vadd.xlane.f32.xlu0 %v915_v3 }
 0x1a2   : > { %919 = vadd.xlane.f32.xlu1 %v918_v4 }
 0x1a5   : > { %433 = vadd.xlane.f32.xlu0 %v432_v5 }
 0x1a6   : > { %436 = vadd.xlane.f32.xlu1 %v435_v6 }
 0x1a9   : > { %884 = vadd.xlane.f32.xlu0 %v883_v7 }
 0x1aa   : > { %887 = vadd.xlane.f32.xlu1 %v886_v8 }
 0x1ad   : > { %497 = vadd.xlane.f32.xlu0 %v496_v9 }
 0x1ae   : > { %500 = vadd.xlane.f32.xlu1 %v499_v10 }
 0x1b1   : > { %948 = vadd.xlane.f32.xlu0 %v947_v13 }
 0x1b2   : > { %951 = vadd.xlane.f32.xlu1 %v950_v14 }
 0x1c2   : > { %v395_v17 = vpop.xlane.xlu0 %394 }
 0x1c3   : > { %v846_v15 = vpop.xlane.xlu1 %845 }
 0x1c6   : > { %v392_v29 = vpop.xlane.xlu0 %391 }
 0x1c7   : > { %v419_v32 = vpop.xlane.xlu1 %418 }
 0x1ca   : > { %v843_v35 = vpop.xlane.xlu0 %842 }
 0x1cb   : > { %v451_v36 = vpop.xlane.xlu1 %450 }
 0x1cc   : > { %v511_v51 = vsub.f32 %v395_v17, %v451_v36  ;;  %v2143_v58 = vmul.f32 0.0625, %v451_v36 }
 0x1ce   : > { %v416_v19 = vpop.xlane.xlu0 %415  ;;  %v2145_v44 = vmul.f32 0.0625, %v511_v51  ;;  %v535_v11 = vmul.f32 %v2143_v58, %v2143_v58 }
 0x1cf   : > { %v902_v39 = vpop.xlane.xlu1 %901 }
 0x1d0   : > { %v962_v25 = vsub.f32 %v846_v15, %v902_v39  ;;  %v2147_v59 = vmul.f32 0.0625, %v902_v39  ;;  %v591_v60 = vmul.f32 %v2145_v44, %v2145_v44 }
 0x1d2   : > { %v448_v43 = vpop.xlane.xlu0 %447  ;;  %v2149_v0 = vmul.f32 0.0625, %v962_v25  ;;  %v986_v63 = vmul.f32 %v2147_v59, %v2147_v59 }
 0x1d3   : > { %v870_v18 = vpop.xlane.xlu1 %869  ;;  %v510_v57 = vsub.f32 %v392_v29, %v448_v43  ;;  %v2153_v30 = vmul.f32 0.0625, %v448_v43 }
 0x1d4   : > { %v1042_v12 = vmul.f32 %v2149_v0, %v2149_v0 }
 0x1d5   : > { %v2155_v2 = vmul.f32 0.0625, %v510_v57  ;;  %v534_v3 = vmul.f32 %v2153_v30, %v2153_v30 }
 0x1d6   : > { %v899_v40 = vpop.xlane.xlu0 %898 }
 0x1d7   : > { %v2139_v48 = vpop.xlane.xlu1 %400  ;;  %v961_v47 = vsub.f32 %v843_v35, %v899_v40  ;;  %v2161_v61 = vmul.f32 0.0625, %v899_v40  ;;  %v590_v4 = vmul.f32 %v2155_v2, %v2155_v2 }
 0x1d9   : > { %v2163_v62 = vmul.f32 0.0625, %v961_v47  ;;  %v985_v14 = vmul.f32 %v2161_v61, %v2161_v61 }
 0x1da   : > { %v867_v52 = vpop.xlane.xlu0 %866 }
 0x1db   : > { %v2141_v20 = vpop.xlane.xlu1 %851  ;;  %v1041_v17 = vmul.f32 %v2163_v62, %v2163_v62 }
 0x1de   : > { %v2151_v1 = vpop.xlane.xlu0 %848 }
 0x1df   : > { %v483_v54 = vpop.xlane.xlu1 %482 }
 0x1e0   : > { %v527_v55 = vmul.f32 0.0625, %v483_v54  ;;  %v575_v56 = vsub.f32 %v419_v32, %v483_v54 }
 0x1e2   : > { %v543_v16 = vsub.f32 %v527_v55, %v535_v11  ;;  %v583_v27 = vmul.f32 0.0625, %v575_v56  ;;  %v480_v28 = vpop.xlane.xlu0 %479 }
 0x1e3   : > { %v526_v5 = vmul.f32 0.0625, %v480_v28  ;;  %v574_v6 = vsub.f32 %v416_v19, %v480_v28  ;;  %v934_v7 = vpop.xlane.xlu1 %933 }
 0x1e4   : > { %v551_v8 = vmax.f32 %v543_v16, 0.0  ;;  %v599_v9 = vsub.f32 %v583_v27, %v591_v60  ;;  %v978_v10 = vmul.f32 0.0625, %v934_v7  ;;  %v1026_v13 = vsub.f32 %v870_v18, %v934_v7 }
 0x1e5   : > { %v542_v15 = vsub.f32 %v526_v5, %v534_v3  ;;  %v582_v29 = vmul.f32 0.0625, %v574_v6 }
 0x1e6   : > { %v559_v32 = vadd.f32 1e-05, %v551_v8  ;;  %v607_v35 = vmax.f32 %v599_v9, 0.0  ;;  %v994_v36 = vsub.f32 %v978_v10, %v986_v63  ;;  %v1034_v39 = vmul.f32 0.0625, %v1026_v13  ;;  %v931_v43 = vpop.xlane.xlu0 %930 }
 0x1e7   : > { %v550_v40 = vmax.f32 %v542_v15, 0.0  ;;  %v598_v19 = vsub.f32 %v582_v29, %v590_v4  ;;  %v977_v51 = vmul.f32 0.0625, %v931_v43  ;;  %v1025_v25 = vsub.f32 %v867_v52, %v931_v43  ;;  %v2177_v57 = vpop.xlane.xlu1 %397 }
 0x1e8   : > { %1449 = vrsqrt.f32 %v559_v32  ;;  %v615_v18 = vadd.f32 1e-05, %v607_v35  ;;  %v1002_v47 = vmax.f32 %v994_v36, 0.0  ;;  %v1050_v54 = vsub.f32 %v1034_v39, %v1042_v12 }
 0x1e9   : > { %v558_v11 = vadd.f32 1e-05, %v550_v40  ;;  %v606_v55 = vmax.f32 %v598_v19, 0.0  ;;  %v993_v56 = vsub.f32 %v977_v51, %v985_v14  ;;  %v1033_v60 = vmul.f32 0.0625, %v1025_v25  ;;  %v2190_v14 = vld [vmem:[%s2646_s2] ss:$0 sm:$0xff] }
 0x1ea   : > { %1451 = vrsqrt.f32 %v615_v18  ;;  %v1010_v16 = vadd.f32 1e-05, %v1002_v47  ;;  %v1058_v27 = vmax.f32 %v1050_v54, 0.0  ;;  %v2179_v63 = vpop.xlane.xlu0 %421  ;;  %v2204_v51 = vld [vmem:[%s2647_s3] ss:$0 sm:$0xff] }
 0x1eb   : > { %1453 = vrsqrt.f32 %v558_v11  ;;  %v614_v28 = vadd.f32 1e-05, %v606_v55  ;;  %v1001_v3 = vmax.f32 %v993_v56, 0.0  ;;  %v1049_v4 = vsub.f32 %v1033_v60, %v1041_v17  ;;  %v2181_v52 = vpop.xlane.xlu1 %424 }
 0x1ec   : > { %1455 = vrsqrt.f32 %v1010_v16  ;;  %v1066_v5 = vadd.f32 1e-05, %v1058_v27 }
 0x1ed   : > { %1457 = vrsqrt.f32 %v614_v28  ;;  %v1009_v6 = vadd.f32 1e-05, %v1001_v3  ;;  %v1057_v12 = vmax.f32 %v1049_v4, 0.0 }
 0x1ee   : > { %1459 = vrsqrt.f32 %v1066_v5  ;;  %v454_v7 = vpop.xlane.xlu0 %453 }
 0x1ef   : > { %v1065_v8 = vadd.f32 1e-05, %v1057_v12  ;;  %v2183_v9 = vpop.xlane.xlu1 %456  ;;  %1461 = vrsqrt.f32 %v1009_v6  ;;  %v2208_v18 = vmul.f32 0.0625, %v454_v7 }
 0x1f1   : > { %1463 = vrsqrt.f32 %v1065_v8  ;;  %v512_v8 = vsub.f32 %v2177_v57, %v454_v7 }
 0x1f2   : > { %v1450_v10 = vpop.eup %1449  ;;  %v2185_v13 = vpop.xlane.xlu0 %904 }
 0x1f3   : > { %v2192_v17 = vpop.xlane.xlu1 %907  ;;  %v640_v35 = vmul.f32 %v1450_v10, %v2143_v58 }
 0x1f4   : > { %v1452_v15 = vpop.eup %1451 }
 0x1f5   : > { %v1454_v29 = vpop.eup %1453  ;;  %v632_v32 = vsel %vm245_vm1, %v1450_v10, %v1452_v15  ;;  %v648_v36 = vmul.f32 %v1452_v15, %v2145_v44 }
 0x1f6   : > { %v1456_v39 = vpop.eup %1455  ;;  %v670_v43 = vmul.f32 %v2190_v14, %v632_v32  ;;  %v2199_v40 = vpop.xlane.xlu0 %872  ;;  %v639_v11 = vmul.f32 %v1454_v29, %v2153_v30  ;;  %v963_v32 = vsub.f32 %v2151_v1, %v2185_v13 }
 0x1f7   : > { %v1458_v19 = vpop.eup %1457  ;;  %v656_v25 = vsel %vm245_vm1, %v640_v35, %v648_v36  ;;  %v2210_v47 = vpop.xlane.xlu1 %875  ;;  %v1090_v16 = vmul.f32 %v1456_v39, %v2147_v59 }
 0x1f8   : > { %v1460_v58 = vpop.eup %1459  ;;  %v678_v44 = vmul.f32 %v2190_v14, %v656_v25  ;;  %v631_v54 = vsel %vm245_vm1, %v1454_v29, %v1458_v19  ;;  %v647_v55 = vmul.f32 %v1458_v19, %v2155_v2  ;;  %v700_v4 = vmul.f32 %v1861_v22, %v670_v43 }
 0x1f9   : > { %v669_v56 = vmul.f32 %v2190_v14, %v631_v54  ;;  %v1082_v60 = vsel %vm245_vm1, %v1456_v39, %v1460_v58  ;;  %v1098_v27 = vmul.f32 %v1460_v58, %v2149_v0  ;;  %v1462_v28 = vpop.eup %1461  ;;  %v513_v0 = vsub.f32 %v2139_v48, %v2183_v9 }
 0x1fa   : > { %v692_v3 = vsub.f32 %v2204_v51, %v678_v44  ;;  %v655_v5 = vsel %vm245_vm1, %v639_v11, %v647_v55  ;;  %v1114_v30 = vmul.f32 %v2190_v14, %v1082_v60  ;;  %v2228_v2 = vpop.xlane.xlu0 %403  ;;  %v1089_v39 = vmul.f32 %v1462_v28, %v2161_v61 }
 0x1fb   : > { %v1464_v6 = vpop.eup %1463  ;;  %v677_v12 = vmul.f32 %v2190_v14, %v655_v5  ;;  %v1106_v59 = vsel %vm245_vm1, %v1090_v16, %v1098_v27  ;;  %v2236_v10 = vpop.xlane.xlu1 %406  ;;  %v699_v36 = vmul.f32 %v669_v56, %v1866_v24  ;;  %v964_v24 = vsub.f32 %v2141_v20, %v2192_v17 }
 0x1fc   : > { %v708_v22 = vadd.f32 %v700_v4, %v692_v3  ;;  %v1122_v15 = vmul.f32 %v2190_v14, %v1106_v59  ;;  %v1081_v29 = vsel %vm245_vm1, %v1462_v28, %v1464_v6  ;;  %v1097_v48 = vmul.f32 %v1464_v6, %v2163_v62 }
 0x1fd   : > { %v691_v35 = vsub.f32 %v2204_v51, %v677_v12  ;;  %v1138_v7 = vmul.f32 %v1864_v23, %v1114_v30  ;;  %v1113_v1 = vmul.f32 %v2190_v14, %v1081_v29  ;;  %v2261_v19 = vmul.f32 0.0625, %v2183_v9 }
 0x1fe   : > { %716 = vst.msk [vmem:[%s2247_s28 + $0x10] sm:$0xff] %vm252_vm0, %v708_v22  ;;  %v1130_v57 = vsub.f32 %v2204_v51, %v1122_v15  ;;  %v2256_v43 = vpop.xlane.xlu0 %854  ;;  %v1105_v62 = vsel %vm245_vm1, %v1089_v39, %v1097_v48  ;;  %v2263_v25 = vmul.f32 0.0625, %v512_v8  ;;  %v2268_v54 = vmul.f32 0.0625, %v513_v0 }
 0x1ff   : > { %v707_v61 = vadd.f32 %v699_v36, %v691_v35  ;;  %v2265_v58 = vpop.xlane.xlu1 %857  ;;  %v1121_v44 = vmul.f32 %v2190_v14, %v1105_v62  ;;  %v536_v20 = vmul.f32 %v2208_v18, %v2208_v18  ;;  %v2275_v11 = vmul.f32 0.0625, %v2192_v17 }
 0x200   : > { %v1146_v23 = vadd.f32 %v1138_v7, %v1130_v57  ;;  %v2278_v9 = vmul.f32 0.0625, %v2185_v13  ;;  %v1137_v56 = vmul.f32 %v1113_v1, %v1870_v26  ;;  %v2284_v60 = vmul.f32 0.0625, %v964_v24 }
 0x201   : > { %715 = vst.msk [vmem:[%s2247_s28] sm:$0xff] %vm252_vm0, %v707_v61  ;;  %v1129_v55 = vsub.f32 %v2204_v51, %v1121_v44  ;;  %v2286_v16 = vmul.f32 0.0625, %v963_v32  ;;  %v537_v28 = vmul.f32 %v2261_v19, %v2261_v19  ;;  %v592_v17 = vmul.f32 %v2263_v25, %v2263_v25 }
 0x202   : > { %1291 = vst.msk [vmem:[%s2247_s28 + $0x18] sm:$0xff] %vm252_vm0, %v1146_v23  ;;  %v486_v27 = vpop.xlane.xlu0 %485  ;;  %v593_v26 = vmul.f32 %v2268_v54, %v2268_v54  ;;  %v988_v12 = vmul.f32 %v2275_v11, %v2275_v11  ;;  %v987_v59 = vmul.f32 %v2278_v9, %v2278_v9 }
 0x203   : > { %v489_v13 = vpop.xlane.xlu1 %488  ;;  %v528_v3 = vmul.f32 0.0625, %v486_v27  ;;  %v576_v4 = vsub.f32 %v2179_v63, %v486_v27  ;;  %v1145_v5 = vadd.f32 %v1137_v56, %v1129_v55  ;;  %v1044_v63 = vmul.f32 %v2284_v60, %v2284_v60 }
 0x204   : > { %v529_v30 = vmul.f32 0.0625, %v489_v13  ;;  %v577_v6 = vsub.f32 %v2181_v52, %v489_v13  ;;  %v1043_v22 = vmul.f32 %v2286_v16, %v2286_v16 }
 0x205   : > { %v544_v0 = vsub.f32 %v528_v3, %v536_v20  ;;  %v584_v8 = vmul.f32 0.0625, %v576_v4  ;;  %1290 = vst.msk [vmem:[%s2247_s28 + $0x8] sm:$0xff] %vm252_vm0, %v1145_v5 }
 0x206   : > { %v545_v15 = vsub.f32 %v529_v30, %v537_v28  ;;  %v585_v29 = vmul.f32 0.0625, %v577_v6  ;;  %v937_v32 = vpop.xlane.xlu0 %936 }
 0x207   : > { %v552_v52 = vmax.f32 %v544_v0, 0.0  ;;  %v600_v35 = vsub.f32 %v584_v8, %v592_v17  ;;  %v940_v36 = vpop.xlane.xlu1 %939  ;;  %v979_v39 = vmul.f32 0.0625, %v937_v32  ;;  %v1027_v48 = vsub.f32 %v2199_v40, %v937_v32 }
 0x208   : > { %v553_v57 = vmax.f32 %v545_v15, 0.0  ;;  %v601_v7 = vsub.f32 %v585_v29, %v593_v26  ;;  %v980_v1 = vmul.f32 0.0625, %v940_v36  ;;  %v1028_v24 = vsub.f32 %v2210_v47, %v940_v36 }
 0x209   : > { %v560_v61 = vadd.f32 1e-05, %v552_v52  ;;  %v608_v62 = vmax.f32 %v600_v35, 0.0  ;;  %v995_v23 = vsub.f32 %v979_v39, %v987_v59  ;;  %v1035_v44 = vmul.f32 0.0625, %v1027_v48 }
 0x20a   : > { %v561_v20 = vadd.f32 1e-05, %v553_v57  ;;  %v609_v55 = vmax.f32 %v601_v7, 0.0  ;;  %v996_v56 = vsub.f32 %v980_v1, %v988_v12  ;;  %v1036_v27 = vmul.f32 0.0625, %v1028_v24  ;;  %v2308_v28 = vpop.xlane.xlu0 %459 }
 0x20b   : > { %1465 = vrsqrt.f32 %v560_v61  ;;  %v616_v17 = vadd.f32 1e-05, %v608_v62  ;;  %v1003_v13 = vmax.f32 %v995_v23, 0.0  ;;  %v1051_v3 = vsub.f32 %v1035_v44, %v1043_v22  ;;  %v2310_v40 = vpop.xlane.xlu1 %462 }
 0x20c   : > { %1467 = vrsqrt.f32 %v561_v20  ;;  %v617_v4 = vadd.f32 1e-05, %v609_v55  ;;  %v1004_v5 = vmax.f32 %v996_v56, 0.0  ;;  %v1052_v47 = vsub.f32 %v1036_v27, %v1044_v63 }
 0x20d   : > { %1469 = vrsqrt.f32 %v616_v17  ;;  %v1011_v26 = vadd.f32 1e-05, %v1003_v13  ;;  %v1059_v30 = vmax.f32 %v1051_v3, 0.0  ;;  %v2319_v63 = vmul.f32 0.0625, %v2310_v40 }
 0x20e   : > { %1471 = vrsqrt.f32 %v617_v4  ;;  %v1012_v6 = vadd.f32 1e-05, %v1004_v5  ;;  %v1060_v59 = vmax.f32 %v1052_v47, 0.0  ;;  %v2312_v12 = vpop.xlane.xlu0 %910  ;;  %v515_v39 = vsub.f32 %v2236_v10, %v2310_v40 }
 0x20f   : > { %1473 = vrsqrt.f32 %v1011_v26  ;;  %v1067_v0 = vadd.f32 1e-05, %v1059_v30  ;;  %v2314_v8 = vpop.xlane.xlu1 %913  ;;  %v2329_v48 = vmul.f32 %v2319_v63, %v2319_v63  ;;  %v2332_v57 = vmul.f32 0.0625, %v2308_v28 }
 0x210   : > { %1475 = vrsqrt.f32 %v1012_v6  ;;  %v1068_v22 = vadd.f32 1e-05, %v1060_v59  ;;  %v514_v10 = vsub.f32 %v2228_v2, %v2308_v28  ;;  %v965_v2 = vsub.f32 %v2256_v43, %v2312_v12 }
 0x211   : > { %1477 = vrsqrt.f32 %v1067_v0 }
 0x212   : > { %1479 = vrsqrt.f32 %v1068_v22  ;;  %v2316_v15 = vpop.xlane.xlu0 %427 }
 0x213   : > { %v2321_v29 = vpop.xlane.xlu1 %430 }
 0x215   : > { %v1466_v32 = vpop.eup %1465 }
 0x216   : > { %v1468_v52 = vpop.eup %1467  ;;  %v2323_v35 = vpop.xlane.xlu0 %878  ;;  %v641_v61 = vmul.f32 %v1466_v32, %v2208_v18 }
 0x217   : > { %v1470_v36 = vpop.eup %1469  ;;  %v2334_v7 = vpop.xlane.xlu1 %881  ;;  %v642_v20 = vmul.f32 %v1468_v52, %v2261_v19 }
 0x218   : > { %v1472_v1 = vpop.eup %1471  ;;  %v633_v24 = vsel %vm245_vm1, %v1466_v32, %v1470_v36  ;;  %v649_v62 = vmul.f32 %v1470_v36, %v2263_v25  ;;  %v966_v25 = vsub.f32 %v2265_v58, %v2314_v8  ;;  %v2383_v36 = vmul.f32 0.0625, %v515_v39 }
 0x219   : > { %v1474_v23 = vpop.eup %1473  ;;  %v634_v44 = vsel %vm245_vm1, %v1468_v52, %v1472_v1  ;;  %v650_v55 = vmul.f32 %v1472_v1, %v2268_v54  ;;  %v671_v56 = vmul.f32 %v2190_v14, %v633_v24  ;;  %v2400_v39 = vmul.f32 0.0625, %v2312_v12 }
 0x21a   : > { %v1476_v27 = vpop.eup %1475  ;;  %v672_v17 = vmul.f32 %v2190_v14, %v634_v44  ;;  %v657_v18 = vsel %vm245_vm1, %v641_v61, %v649_v62  ;;  %v2354_v28 = vpop.xlane.xlu0 %409  ;;  %v1091_v40 = vmul.f32 %v1474_v23, %v2278_v9  ;;  %v538_v61 = vmul.f32 %v2332_v57, %v2332_v57 }
 0x21b   : > { %v1478_v13 = vpop.eup %1477  ;;  %v658_v19 = vsel %vm245_vm1, %v642_v20, %v650_v55  ;;  %v679_v54 = vmul.f32 %v2190_v14, %v657_v18  ;;  %v701_v3 = vmul.f32 %v671_v56, %v1886_v33  ;;  %v2361_v4 = vpop.xlane.xlu1 %412  ;;  %v1092_v47 = vmul.f32 %v1476_v27, %v2275_v11 }
 0x21c   : > { %v1480_v5 = vpop.eup %1479  ;;  %v680_v58 = vmul.f32 %v2190_v14, %v658_v19  ;;  %v1083_v43 = vsel %vm245_vm1, %v1474_v23, %v1478_v13  ;;  %v1099_v26 = vmul.f32 %v1478_v13, %v2286_v16  ;;  %v702_v0 = vmul.f32 %v1882_v31, %v672_v17 }
 0x21d   : > { %v693_v30 = vsub.f32 %v2204_v51, %v679_v54  ;;  %v1084_v6 = vsel %vm245_vm1, %v1476_v27, %v1480_v5  ;;  %v1100_v33 = vmul.f32 %v1480_v5, %v2284_v60  ;;  %v1115_v9 = vmul.f32 %v2190_v14, %v1083_v43 }
 0x21e   : > { %v694_v59 = vsub.f32 %v2204_v51, %v680_v58  ;;  %v1116_v11 = vmul.f32 %v2190_v14, %v1084_v6  ;;  %v1107_v22 = vsel %vm245_vm1, %v1091_v40, %v1099_v26  ;;  %v2378_v16 = vpop.xlane.xlu0 %860  ;;  %v2391_v62 = vmul.f32 0.0625, %v2314_v8 }
 0x21f   : > { %v709_v32 = vadd.f32 %v701_v3, %v693_v30  ;;  %v1108_v52 = vsel %vm245_vm1, %v1092_v47, %v1100_v33  ;;  %v1123_v60 = vmul.f32 %v2190_v14, %v1107_v22  ;;  %v2385_v1 = vpop.xlane.xlu1 %863  ;;  %v1139_v44 = vmul.f32 %v1115_v9, %v1894_v37 }
 0x220   : > { %v710_v24 = vadd.f32 %v702_v0, %v694_v59  ;;  %v1124_v31 = vmul.f32 %v2190_v14, %v1108_v52  ;;  %v2397_v20 = vmul.f32 0.0625, %v514_v10  ;;  %v1140_v56 = vmul.f32 %v1888_v34, %v1116_v11 }
 0x221   : > { %717 = vst.msk [vmem:[%s2247_s28 + $0x20] sm:$0xff] %vm252_vm0, %v709_v32  ;;  %v1131_v23 = vsub.f32 %v2204_v51, %v1123_v60  ;;  %v2406_v8 = vmul.f32 0.0625, %v966_v25  ;;  %v2408_v27 = vmul.f32 0.0625, %v965_v2  ;;  %v595_v37 = vmul.f32 %v2383_v36, %v2383_v36 }
 0x222   : > { %718 = vst.msk [vmem:[%s2247_s28 + $0x30] sm:$0xff] %vm252_vm0, %v710_v24  ;;  %v1132_v55 = vsub.f32 %v2204_v51, %v1124_v31  ;;  %v492_v17 = vpop.xlane.xlu0 %491  ;;  %v990_v54 = vmul.f32 %v2391_v62, %v2391_v62  ;;  %v594_v25 = vmul.f32 %v2397_v20, %v2397_v20  ;;  %v989_v2 = vmul.f32 %v2400_v39, %v2400_v39 }
 0x223   : > { %v1147_v18 = vadd.f32 %v1139_v44, %v1131_v23  ;;  %v495_v10 = vpop.xlane.xlu1 %494  ;;  %v530_v12 = vmul.f32 0.0625, %v492_v17  ;;  %v578_v13 = vsub.f32 %v2316_v15, %v492_v17  ;;  %v1046_v15 = vmul.f32 %v2406_v8, %v2406_v8 }
 0x224   : > { %v1148_v19 = vadd.f32 %v1140_v56, %v1132_v55  ;;  %v531_v3 = vmul.f32 0.0625, %v495_v10  ;;  %v579_v34 = vsub.f32 %v2321_v29, %v495_v10  ;;  %v1045_v58 = vmul.f32 %v2408_v27, %v2408_v27 }
 0x225   : > { %1292 = vst.msk [vmem:[%s2247_s28 + $0x28] sm:$0xff] %vm252_vm0, %v1147_v18  ;;  %v546_v40 = vsub.f32 %v530_v12, %v538_v61  ;;  %v586_v5 = vmul.f32 0.0625, %v578_v13 }
 0x226   : > { %1293 = vst.msk [vmem:[%s2247_s28 + $0x38] sm:$0xff] %vm252_vm0, %v1148_v19  ;;  %v547_v29 = vsub.f32 %v531_v3, %v2329_v48  ;;  %v587_v47 = vmul.f32 0.0625, %v579_v34  ;;  %v943_v43 = vpop.xlane.xlu0 %942 }
 0x227   : > { %v554_v26 = vmax.f32 %v546_v40, 0.0  ;;  %v602_v30 = vsub.f32 %v586_v5, %v594_v25  ;;  %v946_v6 = vpop.xlane.xlu1 %945  ;;  %v981_v33 = vmul.f32 0.0625, %v943_v43  ;;  %v1029_v9 = vsub.f32 %v2323_v35, %v943_v43 }
 0x228   : > { %v555_v59 = vmax.f32 %v547_v29, 0.0  ;;  %v603_v0 = vsub.f32 %v587_v47, %v595_v37  ;;  %v982_v11 = vmul.f32 0.0625, %v946_v6  ;;  %v1030_v22 = vsub.f32 %v2334_v7, %v946_v6 }
 0x229   : > { %v562_v32 = vadd.f32 1e-05, %v554_v26  ;;  %v610_v52 = vmax.f32 %v602_v30, 0.0  ;;  %v997_v60 = vsub.f32 %v981_v33, %v989_v2  ;;  %v1037_v24 = vmul.f32 0.0625, %v1029_v9 }
 0x22a   : > { %v563_v31 = vadd.f32 1e-05, %v555_v59  ;;  %v611_v61 = vmax.f32 %v603_v0, 0.0  ;;  %v998_v48 = vsub.f32 %v982_v11, %v990_v54  ;;  %v1038_v23 = vmul.f32 0.0625, %v1030_v22  ;;  %v466_v44 = vpop.xlane.xlu0 %465 }
 0x22b   : > { %1481 = vrsqrt.f32 %v562_v32  ;;  %v618_v55 = vadd.f32 1e-05, %v610_v52  ;;  %v1005_v56 = vmax.f32 %v997_v60, 0.0  ;;  %v1053_v17 = vsub.f32 %v1037_v24, %v1045_v58  ;;  %v469_v18 = vpop.xlane.xlu1 %468 }
 0x22c   : > { %1483 = vrsqrt.f32 %v563_v31  ;;  %v619_v35 = vadd.f32 1e-05, %v611_v61  ;;  %v1006_v37 = vmax.f32 %v998_v48, 0.0  ;;  %v1054_v10 = vsub.f32 %v1038_v23, %v1046_v15 }
 0x22d   : > { %1485 = vrsqrt.f32 %v618_v55  ;;  %v1013_v7 = vadd.f32 1e-05, %v1005_v56  ;;  %v1061_v12 = vmax.f32 %v1053_v17, 0.0  ;;  %v517_v34 = vsub.f32 %v2361_v4, %v469_v18 }
 0x22e   : > { %1487 = vrsqrt.f32 %v619_v35  ;;  %v1014_v13 = vadd.f32 1e-05, %v1006_v37  ;;  %v1062_v19 = vmax.f32 %v1054_v10, 0.0  ;;  %v917_v3 = vpop.xlane.xlu0 %916  ;;  %v516_v40 = vsub.f32 %v2354_v28, %v466_v44 }
 0x22f   : > { %1489 = vrsqrt.f32 %v1013_v7  ;;  %v1069_v54 = vadd.f32 1e-05, %v1061_v12  ;;  %v920_v25 = vpop.xlane.xlu1 %919  ;;  %v2434_v15 = vmul.f32 0.0625, %v469_v18  ;;  %v2436_v58 = vmul.f32 0.0625, %v466_v44 }
 0x230   : > { %1491 = vrsqrt.f32 %v1014_v13  ;;  %v1070_v2 = vadd.f32 1e-05, %v1062_v19  ;;  %v968_v5 = vsub.f32 %v2385_v1, %v920_v25  ;;  %v2440_v47 = vmul.f32 0.0625, %v517_v34 }
 0x231   : > { %1493 = vrsqrt.f32 %v1069_v54  ;;  %v2442_v43 = vmul.f32 0.0625, %v516_v40  ;;  %v2444_v4 = vmul.f32 0.0625, %v920_v25  ;;  %v2446_v26 = vmul.f32 0.0625, %v917_v3 }
 0x232   : > { %1495 = vrsqrt.f32 %v1070_v2  ;;  %v2438_v29 = vpop.xlane.xlu0 %433  ;;  %v2450_v28 = vmul.f32 0.0625, %v968_v5  ;;  %v541_v33 = vmul.f32 %v2434_v15, %v2434_v15  ;;  %v2456_v9 = vmul.f32 %v2436_v58, %v2436_v58 }
 0x233   : > { %v2448_v30 = vpop.xlane.xlu1 %436  ;;  %v967_v59 = vsub.f32 %v2378_v16, %v917_v3  ;;  %v2463_v22 = vmul.f32 %v2440_v47, %v2440_v47  ;;  %v2467_v32 = vmul.f32 %v2442_v43, %v2442_v43  ;;  %v2471_v52 = vmul.f32 %v2444_v4, %v2444_v4 }
 0x234   : > { %v2475_v60 = vmul.f32 %v2446_v26, %v2446_v26  ;;  %v2485_v23 = vmul.f32 %v2450_v28, %v2450_v28 }
 0x235   : > { %v1482_v1 = vpop.eup %1481  ;;  %v2496_v10 = vmul.f32 0.0625, %v967_v59 }
 0x236   : > { %v1484_v6 = vpop.eup %1483  ;;  %v2459_v0 = vpop.xlane.xlu0 %884  ;;  %v643_v61 = vmul.f32 %v1482_v1, %v2332_v57 }
 0x237   : > { %v1486_v11 = vpop.eup %1485  ;;  %v2477_v16 = vpop.xlane.xlu1 %887  ;;  %v644_v56 = vmul.f32 %v1484_v6, %v2319_v63 }
 0x238   : > { %v1488_v24 = vpop.eup %1487  ;;  %v635_v31 = vsel %vm245_vm1, %v1482_v1, %v1486_v11  ;;  %v651_v48 = vmul.f32 %v1486_v11, %v2397_v20 }
 0x239   : > { %v1490_v44 = vpop.eup %1489  ;;  %v636_v55 = vsel %vm245_vm1, %v1484_v6, %v1488_v24  ;;  %v652_v17 = vmul.f32 %v1488_v24, %v2383_v36  ;;  %v673_v18 = vmul.f32 %v2190_v14, %v635_v31 }
 0x23a   : > { %v1492_v35 = vpop.eup %1491  ;;  %v674_v37 = vmul.f32 %v2190_v14, %v636_v55  ;;  %v659_v57 = vsel %vm245_vm1, %v643_v61, %v651_v48  ;;  %v1093_v20 = vmul.f32 %v1490_v44, %v2400_v39  ;;  %v498_v2 = vpop.xlane.xlu0 %497 }
 0x23b   : > { %v1494_v7 = vpop.eup %1493  ;;  %v660_v12 = vsel %vm245_vm1, %v644_v56, %v652_v17  ;;  %v681_v63 = vmul.f32 %v2190_v14, %v659_v57  ;;  %v703_v36 = vmul.f32 %v673_v18, %v1902_v41  ;;  %v1094_v13 = vmul.f32 %v1492_v35, %v2391_v62  ;;  %v501_v19 = vpop.xlane.xlu1 %500 }
 0x23c   : > { %v1496_v3 = vpop.eup %1495  ;;  %v682_v54 = vmul.f32 %v2190_v14, %v660_v12  ;;  %v704_v34 = vmul.f32 %v1896_v38, %v674_v37  ;;  %v1085_v39 = vsel %vm245_vm1, %v1490_v44, %v1494_v7  ;;  %v1101_v25 = vmul.f32 %v1494_v7, %v2408_v27 }
 0x23d   : > { %v695_v40 = vsub.f32 %v2204_v51, %v681_v63  ;;  %v1086_v5 = vsel %vm245_vm1, %v1492_v35, %v1496_v3  ;;  %v1102_v41 = vmul.f32 %v1496_v3, %v2406_v8  ;;  %v1117_v62 = vmul.f32 %v2190_v14, %v1085_v39 }
 0x23e   : > { %v696_v1 = vsub.f32 %v2204_v51, %v682_v54  ;;  %v1118_v38 = vmul.f32 %v2190_v14, %v1086_v5  ;;  %v1109_v6 = vsel %vm245_vm1, %v1093_v20, %v1101_v25  ;;  %v533_v27 = vmul.f32 0.0625, %v501_v19 }
 0x23f   : > { %v711_v59 = vadd.f32 %v703_v36, %v695_v40  ;;  %v1110_v11 = vsel %vm245_vm1, %v1094_v13, %v1102_v41  ;;  %v1125_v24 = vmul.f32 %v2190_v14, %v1109_v6  ;;  %v1141_v31 = vmul.f32 %v1117_v62, %v1909_v45  ;;  %v952_v8 = vpop.xlane.xlu1 %951 }
 0x240   : > { %v712_v61 = vadd.f32 %v704_v34, %v696_v1  ;;  %v1126_v48 = vmul.f32 %v2190_v14, %v1110_v11  ;;  %v1142_v44 = vmul.f32 %v1904_v42, %v1118_v38  ;;  %v549_v55 = vsub.f32 %v533_v27, %v541_v33  ;;  %v949_v33 = vpop.xlane.xlu0 %948 }
 0x241   : > { %719 = vst.msk [vmem:[%s2247_s28 + $0x40] sm:$0xff] %vm252_vm0, %v711_v59  ;;  %v1133_v56 = vsub.f32 %v2204_v51, %v1125_v24  ;;  %v581_v17 = vsub.f32 %v2448_v30, %v501_v19  ;;  %v532_v18 = vmul.f32 0.0625, %v498_v2  ;;  %v580_v35 = vsub.f32 %v2438_v29, %v498_v2 }
 0x242   : > { %720 = vst.msk [vmem:[%s2247_s28 + $0x50] sm:$0xff] %vm252_vm0, %v712_v61  ;;  %v1134_v45 = vsub.f32 %v2204_v51, %v1126_v48  ;;  %v557_v37 = vmax.f32 %v549_v55, 0.0  ;;  %v984_v57 = vmul.f32 0.0625, %v952_v8  ;;  %v1032_v42 = vsub.f32 %v2477_v16, %v952_v8 }
 0x243   : > { %v1149_v20 = vadd.f32 %v1141_v31, %v1133_v56  ;;  %v589_v7 = vmul.f32 0.0625, %v581_v17  ;;  %v548_v12 = vsub.f32 %v532_v18, %v2456_v9  ;;  %v588_v63 = vmul.f32 0.0625, %v580_v35 }
 0x244   : > { %v1150_v30 = vadd.f32 %v1142_v44, %v1134_v45  ;;  %v565_v36 = vadd.f32 1e-05, %v557_v37  ;;  %v1000_v13 = vsub.f32 %v984_v57, %v2471_v52  ;;  %v1040_v29 = vmul.f32 0.0625, %v1032_v42 }
 0x245   : > { %1294 = vst.msk [vmem:[%s2247_s28 + $0x48] sm:$0xff] %vm252_vm0, %v1149_v20  ;;  %v605_v19 = vsub.f32 %v589_v7, %v2463_v22  ;;  %v556_v3 = vmax.f32 %v548_v12, 0.0  ;;  %v604_v54 = vsub.f32 %v588_v63, %v2467_v32  ;;  %v983_v34 = vmul.f32 0.0625, %v949_v33 }
 0x246   : > { %1295 = vst.msk [vmem:[%s2247_s28 + $0x58] sm:$0xff] %vm252_vm0, %v1150_v30  ;;  %v1047_v16 = vmul.f32 %v2496_v10, %v2496_v10  ;;  %v1008_v9 = vmax.f32 %v1000_v13, 0.0  ;;  %v1056_v39 = vsub.f32 %v1040_v29, %v2485_v23  ;;  %v1031_v25 = vsub.f32 %v2459_v0, %v949_v33 }
 0x247   : > { %v613_v52 = vmax.f32 %v605_v19, 0.0  ;;  %v564_v2 = vadd.f32 1e-05, %v556_v3  ;;  %v612_v40 = vmax.f32 %v604_v54, 0.0  ;;  %v999_v5 = vsub.f32 %v983_v34, %v2475_v60 }
 0x248   : > { %1497 = vrsqrt.f32 %v565_v36  ;;  %v1016_v22 = vadd.f32 1e-05, %v1008_v9  ;;  %v1064_v41 = vmax.f32 %v1056_v39, 0.0  ;;  %v1039_v32 = vmul.f32 0.0625, %v1031_v25 }
 0x249   : > { %v621_v62 = vadd.f32 1e-05, %v613_v52  ;;  %1499 = vrsqrt.f32 %v564_v2  ;;  %v620_v1 = vadd.f32 1e-05, %v612_v40  ;;  %v1007_v38 = vmax.f32 %v999_v5, 0.0 }
 0x24a   : > { %1501 = vrsqrt.f32 %v1016_v22  ;;  %v1072_v6 = vadd.f32 1e-05, %v1064_v41  ;;  %v1055_v27 = vsub.f32 %v1039_v32, %v1047_v16 }
 0x24b   : > { %1503 = vrsqrt.f32 %v621_v62  ;;  %v1015_v23 = vadd.f32 1e-05, %v1007_v38 }
 0x24c   : > { %1505 = vrsqrt.f32 %v620_v1  ;;  %v1063_v0 = vmax.f32 %v1055_v27, 0.0 }
 0x24d   : > { %1507 = vrsqrt.f32 %v1072_v6 }
 0x24e   : > { %v1071_v59 = vadd.f32 1e-05, %v1063_v0  ;;  %1509 = vrsqrt.f32 %v1015_v23 }
 0x250   : > { %1511 = vrsqrt.f32 %v1071_v59 }
 0x252   : > { %v1498_v60 = vpop.eup %1497 }
 0x253   : > { %v1500_v11 = vpop.eup %1499  ;;  %v646_v48 = vmul.f32 %v1498_v60, %v2434_v15 }
 0x254   : > { %v1502_v24 = vpop.eup %1501  ;;  %v645_v55 = vmul.f32 %v1500_v11, %v2436_v58 }
 0x255   : > { %v1504_v31 = vpop.eup %1503  ;;  %v1096_v45 = vmul.f32 %v1502_v24, %v2444_v4 }
 0x256   : > { %v1506_v8 = vpop.eup %1505  ;;  %v638_v61 = vsel %vm245_vm1, %v1498_v60, %v1504_v31  ;;  %v654_v44 = vmul.f32 %v1504_v31, %v2440_v47 }
 0x257   : > { %v1508_v56 = vpop.eup %1507  ;;  %v676_v17 = vmul.f32 %v2190_v14, %v638_v61  ;;  %v637_v18 = vsel %vm245_vm1, %v1500_v11, %v1506_v8  ;;  %v653_v35 = vmul.f32 %v1506_v8, %v2442_v43 }
 0x258   : > { %v662_v37 = vsel %vm245_vm1, %v646_v48, %v654_v44  ;;  %v675_v57 = vmul.f32 %v2190_v14, %v637_v18  ;;  %v1088_v15 = vsel %vm245_vm1, %v1502_v24, %v1508_v56  ;;  %v1104_v58 = vmul.f32 %v1508_v56, %v2450_v28  ;;  %v1510_v47 = vpop.eup %1509 }
 0x259   : > { %v684_v42 = vmul.f32 %v2190_v14, %v662_v37  ;;  %v661_v33 = vsel %vm245_vm1, %v645_v55, %v653_v35  ;;  %v1120_v43 = vmul.f32 %v2190_v14, %v1088_v15  ;;  %v706_v63 = vmul.f32 %v1911_v46, %v676_v17 }
 0x25a   : > { %v1512_v20 = vpop.eup %1511  ;;  %v683_v4 = vmul.f32 %v2190_v14, %v661_v33  ;;  %v1112_v7 = vsel %vm245_vm1, %v1096_v45, %v1104_v58  ;;  %v705_v13 = vmul.f32 %v675_v57, %v1916_v49  ;;  %v1095_v29 = vmul.f32 %v1510_v47, %v2446_v26 }
 0x25b   : > { %v698_v12 = vsub.f32 %v2204_v51, %v684_v42  ;;  %v1128_v28 = vmul.f32 %v2190_v14, %v1112_v7  ;;  %v1087_v30 = vsel %vm245_vm1, %v1510_v47, %v1512_v20  ;;  %v1103_v19 = vmul.f32 %v1512_v20, %v2496_v10 }
 0x25c   : > { %v697_v36 = vsub.f32 %v2204_v51, %v683_v4  ;;  %v1144_v54 = vmul.f32 %v1918_v50, %v1120_v43  ;;  %v1119_v34 = vmul.f32 %v2190_v14, %v1087_v30 }
 0x25d   : > { %v714_v3 = vadd.f32 %v706_v63, %v698_v12  ;;  %v1136_v46 = vsub.f32 %v2204_v51, %v1128_v28  ;;  %v1111_v9 = vsel %vm245_vm1, %v1095_v29, %v1103_v19 }
 0x25e   : > { %v713_v16 = vadd.f32 %v705_v13, %v697_v36  ;;  %v1127_v26 = vmul.f32 %v2190_v14, %v1111_v9  ;;  %v1143_v10 = vmul.f32 %v1119_v34, %v1923_v53 }
 0x25f   : > { %722 = vst.msk [vmem:[%s2247_s28 + $0x70] sm:$0xff] %vm252_vm0, %v714_v3  ;;  %v1152_v49 = vadd.f32 %v1144_v54, %v1136_v46 }
 0x260   : > { %721 = vst.msk [vmem:[%s2247_s28 + $0x60] sm:$0xff] %vm252_vm0, %v713_v16  ;;  %v1135_v50 = vsub.f32 %v2204_v51, %v1127_v26 }
 0x261   : > { %1297 = vst.msk [vmem:[%s2247_s28 + $0x78] sm:$0xff] %vm252_vm0, %v1152_v49 }
 0x262   : > { %v1151_v21 = vadd.f32 %v1143_v10, %v1135_v50 }
 0x264   : > { %1296 = vst.msk [vmem:[%s2247_s28 + $0x68] sm:$0xff] %vm252_vm0, %v1151_v21 }
 0x265   : > { %1584 = shalt.err (!%p1581_p7)
}
 0x266   : > { %s1585_s6 = scalar_lea.hbm %s2596_s8, 2048  ;;  %s1589_s12 = scalar_lea.hbm %s2648_s4, 4096 }
 0x267   : > { %p1586_p9 = scmp.ne.s32.totalorder %s2596_s8, %s1585_s6  ;;  %p1590_p5 = scmp.lt.u32.totalorder %s2596_s8, %s2648_s4 }
 0x268   : > { %p1591_p11 = scmp.lt.u32.totalorder %s1589_s12, %s1585_s6  ;;  %p1593_p4 = scmp.lt.u32.totalorder %s1585_s6, %s2596_s8 }
 0x269   : > { %p1587_p1 = pnand %p1586_p9, %p1770_p12 }
 0x26a   : > { %p1592_p2 = por %p1591_p11, %p1590_p5 }
 0x26b   : > { %p1588_p0 = pneg %p1587_p1 }
 0x26c   : > { %p1594_p6 = por %p1593_p4, %p1592_p2 }
 0x26e   : > { %p1595_p8 = pnand %p1594_p6, %p1588_p0 }
 0x270   : > { %1598 = shalt.err (!%p1595_p8)
}
 0x271   : > { %s1649_s28 = smov 128   ;;  %s1650_s29 = smov 8  }
 0x272   : > { %1393 = dma.vmem_to_hbm [thread:$0]  (%p1770_p12), %s2598_s10, 2048, %s2596_s8, %s1163_s19, %s1649_s28, %s1649_s28, %s1650_s29  }
 0x273 PF: > { %s1192_s7 = sand.u32 1, %s1629_s15   ;;  %p2663_p10 = scmp.ne.s32.totalorder %s2653_s22, 0 }
 0x274   : > { %p2664_p13 = scmp.ge.s32.totalorder %s1641_s18, 2  ;;  %s1193_s26 = scalar_lea.sflag [#allocation4], %s1192_s7 }
 0x276   : > { %p1404_p3 = pnand %p2664_p13, %p2663_p10 }
 0x278   : > { %1624 = dma.done.wait (!%p1404_p3), %s1193_s26, 2048  }
 0x279   : > { %1626 = vsyncadd (!%p1404_p3), %s1193_s26, 4294965248  ;;  %p18_p7 = scmp.ge.s32.totalorder %s1732_s27, 4   ;;  %s2665_s15 = smov %s1633_s16 }
 0x27a   : > { %s2666_s16 = smov %s1637_s17  ;;  %s2667_s17 = smov %s1766_s24 }
 0x27b   : > { %s2668_s18 = smov %s1732_s27  ;;  %20 = sbr.rel (!%p18_p7) target bundleno = 6 (0x6), region = 87 }
 0x282   :  { %1198 = vsyncpa [#allocation3], 1 }
 0x283   :  { %1200 = vsyncpa [#allocation3 + $0x1], 1 }
 0x284   :  { %1201 = vsyncpa [#allocation6], 1 }
 0x285   :  { %1202 = vsyncpa [#allocation4], 1 }
 0x286   :  { %1204 = vsyncpa [#allocation4 + $0x1], 1 }

</bundles_post_ra>
